<compile_context>
chip_gen: v5e
topology: v5e:2x2
jax: 0.10.0
libtpu: 0.0.40
codegen_flags: <defaults>
</compile_context>

<pallas_src>
import math
import numpy as np

import jax
import jax.numpy as jnp
from jax import lax
from jax.experimental import pallas as pl
from jax.experimental.pallas import tpu as pltpu

# ----------------------------- configuration (small) ------------------------
B = 2             # batch
S = 8             # sequence length
E = 32            # embedding_size (== hidden_size; ACT's previous_state
                  #  = zeros_like(inputs) mixing requires E == H)
H = 32            # hidden_size
NUM_HEADS = 4
KEY_DEPTH = 32    # total_key_depth
VAL_DEPTH = 32    # total_value_depth
FILTER = 64       # filter_size
NUM_LAYERS = 2    # num_layers == max_hop for the universal path
MAX_LENGTH = 64
ACT_THRESHOLD = 1.0 - 0.1
LN_EPS = 1e-6

BS = B * S
HD_K = KEY_DEPTH // NUM_HEADS
HD_V = VAL_DEPTH // NUM_HEADS


# ----------------------------- timing signals --------------------------------
def _gen_timing_signal(length, channels, min_timescale=1.0, max_timescale=1.0e4):
    position = np.arange(length, dtype=np.float64)
    num_timescales = channels // 2
    log_inc = math.log(float(max_timescale) / float(min_timescale)) / max(num_timescales - 1, 1)
    inv_timescales = min_timescale * np.exp(
        np.arange(num_timescales, dtype=np.float64) * -log_inc)
    scaled_time = position[:, None] * inv_timescales[None, :]
    signal = np.concatenate([np.sin(scaled_time), np.cos(scaled_time)], axis=1)
    signal = np.pad(signal, [[0, 0], [0, channels % 2]])
    return jnp.asarray(signal, dtype=jnp.float32).reshape(1, length, channels)


_TIMING = _gen_timing_signal(MAX_LENGTH, H)       # timing_signal   (1, max_length, H)
_POSITION = _gen_timing_signal(NUM_LAYERS, H)     # position_signal (1, num_layers, H)


# ----------------------------- parameters ------------------------------------
# Kernel-side parameter order (w_p is passed transposed as (1, H); b_p goes to SMEM).
PARAM_NAMES = ('w_proj', 'w_p_t',
               'ln_mha_g', 'ln_mha_b',
               'w_q', 'w_k', 'w_v', 'w_o',
               'ln_ffn_g', 'ln_ffn_b',
               'w_f1', 'b_f1', 'w_f2', 'b_f2',
               'ln_out_g', 'ln_out_b')


def init_params(key):
    ks = jax.random.split(key, 8)

    def w(k, shape):
        return jax.random.normal(k, shape, jnp.float32) * (1.0 / math.sqrt(shape[0]))

    return dict(
        w_proj=w(ks[0], (E, H)),                          # embedding_proj (no bias)
        w_p=w(ks[1], (H, 1)),                             # ACT halting linear
        b_p=jnp.ones((1, 1), jnp.float32),                # p.bias.data.fill_(1)
        ln_mha_g=jnp.ones((1, H), jnp.float32),
        ln_mha_b=jnp.zeros((1, H), jnp.float32),
        w_q=w(ks[2], (H, KEY_DEPTH)),
        w_k=w(ks[3], (H, KEY_DEPTH)),
        w_v=w(ks[4], (H, VAL_DEPTH)),
        w_o=w(ks[5], (VAL_DEPTH, H)),
        ln_ffn_g=jnp.ones((1, H), jnp.float32),
        ln_ffn_b=jnp.zeros((1, H), jnp.float32),
        w_f1=w(ks[6], (H, FILTER)),
        b_f1=jnp.zeros((1, FILTER), jnp.float32),
        w_f2=w(ks[7], (FILTER, H)),
        b_f2=jnp.zeros((1, H), jnp.float32),
        ln_out_g=jnp.ones((1, H), jnp.float32),
        ln_out_b=jnp.zeros((1, H), jnp.float32),
    )


# ----------------------------- shared math -----------------------------------
def _layer_norm(x, g, b):
    mu = jnp.mean(x, axis=-1, keepdims=True)
    var = jnp.mean(jnp.square(x - mu), axis=-1, keepdims=True)
    return g * (x - mu) * lax.rsqrt(var + LN_EPS) + b


# ----------------------------- kernel-side compute ----------------------------
def _encoder_layer_kernel(x, p):
    """Pre-LN MHA + position-wise FFN on the folded (B*S, H) activations.

    `p` maps parameter name -> VMEM Ref; weights are loaded at use-site.
    Per-head weight blocks are sliced from the refs so the activation vregs are
    never lane-sliced, and head outputs are accumulated through the matching
    w_o row block (no lane-axis concatenation of head contexts).
    """
    xn = _layer_norm(x, p['ln_mha_g'][...], p['ln_mha_b'][...])
    scale = 1.0 / math.sqrt(HD_K)

    y_rows = [jnp.zeros((S, H), jnp.float32) for _ in range(B)]
    for h in range(NUM_HEADS):                                    # static unroll
        wq = p['w_q'][:, h * HD_K:(h + 1) * HD_K]                 # (H, hd) loads
        wk = p['w_k'][:, h * HD_K:(h + 1) * HD_K]
        wv = p['w_v'][:, h * HD_V:(h + 1) * HD_V]
        wo = p['w_o'][h * HD_V:(h + 1) * HD_V, :]                 # (hd, H)
        qh = jnp.dot(xn, wq, preferred_element_type=jnp.float32) * scale   # (BS, hd)
        kh = jnp.dot(xn, wk, preferred_element_type=jnp.float32)
        vh = jnp.dot(xn, wv, preferred_element_type=jnp.float32)
        for b in range(B):                                        # per-example softmax
            rows = slice(b * S, (b + 1) * S)                      # sublane-aligned
            logits = jnp.dot(qh[rows], kh[rows].T,
                             preferred_element_type=jnp.float32)  # (S, S)
            attn = jax.nn.softmax(logits, axis=-1)
            ctx = jnp.dot(attn, vh[rows], preferred_element_type=jnp.float32)
            y_rows[b] = y_rows[b] + jnp.dot(ctx, wo,
                                            preferred_element_type=jnp.float32)

    x = x + jnp.concatenate(y_rows, axis=0)                       # (BS, H) residual
    xn2 = _layer_norm(x, p['ln_ffn_g'][...], p['ln_ffn_b'][...])
    hfc = jax.nn.relu(jnp.dot(xn2, p['w_f1'][...],
                              preferred_element_type=jnp.float32) + p['b_f1'][...])
    y2 = jnp.dot(hfc, p['w_f2'][...],
                 preferred_element_type=jnp.float32) + p['b_f2'][...]
    return x + y2


def _act_step_kernel(state, prev, hp, rem, nup, pos_step, timing, p, b_p):
    """One iteration of ACT_basic.forward (decoding=False) on (B*S, .) rows."""
    state = state + timing                    # timing_signal[:, :S, :] (pre-tiled)
    state = state + pos_step                  # position_signal[:, step, :]
    # Halting probability: VPU multiply + lane reduction (no 1-column MXU matmul).
    prob = jax.nn.sigmoid(
        jnp.sum(state * p['w_p_t'][...], axis=-1, keepdims=True) + b_p)     # (BS, 1)
    sr0 = (hp < 1.0).astype(jnp.float32)
    cond = hp + prob * sr0
    new_halted = (cond > ACT_THRESHOLD).astype(jnp.float32) * sr0
    still = (cond <= ACT_THRESHOLD).astype(jnp.float32) * sr0
    hp = hp + prob * still
    rem = rem + new_halted * (1.0 - hp)
    hp = hp + new_halted * rem
    nup = nup + still + new_halted
    uw = prob * still + new_halted * rem
    state = _encoder_layer_kernel(state, p)   # fn(state)
    prev = state * uw + prev * (1.0 - uw)
    return state, prev, hp, rem, nup


def _encoder_kernel(inp_ref, timing_ref, pos_ref, bp_ref, *refs):
    # Keep the weights as Refs; load at use-site (do not hoist into vregs here).
    p = dict(zip(PARAM_NAMES, refs[:len(PARAM_NAMES)]))
    out_ref = refs[len(PARAM_NAMES)]

    x_in = inp_ref[...]                       # (B*S, E) — whole batch, one program
    timing = timing_ref[...]                  # (B*S, H)
    b_p = bp_ref[0, 0]                        # scalar halting bias from SMEM

    # input_dropout(rate=0) is identity; embedding_proj has no bias.
    state = jnp.dot(x_in, p['w_proj'][...], preferred_element_type=jnp.float32)
    prev = jnp.zeros((BS, H), jnp.float32)    # previous_state = zeros_like(inputs) (E == H)
    hp = jnp.zeros((BS, 1), jnp.float32)
    rem = jnp.zeros((BS, 1), jnp.float32)
    nup = jnp.zeros((BS, 1), jnp.float32)

    carry = (state, prev, hp, rem, nup)
    for step in range(NUM_LAYERS):            # fully-unrolled ACT loop (max_hop = 2)
        pos_step = pos_ref[step:step + 1, :]  # static (1, H) read
        carry = _act_step_kernel(*carry, pos_step, timing, p, b_p)
    state, prev, hp, rem, nup = carry

    y = _layer_norm(prev, p['ln_out_g'][...], p['ln_out_b'][...])   # final layer_norm
    # Single merged output slab: [ y | remainders | n_updates ] -> one writeback DMA.
    out_ref[...] = jnp.concatenate([y, rem, nup], axis=-1)


# ----------------------------- wrapper -----------------------------------------
def encoder_forward_pallas(inputs, params):
    x2d = inputs.reshape(BS, E)                            # fold batch into sublanes
    timing = jnp.tile(_TIMING[0, :S, :], (B, 1))           # (B*S, H)
    pos = _POSITION[0]                                     # (NUM_LAYERS, H)

    kparams = dict(params)
    kparams['w_p_t'] = jnp.transpose(params['w_p'])        # (1, H) for VPU halting prob

    vmem = pltpu.MemorySpace.VMEM
    smem = pltpu.MemorySpace.SMEM
    in_specs = ([pl.BlockSpec(memory_space=vmem),          # x2d
                 pl.BlockSpec(memory_space=vmem),          # timing
                 pl.BlockSpec(memory_space=vmem),          # pos
                 pl.BlockSpec(memory_space=smem)]          # b_p scalar
                + [pl.BlockSpec(memory_space=vmem) for _ in PARAM_NAMES])

    out = pl.pallas_call(
        _encoder_kernel,
        out_shape=jax.ShapeDtypeStruct((BS, H + 2), jnp.float32),
        in_specs=in_specs,
        out_specs=pl.BlockSpec(memory_space=vmem),
    )(x2d, timing, pos, params['b_p'], *[kparams[n] for n in PARAM_NAMES])

    y = out[:, :H].reshape(B, S, H)
    rem = out[:, H].reshape(B, S)
    nup = out[:, H + 1].reshape(B, S)
    return y, rem, nup


# ----------------------------- pure-JAX reference -------------------------------
def _encoder_layer_ref(x, p):
    xn = _layer_norm(x, p['ln_mha_g'], p['ln_mha_b'])
    q = jnp.dot(xn, p['w_q'])
    k = jnp.dot(xn, p['w_k'])
    v = jnp.dot(xn, p['w_v'])
    scale = 1.0 / math.sqrt(HD_K)
    ctx_heads = []
    for h in range(NUM_HEADS):
        qh = q[:, h * HD_K:(h + 1) * HD_K] * scale
        kh = k[:, h * HD_K:(h + 1) * HD_K]
        vh = v[:, h * HD_V:(h + 1) * HD_V]
        logits = jnp.dot(qh, kh.T)
        attn = jax.nn.softmax(logits, axis=-1)
        ctx_heads.append(jnp.dot(attn, vh))
    ctx = jnp.concatenate(ctx_heads, axis=-1)
    y = jnp.dot(ctx, p['w_o'])
    x = x + y
    xn2 = _layer_norm(x, p['ln_ffn_g'], p['ln_ffn_b'])
    hfc = jax.nn.relu(jnp.dot(xn2, p['w_f1']) + p['b_f1'])
    y2 = jnp.dot(hfc, p['w_f2']) + p['b_f2']
    return x + y2


def _act_step_ref(state, prev, hp, rem, nup, pos_step, timing, p):
    state = state + timing
    state = state + pos_step
    prob = jax.nn.sigmoid(jnp.dot(state, p['w_p']) + p['b_p'])
    sr0 = (hp < 1.0).astype(jnp.float32)
    cond = hp + prob * sr0
    new_halted = (cond > ACT_THRESHOLD).astype(jnp.float32) * sr0
    still = (cond <= ACT_THRESHOLD).astype(jnp.float32) * sr0
    hp = hp + prob * still
    rem = rem + new_halted * (1.0 - hp)
    hp = hp + new_halted * rem
    nup = nup + still + new_halted
    uw = prob * still + new_halted * rem
    state = _encoder_layer_ref(state, p)
    prev = state * uw + prev * (1.0 - uw)
    return state, prev, hp, rem, nup


def encoder_forward_ref(inputs, params):
    timing = _TIMING[0, :S, :]
    pos = _POSITION[0]

    def per_example(x_in):
        state = jnp.dot(x_in, params['w_proj'])
        prev = jnp.zeros((S, H), jnp.float32)
        hp = jnp.zeros((S, 1), jnp.float32)
        rem = jnp.zeros((S, 1), jnp.float32)
        nup = jnp.zeros((S, 1), jnp.float32)
        carry = (state, prev, hp, rem, nup)
        for step in range(NUM_LAYERS):
            carry = _act_step_ref(*carry, pos[step:step + 1, :], timing, params)
        state, prev, hp, rem, nup = carry
        y = _layer_norm(prev, params['ln_out_g'], params['ln_out_b'])
        return y, rem[:, 0], nup[:, 0]

    return jax.vmap(per_example)(inputs)


# ----------------------------- main ---------------------------------------------
if __name__ == "__main__":
    key = jax.random.PRNGKey(0)
    k_in, k_par = jax.random.split(key)
    inputs = jax.random.normal(k_in, (B, S, E), jnp.float32)
    # NOTE: Encoder.forward also takes `mask`; it is unused on the universal/ACT
    # path implemented here (EncoderLayer is called as fn(state) with no mask).
    params = init_params(k_par)

    y, rem, nup = encoder_forward_pallas(inputs, params)
    jax.block_until_ready(y)

    y_ref, rem_ref, nup_ref = encoder_forward_ref(inputs, params)
    np.testing.assert_allclose(np.asarray(y), np.asarray(y_ref), rtol=2e-4, atol=2e-4)
    np.testing.assert_allclose(np.asarray(rem), np.asarray(rem_ref), rtol=2e-4, atol=2e-4)
    np.testing.assert_allclose(np.asarray(nup), np.asarray(nup_ref), rtol=0, atol=1e-6)

    print("KERNEL_OK")
</pallas_src>

<mosaic_0001>
module attributes {stable_mosaic.version = 11 : i64} {
  func.func @_encoder_kernel(%arg0: memref<16x32xf32, #tpu.memory_space<vmem>>, %arg1: memref<16x32xf32, #tpu.memory_space<vmem>>, %arg2: memref<2x32xf32, #tpu.memory_space<vmem>>, %arg3: memref<1x1xf32, #tpu.memory_space<smem>>, %arg4: memref<32x32xf32, #tpu.memory_space<vmem>>, %arg5: memref<1x32xf32, #tpu.memory_space<vmem>>, %arg6: memref<1x32xf32, #tpu.memory_space<vmem>>, %arg7: memref<1x32xf32, #tpu.memory_space<vmem>>, %arg8: memref<32x32xf32, #tpu.memory_space<vmem>>, %arg9: memref<32x32xf32, #tpu.memory_space<vmem>>, %arg10: memref<32x32xf32, #tpu.memory_space<vmem>>, %arg11: memref<32x32xf32, #tpu.memory_space<vmem>>, %arg12: memref<1x32xf32, #tpu.memory_space<vmem>>, %arg13: memref<1x32xf32, #tpu.memory_space<vmem>>, %arg14: memref<32x64xf32, #tpu.memory_space<vmem>>, %arg15: memref<1x64xf32, #tpu.memory_space<vmem>>, %arg16: memref<64x32xf32, #tpu.memory_space<vmem>>, %arg17: memref<1x32xf32, #tpu.memory_space<vmem>>, %arg18: memref<1x32xf32, #tpu.memory_space<vmem>>, %arg19: memref<1x32xf32, #tpu.memory_space<vmem>>, %arg20: memref<16x34xf32, #tpu.memory_space<vmem>>) attributes {dimension_semantics = [], scalar_prefetch = 0 : i64, scratch_operands = 0 : i64, tpu.core_type = #tpu.core_type<tc>} {
    %c0 = arith.constant 0 : index
    %c0_0 = arith.constant 0 : index
    %0 = vector.load %arg0[%c0, %c0_0] : memref<16x32xf32, #tpu.memory_space<vmem>>, vector<16x32xf32>
    %c0_1 = arith.constant 0 : index
    %c0_2 = arith.constant 0 : index
    %1 = vector.load %arg1[%c0_1, %c0_2] : memref<16x32xf32, #tpu.memory_space<vmem>>, vector<16x32xf32>
    %c0_3 = arith.constant 0 : index
    %c0_4 = arith.constant 0 : index
    %2 = memref.load %arg3[%c0_3, %c0_4] : memref<1x1xf32, #tpu.memory_space<smem>>
    %c0_5 = arith.constant 0 : index
    %c0_6 = arith.constant 0 : index
    %3 = vector.load %arg4[%c0_5, %c0_6] : memref<32x32xf32, #tpu.memory_space<vmem>>, vector<32x32xf32>
    %cst = arith.constant dense<0.000000e+00> : vector<16x32xf32>
    %4 = tpu.matmul %0, %3, %cst {dimension_numbers = #tpu.dot_dimension_numbers<[1], [0], [0], [1], [0, 0, 1, 1], [], []>} : vector<16x32xf32>, vector<32x32xf32>, vector<16x32xf32> -> vector<16x32xf32>
    %cst_7 = arith.constant 0.000000e+00 : f32
    %5 = vector.broadcast %cst_7 : f32 to vector<16x32xf32>
    %cst_8 = arith.constant 0.000000e+00 : f32
    %6 = vector.broadcast %cst_8 : f32 to vector<16x1xf32>
    %cst_9 = arith.constant 0.000000e+00 : f32
    %7 = vector.broadcast %cst_9 : f32 to vector<16x1xf32>
    %cst_10 = arith.constant 0.000000e+00 : f32
    %8 = vector.broadcast %cst_10 : f32 to vector<16x1xf32>
    %c0_11 = arith.constant 0 : index
    %c0_12 = arith.constant 0 : index
    %9 = vector.load %arg2[%c0_11, %c0_12] : memref<2x32xf32, #tpu.memory_space<vmem>>, vector<1x32xf32>
    %10 = arith.addf %4, %1 : vector<16x32xf32>
    %11 = vector.broadcast %9 : vector<1x32xf32> to vector<16x32xf32>
    %12 = arith.addf %10, %11 : vector<16x32xf32>
    %c0_13 = arith.constant 0 : index
    %c0_14 = arith.constant 0 : index
    %13 = vector.load %arg5[%c0_13, %c0_14] : memref<1x32xf32, #tpu.memory_space<vmem>>, vector<1x32xf32>
    %14 = vector.broadcast %13 : vector<1x32xf32> to vector<16x32xf32>
    %15 = arith.mulf %12, %14 : vector<16x32xf32>
    %cst_15 = arith.constant dense<0.000000e+00> : vector<16xf32>
    %16 = vector.multi_reduction <add>, %15, %cst_15 [1] : vector<16x32xf32> to vector<16xf32>
    %17 = vector.shape_cast %16 : vector<16xf32> to vector<16x1xf32>
    %18 = vector.broadcast %2 : f32 to vector<16x1xf32>
    %19 = arith.addf %17, %18 : vector<16x1xf32>
    %20 = arith.negf %19 : vector<16x1xf32>
    %21 = math.exp %20 : vector<16x1xf32>
    %cst_16 = arith.constant 1.000000e+00 : f32
    %22 = vector.broadcast %cst_16 : f32 to vector<16x1xf32>
    %23 = arith.addf %22, %21 : vector<16x1xf32>
    %24 = arith.divf %22, %23 : vector<16x1xf32>
    %cst_17 = arith.constant 1.000000e+00 : f32
    %25 = vector.broadcast %cst_17 : f32 to vector<16x1xf32>
    %26 = arith.cmpf olt, %6, %25 : vector<16x1xf32>
    %27 = arith.extui %26 : vector<16x1xi1> to vector<16x1xi32>
    %28 = arith.sitofp %27 : vector<16x1xi32> to vector<16x1xf32>
    %29 = arith.mulf %24, %28 : vector<16x1xf32>
    %30 = arith.addf %6, %29 : vector<16x1xf32>
    %cst_18 = arith.constant 0.899999976 : f32
    %31 = vector.broadcast %cst_18 : f32 to vector<16x1xf32>
    %32 = arith.cmpf ogt, %30, %31 : vector<16x1xf32>
    %33 = arith.extui %32 : vector<16x1xi1> to vector<16x1xi32>
    %34 = arith.sitofp %33 : vector<16x1xi32> to vector<16x1xf32>
    %35 = arith.mulf %34, %28 : vector<16x1xf32>
    %cst_19 = arith.constant 0.899999976 : f32
    %36 = vector.broadcast %cst_19 : f32 to vector<16x1xf32>
    %37 = arith.cmpf ole, %30, %36 : vector<16x1xf32>
    %38 = arith.extui %37 : vector<16x1xi1> to vector<16x1xi32>
    %39 = arith.sitofp %38 : vector<16x1xi32> to vector<16x1xf32>
    %40 = arith.mulf %39, %28 : vector<16x1xf32>
    %41 = arith.mulf %24, %40 : vector<16x1xf32>
    %42 = arith.addf %6, %41 : vector<16x1xf32>
    %cst_20 = arith.constant 1.000000e+00 : f32
    %43 = vector.broadcast %cst_20 : f32 to vector<16x1xf32>
    %44 = arith.subf %43, %42 : vector<16x1xf32>
    %45 = arith.mulf %35, %44 : vector<16x1xf32>
    %46 = arith.addf %7, %45 : vector<16x1xf32>
    %47 = arith.mulf %35, %46 : vector<16x1xf32>
    %48 = arith.addf %42, %47 : vector<16x1xf32>
    %49 = arith.addf %8, %40 : vector<16x1xf32>
    %50 = arith.addf %49, %35 : vector<16x1xf32>
    %51 = arith.mulf %24, %40 : vector<16x1xf32>
    %52 = arith.mulf %35, %46 : vector<16x1xf32>
    %53 = arith.addf %51, %52 : vector<16x1xf32>
    %c0_21 = arith.constant 0 : index
    %c0_22 = arith.constant 0 : index
    %54 = vector.load %arg6[%c0_21, %c0_22] : memref<1x32xf32, #tpu.memory_space<vmem>>, vector<1x32xf32>
    %c0_23 = arith.constant 0 : index
    %c0_24 = arith.constant 0 : index
    %55 = vector.load %arg7[%c0_23, %c0_24] : memref<1x32xf32, #tpu.memory_space<vmem>>, vector<1x32xf32>
    %cst_25 = arith.constant dense<0.000000e+00> : vector<16xf32>
    %56 = vector.multi_reduction <add>, %12, %cst_25 [1] : vector<16x32xf32> to vector<16xf32>
    %57 = vector.shape_cast %56 : vector<16xf32> to vector<16x1xf32>
    %cst_26 = arith.constant 3.200000e+01 : f32
    %58 = vector.broadcast %cst_26 : f32 to vector<16x1xf32>
    %59 = arith.divf %57, %58 : vector<16x1xf32>
    %60 = vector.broadcast %59 : vector<16x1xf32> to vector<16x32xf32>
    %61 = arith.subf %12, %60 : vector<16x32xf32>
    %62 = arith.mulf %61, %61 : vector<16x32xf32>
    %cst_27 = arith.constant dense<0.000000e+00> : vector<16xf32>
    %63 = vector.multi_reduction <add>, %62, %cst_27 [1] : vector<16x32xf32> to vector<16xf32>
    %64 = vector.shape_cast %63 : vector<16xf32> to vector<16x1xf32>
    %cst_28 = arith.constant 3.200000e+01 : f32
    %65 = vector.broadcast %cst_28 : f32 to vector<16x1xf32>
    %66 = arith.divf %64, %65 : vector<16x1xf32>
    %67 = vector.broadcast %59 : vector<16x1xf32> to vector<16x32xf32>
    %68 = arith.subf %12, %67 : vector<16x32xf32>
    %69 = vector.broadcast %54 : vector<1x32xf32> to vector<16x32xf32>
    %70 = arith.mulf %69, %68 : vector<16x32xf32>
    %cst_29 = arith.constant 9.99999997E-7 : f32
    %71 = vector.broadcast %cst_29 : f32 to vector<16x1xf32>
    %72 = arith.addf %66, %71 : vector<16x1xf32>
    %73 = math.rsqrt %72 : vector<16x1xf32>
    %74 = vector.broadcast %73 : vector<16x1xf32> to vector<16x32xf32>
    %75 = arith.mulf %70, %74 : vector<16x32xf32>
    %76 = vector.broadcast %55 : vector<1x32xf32> to vector<16x32xf32>
    %77 = arith.addf %75, %76 : vector<16x32xf32>
    %cst_30 = arith.constant 0.000000e+00 : f32
    %78 = vector.broadcast %cst_30 : f32 to vector<8x32xf32>
    %cst_31 = arith.constant 0.000000e+00 : f32
    %79 = vector.broadcast %cst_31 : f32 to vector<8x32xf32>
    %c0_32 = arith.constant 0 : index
    %c0_33 = arith.constant 0 : index
    %80 = vector.load %arg8[%c0_32, %c0_33] : memref<32x32xf32, #tpu.memory_space<vmem>>, vector<32x8xf32>
    %c0_34 = arith.constant 0 : index
    %c0_35 = arith.constant 0 : index
    %81 = vector.load %arg9[%c0_34, %c0_35] : memref<32x32xf32, #tpu.memory_space<vmem>>, vector<32x8xf32>
    %c0_36 = arith.constant 0 : index
    %c0_37 = arith.constant 0 : index
    %82 = vector.load %arg10[%c0_36, %c0_37] : memref<32x32xf32, #tpu.memory_space<vmem>>, vector<32x8xf32>
    %c0_38 = arith.constant 0 : index
    %c0_39 = arith.constant 0 : index
    %83 = vector.load %arg11[%c0_38, %c0_39] : memref<32x32xf32, #tpu.memory_space<vmem>>, vector<8x32xf32>
    %cst_40 = arith.constant dense<0.000000e+00> : vector<16x8xf32>
    %84 = tpu.matmul %77, %80, %cst_40 {dimension_numbers = #tpu.dot_dimension_numbers<[1], [0], [0], [1], [0, 0, 1, 1], [], []>} : vector<16x32xf32>, vector<32x8xf32>, vector<16x8xf32> -> vector<16x8xf32>
    %cst_41 = arith.constant 0.353553385 : f32
    %85 = vector.broadcast %cst_41 : f32 to vector<16x8xf32>
    %86 = arith.mulf %84, %85 : vector<16x8xf32>
    %cst_42 = arith.constant dense<0.000000e+00> : vector<16x8xf32>
    %87 = tpu.matmul %77, %81, %cst_42 {dimension_numbers = #tpu.dot_dimension_numbers<[1], [0], [0], [1], [0, 0, 1, 1], [], []>} : vector<16x32xf32>, vector<32x8xf32>, vector<16x8xf32> -> vector<16x8xf32>
    %cst_43 = arith.constant dense<0.000000e+00> : vector<16x8xf32>
    %88 = tpu.matmul %77, %82, %cst_43 {dimension_numbers = #tpu.dot_dimension_numbers<[1], [0], [0], [1], [0, 0, 1, 1], [], []>} : vector<16x32xf32>, vector<32x8xf32>, vector<16x8xf32> -> vector<16x8xf32>
    %89 = vector.extract_strided_slice %86 {offsets = [0, 0], sizes = [8, 8], strides = [1, 1]} : vector<16x8xf32> to vector<8x8xf32>
    %90 = vector.extract_strided_slice %87 {offsets = [0, 0], sizes = [8, 8], strides = [1, 1]} : vector<16x8xf32> to vector<8x8xf32>
    %91 = tpu.transpose %90, [1, 0] : vector<8x8xf32> -> vector<8x8xf32>
    %cst_44 = arith.constant dense<0.000000e+00> : vector<8x8xf32>
    %92 = tpu.matmul %89, %91, %cst_44 {dimension_numbers = #tpu.dot_dimension_numbers<[1], [0], [0], [1], [0, 0, 1, 1], [], []>} : vector<8x8xf32>, vector<8x8xf32>, vector<8x8xf32> -> vector<8x8xf32>
    %cst_45 = arith.constant dense<0xFF800000> : vector<8xf32>
    %93 = vector.multi_reduction <maximumf>, %92, %cst_45 [1] : vector<8x8xf32> to vector<8xf32>
    %cst_46 = arith.constant 0xFF800000 : f32
    %94 = vector.broadcast %cst_46 : f32 to vector<8xf32>
    %95 = arith.maximumf %94, %93 : vector<8xf32>
    %96 = vector.shape_cast %95 : vector<8xf32> to vector<8x1xf32>
    %97 = vector.broadcast %96 : vector<8x1xf32> to vector<8x8xf32>
    %98 = arith.subf %92, %97 : vector<8x8xf32>
    %99 = math.exp %98 : vector<8x8xf32>
    %cst_47 = arith.constant dense<0.000000e+00> : vector<8xf32>
    %100 = vector.multi_reduction <add>, %99, %cst_47 [1] : vector<8x8xf32> to vector<8xf32>
    %101 = vector.shape_cast %100 : vector<8xf32> to vector<8x1xf32>
    %102 = vector.broadcast %101 : vector<8x1xf32> to vector<8x8xf32>
    %103 = arith.divf %99, %102 : vector<8x8xf32>
    %104 = vector.extract_strided_slice %88 {offsets = [0, 0], sizes = [8, 8], strides = [1, 1]} : vector<16x8xf32> to vector<8x8xf32>
    %cst_48 = arith.constant dense<0.000000e+00> : vector<8x8xf32>
    %105 = tpu.matmul %103, %104, %cst_48 {dimension_numbers = #tpu.dot_dimension_numbers<[1], [0], [0], [1], [0, 0, 1, 1], [], []>} : vector<8x8xf32>, vector<8x8xf32>, vector<8x8xf32> -> vector<8x8xf32>
    %cst_49 = arith.constant dense<0.000000e+00> : vector<8x32xf32>
    %106 = tpu.matmul %105, %83, %cst_49 {dimension_numbers = #tpu.dot_dimension_numbers<[1], [0], [0], [1], [0, 0, 1, 1], [], []>} : vector<8x8xf32>, vector<8x32xf32>, vector<8x32xf32> -> vector<8x32xf32>
    %107 = arith.addf %78, %106 : vector<8x32xf32>
    %108 = vector.extract_strided_slice %86 {offsets = [8, 0], sizes = [8, 8], strides = [1, 1]} : vector<16x8xf32> to vector<8x8xf32>
    %109 = vector.extract_strided_slice %87 {offsets = [8, 0], sizes = [8, 8], strides = [1, 1]} : vector<16x8xf32> to vector<8x8xf32>
    %110 = tpu.transpose %109, [1, 0] : vector<8x8xf32> -> vector<8x8xf32>
    %cst_50 = arith.constant dense<0.000000e+00> : vector<8x8xf32>
    %111 = tpu.matmul %108, %110, %cst_50 {dimension_numbers = #tpu.dot_dimension_numbers<[1], [0], [0], [1], [0, 0, 1, 1], [], []>} : vector<8x8xf32>, vector<8x8xf32>, vector<8x8xf32> -> vector<8x8xf32>
    %cst_51 = arith.constant dense<0xFF800000> : vector<8xf32>
    %112 = vector.multi_reduction <maximumf>, %111, %cst_51 [1] : vector<8x8xf32> to vector<8xf32>
    %cst_52 = arith.constant 0xFF800000 : f32
    %113 = vector.broadcast %cst_52 : f32 to vector<8xf32>
    %114 = arith.maximumf %113, %112 : vector<8xf32>
    %115 = vector.shape_cast %114 : vector<8xf32> to vector<8x1xf32>
    %116 = vector.broadcast %115 : vector<8x1xf32> to vector<8x8xf32>
    %117 = arith.subf %111, %116 : vector<8x8xf32>
    %118 = math.exp %117 : vector<8x8xf32>
    %cst_53 = arith.constant dense<0.000000e+00> : vector<8xf32>
    %119 = vector.multi_reduction <add>, %118, %cst_53 [1] : vector<8x8xf32> to vector<8xf32>
    %120 = vector.shape_cast %119 : vector<8xf32> to vector<8x1xf32>
    %121 = vector.broadcast %120 : vector<8x1xf32> to vector<8x8xf32>
    %122 = arith.divf %118, %121 : vector<8x8xf32>
    %123 = vector.extract_strided_slice %88 {offsets = [8, 0], sizes = [8, 8], strides = [1, 1]} : vector<16x8xf32> to vector<8x8xf32>
    %cst_54 = arith.constant dense<0.000000e+00> : vector<8x8xf32>
    %124 = tpu.matmul %122, %123, %cst_54 {dimension_numbers = #tpu.dot_dimension_numbers<[1], [0], [0], [1], [0, 0, 1, 1], [], []>} : vector<8x8xf32>, vector<8x8xf32>, vector<8x8xf32> -> vector<8x8xf32>
    %cst_55 = arith.constant dense<0.000000e+00> : vector<8x32xf32>
    %125 = tpu.matmul %124, %83, %cst_55 {dimension_numbers = #tpu.dot_dimension_numbers<[1], [0], [0], [1], [0, 0, 1, 1], [], []>} : vector<8x8xf32>, vector<8x32xf32>, vector<8x32xf32> -> vector<8x32xf32>
    %126 = arith.addf %79, %125 : vector<8x32xf32>
    %c0_56 = arith.constant 0 : index
    %c8 = arith.constant 8 : index
    %127 = vector.load %arg8[%c0_56, %c8] : memref<32x32xf32, #tpu.memory_space<vmem>>, vector<32x8xf32>
    %c0_57 = arith.constant 0 : index
    %c8_58 = arith.constant 8 : index
    %128 = vector.load %arg9[%c0_57, %c8_58] : memref<32x32xf32, #tpu.memory_space<vmem>>, vector<32x8xf32>
    %c0_59 = arith.constant 0 : index
    %c8_60 = arith.constant 8 : index
    %129 = vector.load %arg10[%c0_59, %c8_60] : memref<32x32xf32, #tpu.memory_space<vmem>>, vector<32x8xf32>
    %c8_61 = arith.constant 8 : index
    %c0_62 = arith.constant 0 : index
    %130 = vector.load %arg11[%c8_61, %c0_62] : memref<32x32xf32, #tpu.memory_space<vmem>>, vector<8x32xf32>
    %cst_63 = arith.constant dense<0.000000e+00> : vector<16x8xf32>
    %131 = tpu.matmul %77, %127, %cst_63 {dimension_numbers = #tpu.dot_dimension_numbers<[1], [0], [0], [1], [0, 0, 1, 1], [], []>} : vector<16x32xf32>, vector<32x8xf32>, vector<16x8xf32> -> vector<16x8xf32>
    %cst_64 = arith.constant 0.353553385 : f32
    %132 = vector.broadcast %cst_64 : f32 to vector<16x8xf32>
    %133 = arith.mulf %131, %132 : vector<16x8xf32>
    %cst_65 = arith.constant dense<0.000000e+00> : vector<16x8xf32>
    %134 = tpu.matmul %77, %128, %cst_65 {dimension_numbers = #tpu.dot_dimension_numbers<[1], [0], [0], [1], [0, 0, 1, 1], [], []>} : vector<16x32xf32>, vector<32x8xf32>, vector<16x8xf32> -> vector<16x8xf32>
    %cst_66 = arith.constant dense<0.000000e+00> : vector<16x8xf32>
    %135 = tpu.matmul %77, %129, %cst_66 {dimension_numbers = #tpu.dot_dimension_numbers<[1], [0], [0], [1], [0, 0, 1, 1], [], []>} : vector<16x32xf32>, vector<32x8xf32>, vector<16x8xf32> -> vector<16x8xf32>
    %136 = vector.extract_strided_slice %133 {offsets = [0, 0], sizes = [8, 8], strides = [1, 1]} : vector<16x8xf32> to vector<8x8xf32>
    %137 = vector.extract_strided_slice %134 {offsets = [0, 0], sizes = [8, 8], strides = [1, 1]} : vector<16x8xf32> to vector<8x8xf32>
    %138 = tpu.transpose %137, [1, 0] : vector<8x8xf32> -> vector<8x8xf32>
    %cst_67 = arith.constant dense<0.000000e+00> : vector<8x8xf32>
    %139 = tpu.matmul %136, %138, %cst_67 {dimension_numbers = #tpu.dot_dimension_numbers<[1], [0], [0], [1], [0, 0, 1, 1], [], []>} : vector<8x8xf32>, vector<8x8xf32>, vector<8x8xf32> -> vector<8x8xf32>
    %cst_68 = arith.constant dense<0xFF800000> : vector<8xf32>
    %140 = vector.multi_reduction <maximumf>, %139, %cst_68 [1] : vector<8x8xf32> to vector<8xf32>
    %cst_69 = arith.constant 0xFF800000 : f32
    %141 = vector.broadcast %cst_69 : f32 to vector<8xf32>
    %142 = arith.maximumf %141, %140 : vector<8xf32>
    %143 = vector.shape_cast %142 : vector<8xf32> to vector<8x1xf32>
    %144 = vector.broadcast %143 : vector<8x1xf32> to vector<8x8xf32>
    %145 = arith.subf %139, %144 : vector<8x8xf32>
    %146 = math.exp %145 : vector<8x8xf32>
    %cst_70 = arith.constant dense<0.000000e+00> : vector<8xf32>
    %147 = vector.multi_reduction <add>, %146, %cst_70 [1] : vector<8x8xf32> to vector<8xf32>
    %148 = vector.shape_cast %147 : vector<8xf32> to vector<8x1xf32>
    %149 = vector.broadcast %148 : vector<8x1xf32> to vector<8x8xf32>
    %150 = arith.divf %146, %149 : vector<8x8xf32>
    %151 = vector.extract_strided_slice %135 {offsets = [0, 0], sizes = [8, 8], strides = [1, 1]} : vector<16x8xf32> to vector<8x8xf32>
    %cst_71 = arith.constant dense<0.000000e+00> : vector<8x8xf32>
    %152 = tpu.matmul %150, %151, %cst_71 {dimension_numbers = #tpu.dot_dimension_numbers<[1], [0], [0], [1], [0, 0, 1, 1], [], []>} : vector<8x8xf32>, vector<8x8xf32>, vector<8x8xf32> -> vector<8x8xf32>
    %cst_72 = arith.constant dense<0.000000e+00> : vector<8x32xf32>
    %153 = tpu.matmul %152, %130, %cst_72 {dimension_numbers = #tpu.dot_dimension_numbers<[1], [0], [0], [1], [0, 0, 1, 1], [], []>} : vector<8x8xf32>, vector<8x32xf32>, vector<8x32xf32> -> vector<8x32xf32>
    %154 = arith.addf %107, %153 : vector<8x32xf32>
    %155 = vector.extract_strided_slice %133 {offsets = [8, 0], sizes = [8, 8], strides = [1, 1]} : vector<16x8xf32> to vector<8x8xf32>
    %156 = vector.extract_strided_slice %134 {offsets = [8, 0], sizes = [8, 8], strides = [1, 1]} : vector<16x8xf32> to vector<8x8xf32>
    %157 = tpu.transpose %156, [1, 0] : vector<8x8xf32> -> vector<8x8xf32>
    %cst_73 = arith.constant dense<0.000000e+00> : vector<8x8xf32>
    %158 = tpu.matmul %155, %157, %cst_73 {dimension_numbers = #tpu.dot_dimension_numbers<[1], [0], [0], [1], [0, 0, 1, 1], [], []>} : vector<8x8xf32>, vector<8x8xf32>, vector<8x8xf32> -> vector<8x8xf32>
    %cst_74 = arith.constant dense<0xFF800000> : vector<8xf32>
    %159 = vector.multi_reduction <maximumf>, %158, %cst_74 [1] : vector<8x8xf32> to vector<8xf32>
    %cst_75 = arith.constant 0xFF800000 : f32
    %160 = vector.broadcast %cst_75 : f32 to vector<8xf32>
    %161 = arith.maximumf %160, %159 : vector<8xf32>
    %162 = vector.shape_cast %161 : vector<8xf32> to vector<8x1xf32>
    %163 = vector.broadcast %162 : vector<8x1xf32> to vector<8x8xf32>
    %164 = arith.subf %158, %163 : vector<8x8xf32>
    %165 = math.exp %164 : vector<8x8xf32>
    %cst_76 = arith.constant dense<0.000000e+00> : vector<8xf32>
    %166 = vector.multi_reduction <add>, %165, %cst_76 [1] : vector<8x8xf32> to vector<8xf32>
    %167 = vector.shape_cast %166 : vector<8xf32> to vector<8x1xf32>
    %168 = vector.broadcast %167 : vector<8x1xf32> to vector<8x8xf32>
    %169 = arith.divf %165, %168 : vector<8x8xf32>
    %170 = vector.extract_strided_slice %135 {offsets = [8, 0], sizes = [8, 8], strides = [1, 1]} : vector<16x8xf32> to vector<8x8xf32>
    %cst_77 = arith.constant dense<0.000000e+00> : vector<8x8xf32>
    %171 = tpu.matmul %169, %170, %cst_77 {dimension_numbers = #tpu.dot_dimension_numbers<[1], [0], [0], [1], [0, 0, 1, 1], [], []>} : vector<8x8xf32>, vector<8x8xf32>, vector<8x8xf32> -> vector<8x8xf32>
    %cst_78 = arith.constant dense<0.000000e+00> : vector<8x32xf32>
    %172 = tpu.matmul %171, %130, %cst_78 {dimension_numbers = #tpu.dot_dimension_numbers<[1], [0], [0], [1], [0, 0, 1, 1], [], []>} : vector<8x8xf32>, vector<8x32xf32>, vector<8x32xf32> -> vector<8x32xf32>
    %173 = arith.addf %126, %172 : vector<8x32xf32>
    %c0_79 = arith.constant 0 : index
    %c16 = arith.constant 16 : index
    %174 = vector.load %arg8[%c0_79, %c16] : memref<32x32xf32, #tpu.memory_space<vmem>>, vector<32x8xf32>
    %c0_80 = arith.constant 0 : index
    %c16_81 = arith.constant 16 : index
    %175 = vector.load %arg9[%c0_80, %c16_81] : memref<32x32xf32, #tpu.memory_space<vmem>>, vector<32x8xf32>
    %c0_82 = arith.constant 0 : index
    %c16_83 = arith.constant 16 : index
    %176 = vector.load %arg10[%c0_82, %c16_83] : memref<32x32xf32, #tpu.memory_space<vmem>>, vector<32x8xf32>
    %c16_84 = arith.constant 16 : index
    %c0_85 = arith.constant 0 : index
    %177 = vector.load %arg11[%c16_84, %c0_85] : memref<32x32xf32, #tpu.memory_space<vmem>>, vector<8x32xf32>
    %cst_86 = arith.constant dense<0.000000e+00> : vector<16x8xf32>
    %178 = tpu.matmul %77, %174, %cst_86 {dimension_numbers = #tpu.dot_dimension_numbers<[1], [0], [0], [1], [0, 0, 1, 1], [], []>} : vector<16x32xf32>, vector<32x8xf32>, vector<16x8xf32> -> vector<16x8xf32>
    %cst_87 = arith.constant 0.353553385 : f32
    %179 = vector.broadcast %cst_87 : f32 to vector<16x8xf32>
    %180 = arith.mulf %178, %179 : vector<16x8xf32>
    %cst_88 = arith.constant dense<0.000000e+00> : vector<16x8xf32>
    %181 = tpu.matmul %77, %175, %cst_88 {dimension_numbers = #tpu.dot_dimension_numbers<[1], [0], [0], [1], [0, 0, 1, 1], [], []>} : vector<16x32xf32>, vector<32x8xf32>, vector<16x8xf32> -> vector<16x8xf32>
    %cst_89 = arith.constant dense<0.000000e+00> : vector<16x8xf32>
    %182 = tpu.matmul %77, %176, %cst_89 {dimension_numbers = #tpu.dot_dimension_numbers<[1], [0], [0], [1], [0, 0, 1, 1], [], []>} : vector<16x32xf32>, vector<32x8xf32>, vector<16x8xf32> -> vector<16x8xf32>
    %183 = vector.extract_strided_slice %180 {offsets = [0, 0], sizes = [8, 8], strides = [1, 1]} : vector<16x8xf32> to vector<8x8xf32>
    %184 = vector.extract_strided_slice %181 {offsets = [0, 0], sizes = [8, 8], strides = [1, 1]} : vector<16x8xf32> to vector<8x8xf32>
    %185 = tpu.transpose %184, [1, 0] : vector<8x8xf32> -> vector<8x8xf32>
    %cst_90 = arith.constant dense<0.000000e+00> : vector<8x8xf32>
    %186 = tpu.matmul %183, %185, %cst_90 {dimension_numbers = #tpu.dot_dimension_numbers<[1], [0], [0], [1], [0, 0, 1, 1], [], []>} : vector<8x8xf32>, vector<8x8xf32>, vector<8x8xf32> -> vector<8x8xf32>
    %cst_91 = arith.constant dense<0xFF800000> : vector<8xf32>
    %187 = vector.multi_reduction <maximumf>, %186, %cst_91 [1] : vector<8x8xf32> to vector<8xf32>
    %cst_92 = arith.constant 0xFF800000 : f32
    %188 = vector.broadcast %cst_92 : f32 to vector<8xf32>
    %189 = arith.maximumf %188, %187 : vector<8xf32>
    %190 = vector.shape_cast %189 : vector<8xf32> to vector<8x1xf32>
    %191 = vector.broadcast %190 : vector<8x1xf32> to vector<8x8xf32>
    %192 = arith.subf %186, %191 : vector<8x8xf32>
    %193 = math.exp %192 : vector<8x8xf32>
    %cst_93 = arith.constant dense<0.000000e+00> : vector<8xf32>
    %194 = vector.multi_reduction <add>, %193, %cst_93 [1] : vector<8x8xf32> to vector<8xf32>
    %195 = vector.shape_cast %194 : vector<8xf32> to vector<8x1xf32>
    %196 = vector.broadcast %195 : vector<8x1xf32> to vector<8x8xf32>
    %197 = arith.divf %193, %196 : vector<8x8xf32>
    %198 = vector.extract_strided_slice %182 {offsets = [0, 0], sizes = [8, 8], strides = [1, 1]} : vector<16x8xf32> to vector<8x8xf32>
    %cst_94 = arith.constant dense<0.000000e+00> : vector<8x8xf32>
    %199 = tpu.matmul %197, %198, %cst_94 {dimension_numbers = #tpu.dot_dimension_numbers<[1], [0], [0], [1], [0, 0, 1, 1], [], []>} : vector<8x8xf32>, vector<8x8xf32>, vector<8x8xf32> -> vector<8x8xf32>
    %cst_95 = arith.constant dense<0.000000e+00> : vector<8x32xf32>
    %200 = tpu.matmul %199, %177, %cst_95 {dimension_numbers = #tpu.dot_dimension_numbers<[1], [0], [0], [1], [0, 0, 1, 1], [], []>} : vector<8x8xf32>, vector<8x32xf32>, vector<8x32xf32> -> vector<8x32xf32>
    %201 = arith.addf %154, %200 : vector<8x32xf32>
    %202 = vector.extract_strided_slice %180 {offsets = [8, 0], sizes = [8, 8], strides = [1, 1]} : vector<16x8xf32> to vector<8x8xf32>
    %203 = vector.extract_strided_slice %181 {offsets = [8, 0], sizes = [8, 8], strides = [1, 1]} : vector<16x8xf32> to vector<8x8xf32>
    %204 = tpu.transpose %203, [1, 0] : vector<8x8xf32> -> vector<8x8xf32>
    %cst_96 = arith.constant dense<0.000000e+00> : vector<8x8xf32>
    %205 = tpu.matmul %202, %204, %cst_96 {dimension_numbers = #tpu.dot_dimension_numbers<[1], [0], [0], [1], [0, 0, 1, 1], [], []>} : vector<8x8xf32>, vector<8x8xf32>, vector<8x8xf32> -> vector<8x8xf32>
    %cst_97 = arith.constant dense<0xFF800000> : vector<8xf32>
    %206 = vector.multi_reduction <maximumf>, %205, %cst_97 [1] : vector<8x8xf32> to vector<8xf32>
    %cst_98 = arith.constant 0xFF800000 : f32
    %207 = vector.broadcast %cst_98 : f32 to vector<8xf32>
    %208 = arith.maximumf %207, %206 : vector<8xf32>
    %209 = vector.shape_cast %208 : vector<8xf32> to vector<8x1xf32>
    %210 = vector.broadcast %209 : vector<8x1xf32> to vector<8x8xf32>
    %211 = arith.subf %205, %210 : vector<8x8xf32>
    %212 = math.exp %211 : vector<8x8xf32>
    %cst_99 = arith.constant dense<0.000000e+00> : vector<8xf32>
    %213 = vector.multi_reduction <add>, %212, %cst_99 [1] : vector<8x8xf32> to vector<8xf32>
    %214 = vector.shape_cast %213 : vector<8xf32> to vector<8x1xf32>
    %215 = vector.broadcast %214 : vector<8x1xf32> to vector<8x8xf32>
    %216 = arith.divf %212, %215 : vector<8x8xf32>
    %217 = vector.extract_strided_slice %182 {offsets = [8, 0], sizes = [8, 8], strides = [1, 1]} : vector<16x8xf32> to vector<8x8xf32>
    %cst_100 = arith.constant dense<0.000000e+00> : vector<8x8xf32>
    %218 = tpu.matmul %216, %217, %cst_100 {dimension_numbers = #tpu.dot_dimension_numbers<[1], [0], [0], [1], [0, 0, 1, 1], [], []>} : vector<8x8xf32>, vector<8x8xf32>, vector<8x8xf32> -> vector<8x8xf32>
    %cst_101 = arith.constant dense<0.000000e+00> : vector<8x32xf32>
    %219 = tpu.matmul %218, %177, %cst_101 {dimension_numbers = #tpu.dot_dimension_numbers<[1], [0], [0], [1], [0, 0, 1, 1], [], []>} : vector<8x8xf32>, vector<8x32xf32>, vector<8x32xf32> -> vector<8x32xf32>
    %220 = arith.addf %173, %219 : vector<8x32xf32>
    %c0_102 = arith.constant 0 : index
    %c24 = arith.constant 24 : index
    %221 = vector.load %arg8[%c0_102, %c24] : memref<32x32xf32, #tpu.memory_space<vmem>>, vector<32x8xf32>
    %c0_103 = arith.constant 0 : index
    %c24_104 = arith.constant 24 : index
    %222 = vector.load %arg9[%c0_103, %c24_104] : memref<32x32xf32, #tpu.memory_space<vmem>>, vector<32x8xf32>
    %c0_105 = arith.constant 0 : index
    %c24_106 = arith.constant 24 : index
    %223 = vector.load %arg10[%c0_105, %c24_106] : memref<32x32xf32, #tpu.memory_space<vmem>>, vector<32x8xf32>
    %c24_107 = arith.constant 24 : index
    %c0_108 = arith.constant 0 : index
    %224 = vector.load %arg11[%c24_107, %c0_108] : memref<32x32xf32, #tpu.memory_space<vmem>>, vector<8x32xf32>
    %cst_109 = arith.constant dense<0.000000e+00> : vector<16x8xf32>
    %225 = tpu.matmul %77, %221, %cst_109 {dimension_numbers = #tpu.dot_dimension_numbers<[1], [0], [0], [1], [0, 0, 1, 1], [], []>} : vector<16x32xf32>, vector<32x8xf32>, vector<16x8xf32> -> vector<16x8xf32>
    %cst_110 = arith.constant 0.353553385 : f32
    %226 = vector.broadcast %cst_110 : f32 to vector<16x8xf32>
    %227 = arith.mulf %225, %226 : vector<16x8xf32>
    %cst_111 = arith.constant dense<0.000000e+00> : vector<16x8xf32>
    %228 = tpu.matmul %77, %222, %cst_111 {dimension_numbers = #tpu.dot_dimension_numbers<[1], [0], [0], [1], [0, 0, 1, 1], [], []>} : vector<16x32xf32>, vector<32x8xf32>, vector<16x8xf32> -> vector<16x8xf32>
    %cst_112 = arith.constant dense<0.000000e+00> : vector<16x8xf32>
    %229 = tpu.matmul %77, %223, %cst_112 {dimension_numbers = #tpu.dot_dimension_numbers<[1], [0], [0], [1], [0, 0, 1, 1], [], []>} : vector<16x32xf32>, vector<32x8xf32>, vector<16x8xf32> -> vector<16x8xf32>
    %230 = vector.extract_strided_slice %227 {offsets = [0, 0], sizes = [8, 8], strides = [1, 1]} : vector<16x8xf32> to vector<8x8xf32>
    %231 = vector.extract_strided_slice %228 {offsets = [0, 0], sizes = [8, 8], strides = [1, 1]} : vector<16x8xf32> to vector<8x8xf32>
    %232 = tpu.transpose %231, [1, 0] : vector<8x8xf32> -> vector<8x8xf32>
    %cst_113 = arith.constant dense<0.000000e+00> : vector<8x8xf32>
    %233 = tpu.matmul %230, %232, %cst_113 {dimension_numbers = #tpu.dot_dimension_numbers<[1], [0], [0], [1], [0, 0, 1, 1], [], []>} : vector<8x8xf32>, vector<8x8xf32>, vector<8x8xf32> -> vector<8x8xf32>
    %cst_114 = arith.constant dense<0xFF800000> : vector<8xf32>
    %234 = vector.multi_reduction <maximumf>, %233, %cst_114 [1] : vector<8x8xf32> to vector<8xf32>
    %cst_115 = arith.constant 0xFF800000 : f32
    %235 = vector.broadcast %cst_115 : f32 to vector<8xf32>
    %236 = arith.maximumf %235, %234 : vector<8xf32>
    %237 = vector.shape_cast %236 : vector<8xf32> to vector<8x1xf32>
    %238 = vector.broadcast %237 : vector<8x1xf32> to vector<8x8xf32>
    %239 = arith.subf %233, %238 : vector<8x8xf32>
    %240 = math.exp %239 : vector<8x8xf32>
    %cst_116 = arith.constant dense<0.000000e+00> : vector<8xf32>
    %241 = vector.multi_reduction <add>, %240, %cst_116 [1] : vector<8x8xf32> to vector<8xf32>
    %242 = vector.shape_cast %241 : vector<8xf32> to vector<8x1xf32>
    %243 = vector.broadcast %242 : vector<8x1xf32> to vector<8x8xf32>
    %244 = arith.divf %240, %243 : vector<8x8xf32>
    %245 = vector.extract_strided_slice %229 {offsets = [0, 0], sizes = [8, 8], strides = [1, 1]} : vector<16x8xf32> to vector<8x8xf32>
    %cst_117 = arith.constant dense<0.000000e+00> : vector<8x8xf32>
    %246 = tpu.matmul %244, %245, %cst_117 {dimension_numbers = #tpu.dot_dimension_numbers<[1], [0], [0], [1], [0, 0, 1, 1], [], []>} : vector<8x8xf32>, vector<8x8xf32>, vector<8x8xf32> -> vector<8x8xf32>
    %cst_118 = arith.constant dense<0.000000e+00> : vector<8x32xf32>
    %247 = tpu.matmul %246, %224, %cst_118 {dimension_numbers = #tpu.dot_dimension_numbers<[1], [0], [0], [1], [0, 0, 1, 1], [], []>} : vector<8x8xf32>, vector<8x32xf32>, vector<8x32xf32> -> vector<8x32xf32>
    %248 = arith.addf %201, %247 : vector<8x32xf32>
    %249 = vector.extract_strided_slice %227 {offsets = [8, 0], sizes = [8, 8], strides = [1, 1]} : vector<16x8xf32> to vector<8x8xf32>
    %250 = vector.extract_strided_slice %228 {offsets = [8, 0], sizes = [8, 8], strides = [1, 1]} : vector<16x8xf32> to vector<8x8xf32>
    %251 = tpu.transpose %250, [1, 0] : vector<8x8xf32> -> vector<8x8xf32>
    %cst_119 = arith.constant dense<0.000000e+00> : vector<8x8xf32>
    %252 = tpu.matmul %249, %251, %cst_119 {dimension_numbers = #tpu.dot_dimension_numbers<[1], [0], [0], [1], [0, 0, 1, 1], [], []>} : vector<8x8xf32>, vector<8x8xf32>, vector<8x8xf32> -> vector<8x8xf32>
    %cst_120 = arith.constant dense<0xFF800000> : vector<8xf32>
    %253 = vector.multi_reduction <maximumf>, %252, %cst_120 [1] : vector<8x8xf32> to vector<8xf32>
    %cst_121 = arith.constant 0xFF800000 : f32
    %254 = vector.broadcast %cst_121 : f32 to vector<8xf32>
    %255 = arith.maximumf %254, %253 : vector<8xf32>
    %256 = vector.shape_cast %255 : vector<8xf32> to vector<8x1xf32>
    %257 = vector.broadcast %256 : vector<8x1xf32> to vector<8x8xf32>
    %258 = arith.subf %252, %257 : vector<8x8xf32>
    %259 = math.exp %258 : vector<8x8xf32>
    %cst_122 = arith.constant dense<0.000000e+00> : vector<8xf32>
    %260 = vector.multi_reduction <add>, %259, %cst_122 [1] : vector<8x8xf32> to vector<8xf32>
    %261 = vector.shape_cast %260 : vector<8xf32> to vector<8x1xf32>
    %262 = vector.broadcast %261 : vector<8x1xf32> to vector<8x8xf32>
    %263 = arith.divf %259, %262 : vector<8x8xf32>
    %264 = vector.extract_strided_slice %229 {offsets = [8, 0], sizes = [8, 8], strides = [1, 1]} : vector<16x8xf32> to vector<8x8xf32>
    %cst_123 = arith.constant dense<0.000000e+00> : vector<8x8xf32>
    %265 = tpu.matmul %263, %264, %cst_123 {dimension_numbers = #tpu.dot_dimension_numbers<[1], [0], [0], [1], [0, 0, 1, 1], [], []>} : vector<8x8xf32>, vector<8x8xf32>, vector<8x8xf32> -> vector<8x8xf32>
    %cst_124 = arith.constant dense<0.000000e+00> : vector<8x32xf32>
    %266 = tpu.matmul %265, %224, %cst_124 {dimension_numbers = #tpu.dot_dimension_numbers<[1], [0], [0], [1], [0, 0, 1, 1], [], []>} : vector<8x8xf32>, vector<8x32xf32>, vector<8x32xf32> -> vector<8x32xf32>
    %267 = arith.addf %220, %266 : vector<8x32xf32>
    %268 = tpu.concatenate %248, %267 in 0 : vector<8x32xf32>, vector<8x32xf32> -> vector<16x32xf32>
    %269 = arith.addf %12, %268 : vector<16x32xf32>
    %c0_125 = arith.constant 0 : index
    %c0_126 = arith.constant 0 : index
    %270 = vector.load %arg12[%c0_125, %c0_126] : memref<1x32xf32, #tpu.memory_space<vmem>>, vector<1x32xf32>
    %c0_127 = arith.constant 0 : index
    %c0_128 = arith.constant 0 : index
    %271 = vector.load %arg13[%c0_127, %c0_128] : memref<1x32xf32, #tpu.memory_space<vmem>>, vector<1x32xf32>
    %cst_129 = arith.constant dense<0.000000e+00> : vector<16xf32>
    %272 = vector.multi_reduction <add>, %269, %cst_129 [1] : vector<16x32xf32> to vector<16xf32>
    %273 = vector.shape_cast %272 : vector<16xf32> to vector<16x1xf32>
    %cst_130 = arith.constant 3.200000e+01 : f32
    %274 = vector.broadcast %cst_130 : f32 to vector<16x1xf32>
    %275 = arith.divf %273, %274 : vector<16x1xf32>
    %276 = vector.broadcast %275 : vector<16x1xf32> to vector<16x32xf32>
    %277 = arith.subf %269, %276 : vector<16x32xf32>
    %278 = arith.mulf %277, %277 : vector<16x32xf32>
    %cst_131 = arith.constant dense<0.000000e+00> : vector<16xf32>
    %279 = vector.multi_reduction <add>, %278, %cst_131 [1] : vector<16x32xf32> to vector<16xf32>
    %280 = vector.shape_cast %279 : vector<16xf32> to vector<16x1xf32>
    %cst_132 = arith.constant 3.200000e+01 : f32
    %281 = vector.broadcast %cst_132 : f32 to vector<16x1xf32>
    %282 = arith.divf %280, %281 : vector<16x1xf32>
    %283 = vector.broadcast %275 : vector<16x1xf32> to vector<16x32xf32>
    %284 = arith.subf %269, %283 : vector<16x32xf32>
    %285 = vector.broadcast %270 : vector<1x32xf32> to vector<16x32xf32>
    %286 = arith.mulf %285, %284 : vector<16x32xf32>
    %cst_133 = arith.constant 9.99999997E-7 : f32
    %287 = vector.broadcast %cst_133 : f32 to vector<16x1xf32>
    %288 = arith.addf %282, %287 : vector<16x1xf32>
    %289 = math.rsqrt %288 : vector<16x1xf32>
    %290 = vector.broadcast %289 : vector<16x1xf32> to vector<16x32xf32>
    %291 = arith.mulf %286, %290 : vector<16x32xf32>
    %292 = vector.broadcast %271 : vector<1x32xf32> to vector<16x32xf32>
    %293 = arith.addf %291, %292 : vector<16x32xf32>
    %c0_134 = arith.constant 0 : index
    %c0_135 = arith.constant 0 : index
    %294 = vector.load %arg14[%c0_134, %c0_135] : memref<32x64xf32, #tpu.memory_space<vmem>>, vector<32x64xf32>
    %cst_136 = arith.constant dense<0.000000e+00> : vector<16x64xf32>
    %295 = tpu.matmul %293, %294, %cst_136 {dimension_numbers = #tpu.dot_dimension_numbers<[1], [0], [0], [1], [0, 0, 1, 1], [], []>} : vector<16x32xf32>, vector<32x64xf32>, vector<16x64xf32> -> vector<16x64xf32>
    %c0_137 = arith.constant 0 : index
    %c0_138 = arith.constant 0 : index
    %296 = vector.load %arg15[%c0_137, %c0_138] : memref<1x64xf32, #tpu.memory_space<vmem>>, vector<1x64xf32>
    %297 = vector.broadcast %296 : vector<1x64xf32> to vector<16x64xf32>
    %298 = arith.addf %295, %297 : vector<16x64xf32>
    %cst_139 = arith.constant 0.000000e+00 : f32
    %299 = vector.broadcast %cst_139 : f32 to vector<16x64xf32>
    %300 = arith.maximumf %298, %299 : vector<16x64xf32>
    %c0_140 = arith.constant 0 : index
    %c0_141 = arith.constant 0 : index
    %301 = vector.load %arg16[%c0_140, %c0_141] : memref<64x32xf32, #tpu.memory_space<vmem>>, vector<64x32xf32>
    %cst_142 = arith.constant dense<0.000000e+00> : vector<16x32xf32>
    %302 = tpu.matmul %300, %301, %cst_142 {dimension_numbers = #tpu.dot_dimension_numbers<[1], [0], [0], [1], [0, 0, 1, 1], [], []>} : vector<16x64xf32>, vector<64x32xf32>, vector<16x32xf32> -> vector<16x32xf32>
    %c0_143 = arith.constant 0 : index
    %c0_144 = arith.constant 0 : index
    %303 = vector.load %arg17[%c0_143, %c0_144] : memref<1x32xf32, #tpu.memory_space<vmem>>, vector<1x32xf32>
    %304 = vector.broadcast %303 : vector<1x32xf32> to vector<16x32xf32>
    %305 = arith.addf %302, %304 : vector<16x32xf32>
    %306 = arith.addf %269, %305 : vector<16x32xf32>
    %307 = vector.broadcast %53 : vector<16x1xf32> to vector<16x32xf32>
    %308 = arith.mulf %306, %307 : vector<16x32xf32>
    %cst_145 = arith.constant 1.000000e+00 : f32
    %309 = vector.broadcast %cst_145 : f32 to vector<16x1xf32>
    %310 = arith.subf %309, %53 : vector<16x1xf32>
    %311 = vector.broadcast %310 : vector<16x1xf32> to vector<16x32xf32>
    %312 = arith.mulf %5, %311 : vector<16x32xf32>
    %313 = arith.addf %308, %312 : vector<16x32xf32>
    %c1 = arith.constant 1 : index
    %c0_146 = arith.constant 0 : index
    %314 = vector.load %arg2[%c1, %c0_146] : memref<2x32xf32, #tpu.memory_space<vmem>>, vector<1x32xf32>
    %315 = arith.addf %306, %1 : vector<16x32xf32>
    %316 = vector.broadcast %314 : vector<1x32xf32> to vector<16x32xf32>
    %317 = arith.addf %315, %316 : vector<16x32xf32>
    %c0_147 = arith.constant 0 : index
    %c0_148 = arith.constant 0 : index
    %318 = vector.load %arg5[%c0_147, %c0_148] : memref<1x32xf32, #tpu.memory_space<vmem>>, vector<1x32xf32>
    %319 = vector.broadcast %318 : vector<1x32xf32> to vector<16x32xf32>
    %320 = arith.mulf %317, %319 : vector<16x32xf32>
    %cst_149 = arith.constant dense<0.000000e+00> : vector<16xf32>
    %321 = vector.multi_reduction <add>, %320, %cst_149 [1] : vector<16x32xf32> to vector<16xf32>
    %322 = vector.shape_cast %321 : vector<16xf32> to vector<16x1xf32>
    %323 = vector.broadcast %2 : f32 to vector<16x1xf32>
    %324 = arith.addf %322, %323 : vector<16x1xf32>
    %325 = arith.negf %324 : vector<16x1xf32>
    %326 = math.exp %325 : vector<16x1xf32>
    %cst_150 = arith.constant 1.000000e+00 : f32
    %327 = vector.broadcast %cst_150 : f32 to vector<16x1xf32>
    %328 = arith.addf %327, %326 : vector<16x1xf32>
    %329 = arith.divf %327, %328 : vector<16x1xf32>
    %cst_151 = arith.constant 1.000000e+00 : f32
    %330 = vector.broadcast %cst_151 : f32 to vector<16x1xf32>
    %331 = arith.cmpf olt, %48, %330 : vector<16x1xf32>
    %332 = arith.extui %331 : vector<16x1xi1> to vector<16x1xi32>
    %333 = arith.sitofp %332 : vector<16x1xi32> to vector<16x1xf32>
    %334 = arith.mulf %329, %333 : vector<16x1xf32>
    %335 = arith.addf %48, %334 : vector<16x1xf32>
    %cst_152 = arith.constant 0.899999976 : f32
    %336 = vector.broadcast %cst_152 : f32 to vector<16x1xf32>
    %337 = arith.cmpf ogt, %335, %336 : vector<16x1xf32>
    %338 = arith.extui %337 : vector<16x1xi1> to vector<16x1xi32>
    %339 = arith.sitofp %338 : vector<16x1xi32> to vector<16x1xf32>
    %340 = arith.mulf %339, %333 : vector<16x1xf32>
    %cst_153 = arith.constant 0.899999976 : f32
    %341 = vector.broadcast %cst_153 : f32 to vector<16x1xf32>
    %342 = arith.cmpf ole, %335, %341 : vector<16x1xf32>
    %343 = arith.extui %342 : vector<16x1xi1> to vector<16x1xi32>
    %344 = arith.sitofp %343 : vector<16x1xi32> to vector<16x1xf32>
    %345 = arith.mulf %344, %333 : vector<16x1xf32>
    %346 = arith.mulf %329, %345 : vector<16x1xf32>
    %347 = arith.addf %48, %346 : vector<16x1xf32>
    %cst_154 = arith.constant 1.000000e+00 : f32
    %348 = vector.broadcast %cst_154 : f32 to vector<16x1xf32>
    %349 = arith.subf %348, %347 : vector<16x1xf32>
    %350 = arith.mulf %340, %349 : vector<16x1xf32>
    %351 = arith.addf %46, %350 : vector<16x1xf32>
    %352 = arith.addf %50, %345 : vector<16x1xf32>
    %353 = arith.addf %352, %340 : vector<16x1xf32>
    %354 = arith.mulf %329, %345 : vector<16x1xf32>
    %355 = arith.mulf %340, %351 : vector<16x1xf32>
    %356 = arith.addf %354, %355 : vector<16x1xf32>
    %c0_155 = arith.constant 0 : index
    %c0_156 = arith.constant 0 : index
    %357 = vector.load %arg6[%c0_155, %c0_156] : memref<1x32xf32, #tpu.memory_space<vmem>>, vector<1x32xf32>
    %c0_157 = arith.constant 0 : index
    %c0_158 = arith.constant 0 : index
    %358 = vector.load %arg7[%c0_157, %c0_158] : memref<1x32xf32, #tpu.memory_space<vmem>>, vector<1x32xf32>
    %cst_159 = arith.constant dense<0.000000e+00> : vector<16xf32>
    %359 = vector.multi_reduction <add>, %317, %cst_159 [1] : vector<16x32xf32> to vector<16xf32>
    %360 = vector.shape_cast %359 : vector<16xf32> to vector<16x1xf32>
    %cst_160 = arith.constant 3.200000e+01 : f32
    %361 = vector.broadcast %cst_160 : f32 to vector<16x1xf32>
    %362 = arith.divf %360, %361 : vector<16x1xf32>
    %363 = vector.broadcast %362 : vector<16x1xf32> to vector<16x32xf32>
    %364 = arith.subf %317, %363 : vector<16x32xf32>
    %365 = arith.mulf %364, %364 : vector<16x32xf32>
    %cst_161 = arith.constant dense<0.000000e+00> : vector<16xf32>
    %366 = vector.multi_reduction <add>, %365, %cst_161 [1] : vector<16x32xf32> to vector<16xf32>
    %367 = vector.shape_cast %366 : vector<16xf32> to vector<16x1xf32>
    %cst_162 = arith.constant 3.200000e+01 : f32
    %368 = vector.broadcast %cst_162 : f32 to vector<16x1xf32>
    %369 = arith.divf %367, %368 : vector<16x1xf32>
    %370 = vector.broadcast %362 : vector<16x1xf32> to vector<16x32xf32>
    %371 = arith.subf %317, %370 : vector<16x32xf32>
    %372 = vector.broadcast %357 : vector<1x32xf32> to vector<16x32xf32>
    %373 = arith.mulf %372, %371 : vector<16x32xf32>
    %cst_163 = arith.constant 9.99999997E-7 : f32
    %374 = vector.broadcast %cst_163 : f32 to vector<16x1xf32>
    %375 = arith.addf %369, %374 : vector<16x1xf32>
    %376 = math.rsqrt %375 : vector<16x1xf32>
    %377 = vector.broadcast %376 : vector<16x1xf32> to vector<16x32xf32>
    %378 = arith.mulf %373, %377 : vector<16x32xf32>
    %379 = vector.broadcast %358 : vector<1x32xf32> to vector<16x32xf32>
    %380 = arith.addf %378, %379 : vector<16x32xf32>
    %cst_164 = arith.constant 0.000000e+00 : f32
    %381 = vector.broadcast %cst_164 : f32 to vector<8x32xf32>
    %cst_165 = arith.constant 0.000000e+00 : f32
    %382 = vector.broadcast %cst_165 : f32 to vector<8x32xf32>
    %c0_166 = arith.constant 0 : index
    %c0_167 = arith.constant 0 : index
    %383 = vector.load %arg8[%c0_166, %c0_167] : memref<32x32xf32, #tpu.memory_space<vmem>>, vector<32x8xf32>
    %c0_168 = arith.constant 0 : index
    %c0_169 = arith.constant 0 : index
    %384 = vector.load %arg9[%c0_168, %c0_169] : memref<32x32xf32, #tpu.memory_space<vmem>>, vector<32x8xf32>
    %c0_170 = arith.constant 0 : index
    %c0_171 = arith.constant 0 : index
    %385 = vector.load %arg10[%c0_170, %c0_171] : memref<32x32xf32, #tpu.memory_space<vmem>>, vector<32x8xf32>
    %c0_172 = arith.constant 0 : index
    %c0_173 = arith.constant 0 : index
    %386 = vector.load %arg11[%c0_172, %c0_173] : memref<32x32xf32, #tpu.memory_space<vmem>>, vector<8x32xf32>
    %cst_174 = arith.constant dense<0.000000e+00> : vector<16x8xf32>
    %387 = tpu.matmul %380, %383, %cst_174 {dimension_numbers = #tpu.dot_dimension_numbers<[1], [0], [0], [1], [0, 0, 1, 1], [], []>} : vector<16x32xf32>, vector<32x8xf32>, vector<16x8xf32> -> vector<16x8xf32>
    %cst_175 = arith.constant 0.353553385 : f32
    %388 = vector.broadcast %cst_175 : f32 to vector<16x8xf32>
    %389 = arith.mulf %387, %388 : vector<16x8xf32>
    %cst_176 = arith.constant dense<0.000000e+00> : vector<16x8xf32>
    %390 = tpu.matmul %380, %384, %cst_176 {dimension_numbers = #tpu.dot_dimension_numbers<[1], [0], [0], [1], [0, 0, 1, 1], [], []>} : vector<16x32xf32>, vector<32x8xf32>, vector<16x8xf32> -> vector<16x8xf32>
    %cst_177 = arith.constant dense<0.000000e+00> : vector<16x8xf32>
    %391 = tpu.matmul %380, %385, %cst_177 {dimension_numbers = #tpu.dot_dimension_numbers<[1], [0], [0], [1], [0, 0, 1, 1], [], []>} : vector<16x32xf32>, vector<32x8xf32>, vector<16x8xf32> -> vector<16x8xf32>
    %392 = vector.extract_strided_slice %389 {offsets = [0, 0], sizes = [8, 8], strides = [1, 1]} : vector<16x8xf32> to vector<8x8xf32>
    %393 = vector.extract_strided_slice %390 {offsets = [0, 0], sizes = [8, 8], strides = [1, 1]} : vector<16x8xf32> to vector<8x8xf32>
    %394 = tpu.transpose %393, [1, 0] : vector<8x8xf32> -> vector<8x8xf32>
    %cst_178 = arith.constant dense<0.000000e+00> : vector<8x8xf32>
    %395 = tpu.matmul %392, %394, %cst_178 {dimension_numbers = #tpu.dot_dimension_numbers<[1], [0], [0], [1], [0, 0, 1, 1], [], []>} : vector<8x8xf32>, vector<8x8xf32>, vector<8x8xf32> -> vector<8x8xf32>
    %cst_179 = arith.constant dense<0xFF800000> : vector<8xf32>
    %396 = vector.multi_reduction <maximumf>, %395, %cst_179 [1] : vector<8x8xf32> to vector<8xf32>
    %cst_180 = arith.constant 0xFF800000 : f32
    %397 = vector.broadcast %cst_180 : f32 to vector<8xf32>
    %398 = arith.maximumf %397, %396 : vector<8xf32>
    %399 = vector.shape_cast %398 : vector<8xf32> to vector<8x1xf32>
    %400 = vector.broadcast %399 : vector<8x1xf32> to vector<8x8xf32>
    %401 = arith.subf %395, %400 : vector<8x8xf32>
    %402 = math.exp %401 : vector<8x8xf32>
    %cst_181 = arith.constant dense<0.000000e+00> : vector<8xf32>
    %403 = vector.multi_reduction <add>, %402, %cst_181 [1] : vector<8x8xf32> to vector<8xf32>
    %404 = vector.shape_cast %403 : vector<8xf32> to vector<8x1xf32>
    %405 = vector.broadcast %404 : vector<8x1xf32> to vector<8x8xf32>
    %406 = arith.divf %402, %405 : vector<8x8xf32>
    %407 = vector.extract_strided_slice %391 {offsets = [0, 0], sizes = [8, 8], strides = [1, 1]} : vector<16x8xf32> to vector<8x8xf32>
    %cst_182 = arith.constant dense<0.000000e+00> : vector<8x8xf32>
    %408 = tpu.matmul %406, %407, %cst_182 {dimension_numbers = #tpu.dot_dimension_numbers<[1], [0], [0], [1], [0, 0, 1, 1], [], []>} : vector<8x8xf32>, vector<8x8xf32>, vector<8x8xf32> -> vector<8x8xf32>
    %cst_183 = arith.constant dense<0.000000e+00> : vector<8x32xf32>
    %409 = tpu.matmul %408, %386, %cst_183 {dimension_numbers = #tpu.dot_dimension_numbers<[1], [0], [0], [1], [0, 0, 1, 1], [], []>} : vector<8x8xf32>, vector<8x32xf32>, vector<8x32xf32> -> vector<8x32xf32>
    %410 = arith.addf %381, %409 : vector<8x32xf32>
    %411 = vector.extract_strided_slice %389 {offsets = [8, 0], sizes = [8, 8], strides = [1, 1]} : vector<16x8xf32> to vector<8x8xf32>
    %412 = vector.extract_strided_slice %390 {offsets = [8, 0], sizes = [8, 8], strides = [1, 1]} : vector<16x8xf32> to vector<8x8xf32>
    %413 = tpu.transpose %412, [1, 0] : vector<8x8xf32> -> vector<8x8xf32>
    %cst_184 = arith.constant dense<0.000000e+00> : vector<8x8xf32>
    %414 = tpu.matmul %411, %413, %cst_184 {dimension_numbers = #tpu.dot_dimension_numbers<[1], [0], [0], [1], [0, 0, 1, 1], [], []>} : vector<8x8xf32>, vector<8x8xf32>, vector<8x8xf32> -> vector<8x8xf32>
    %cst_185 = arith.constant dense<0xFF800000> : vector<8xf32>
    %415 = vector.multi_reduction <maximumf>, %414, %cst_185 [1] : vector<8x8xf32> to vector<8xf32>
    %cst_186 = arith.constant 0xFF800000 : f32
    %416 = vector.broadcast %cst_186 : f32 to vector<8xf32>
    %417 = arith.maximumf %416, %415 : vector<8xf32>
    %418 = vector.shape_cast %417 : vector<8xf32> to vector<8x1xf32>
    %419 = vector.broadcast %418 : vector<8x1xf32> to vector<8x8xf32>
    %420 = arith.subf %414, %419 : vector<8x8xf32>
    %421 = math.exp %420 : vector<8x8xf32>
    %cst_187 = arith.constant dense<0.000000e+00> : vector<8xf32>
    %422 = vector.multi_reduction <add>, %421, %cst_187 [1] : vector<8x8xf32> to vector<8xf32>
    %423 = vector.shape_cast %422 : vector<8xf32> to vector<8x1xf32>
    %424 = vector.broadcast %423 : vector<8x1xf32> to vector<8x8xf32>
    %425 = arith.divf %421, %424 : vector<8x8xf32>
    %426 = vector.extract_strided_slice %391 {offsets = [8, 0], sizes = [8, 8], strides = [1, 1]} : vector<16x8xf32> to vector<8x8xf32>
    %cst_188 = arith.constant dense<0.000000e+00> : vector<8x8xf32>
    %427 = tpu.matmul %425, %426, %cst_188 {dimension_numbers = #tpu.dot_dimension_numbers<[1], [0], [0], [1], [0, 0, 1, 1], [], []>} : vector<8x8xf32>, vector<8x8xf32>, vector<8x8xf32> -> vector<8x8xf32>
    %cst_189 = arith.constant dense<0.000000e+00> : vector<8x32xf32>
    %428 = tpu.matmul %427, %386, %cst_189 {dimension_numbers = #tpu.dot_dimension_numbers<[1], [0], [0], [1], [0, 0, 1, 1], [], []>} : vector<8x8xf32>, vector<8x32xf32>, vector<8x32xf32> -> vector<8x32xf32>
    %429 = arith.addf %382, %428 : vector<8x32xf32>
    %c0_190 = arith.constant 0 : index
    %c8_191 = arith.constant 8 : index
    %430 = vector.load %arg8[%c0_190, %c8_191] : memref<32x32xf32, #tpu.memory_space<vmem>>, vector<32x8xf32>
    %c0_192 = arith.constant 0 : index
    %c8_193 = arith.constant 8 : index
    %431 = vector.load %arg9[%c0_192, %c8_193] : memref<32x32xf32, #tpu.memory_space<vmem>>, vector<32x8xf32>
    %c0_194 = arith.constant 0 : index
    %c8_195 = arith.constant 8 : index
    %432 = vector.load %arg10[%c0_194, %c8_195] : memref<32x32xf32, #tpu.memory_space<vmem>>, vector<32x8xf32>
    %c8_196 = arith.constant 8 : index
    %c0_197 = arith.constant 0 : index
    %433 = vector.load %arg11[%c8_196, %c0_197] : memref<32x32xf32, #tpu.memory_space<vmem>>, vector<8x32xf32>
    %cst_198 = arith.constant dense<0.000000e+00> : vector<16x8xf32>
    %434 = tpu.matmul %380, %430, %cst_198 {dimension_numbers = #tpu.dot_dimension_numbers<[1], [0], [0], [1], [0, 0, 1, 1], [], []>} : vector<16x32xf32>, vector<32x8xf32>, vector<16x8xf32> -> vector<16x8xf32>
    %cst_199 = arith.constant 0.353553385 : f32
    %435 = vector.broadcast %cst_199 : f32 to vector<16x8xf32>
    %436 = arith.mulf %434, %435 : vector<16x8xf32>
    %cst_200 = arith.constant dense<0.000000e+00> : vector<16x8xf32>
    %437 = tpu.matmul %380, %431, %cst_200 {dimension_numbers = #tpu.dot_dimension_numbers<[1], [0], [0], [1], [0, 0, 1, 1], [], []>} : vector<16x32xf32>, vector<32x8xf32>, vector<16x8xf32> -> vector<16x8xf32>
    %cst_201 = arith.constant dense<0.000000e+00> : vector<16x8xf32>
    %438 = tpu.matmul %380, %432, %cst_201 {dimension_numbers = #tpu.dot_dimension_numbers<[1], [0], [0], [1], [0, 0, 1, 1], [], []>} : vector<16x32xf32>, vector<32x8xf32>, vector<16x8xf32> -> vector<16x8xf32>
    %439 = vector.extract_strided_slice %436 {offsets = [0, 0], sizes = [8, 8], strides = [1, 1]} : vector<16x8xf32> to vector<8x8xf32>
    %440 = vector.extract_strided_slice %437 {offsets = [0, 0], sizes = [8, 8], strides = [1, 1]} : vector<16x8xf32> to vector<8x8xf32>
    %441 = tpu.transpose %440, [1, 0] : vector<8x8xf32> -> vector<8x8xf32>
    %cst_202 = arith.constant dense<0.000000e+00> : vector<8x8xf32>
    %442 = tpu.matmul %439, %441, %cst_202 {dimension_numbers = #tpu.dot_dimension_numbers<[1], [0], [0], [1], [0, 0, 1, 1], [], []>} : vector<8x8xf32>, vector<8x8xf32>, vector<8x8xf32> -> vector<8x8xf32>
    %cst_203 = arith.constant dense<0xFF800000> : vector<8xf32>
    %443 = vector.multi_reduction <maximumf>, %442, %cst_203 [1] : vector<8x8xf32> to vector<8xf32>
    %cst_204 = arith.constant 0xFF800000 : f32
    %444 = vector.broadcast %cst_204 : f32 to vector<8xf32>
    %445 = arith.maximumf %444, %443 : vector<8xf32>
    %446 = vector.shape_cast %445 : vector<8xf32> to vector<8x1xf32>
    %447 = vector.broadcast %446 : vector<8x1xf32> to vector<8x8xf32>
    %448 = arith.subf %442, %447 : vector<8x8xf32>
    %449 = math.exp %448 : vector<8x8xf32>
    %cst_205 = arith.constant dense<0.000000e+00> : vector<8xf32>
    %450 = vector.multi_reduction <add>, %449, %cst_205 [1] : vector<8x8xf32> to vector<8xf32>
    %451 = vector.shape_cast %450 : vector<8xf32> to vector<8x1xf32>
    %452 = vector.broadcast %451 : vector<8x1xf32> to vector<8x8xf32>
    %453 = arith.divf %449, %452 : vector<8x8xf32>
    %454 = vector.extract_strided_slice %438 {offsets = [0, 0], sizes = [8, 8], strides = [1, 1]} : vector<16x8xf32> to vector<8x8xf32>
    %cst_206 = arith.constant dense<0.000000e+00> : vector<8x8xf32>
    %455 = tpu.matmul %453, %454, %cst_206 {dimension_numbers = #tpu.dot_dimension_numbers<[1], [0], [0], [1], [0, 0, 1, 1], [], []>} : vector<8x8xf32>, vector<8x8xf32>, vector<8x8xf32> -> vector<8x8xf32>
    %cst_207 = arith.constant dense<0.000000e+00> : vector<8x32xf32>
    %456 = tpu.matmul %455, %433, %cst_207 {dimension_numbers = #tpu.dot_dimension_numbers<[1], [0], [0], [1], [0, 0, 1, 1], [], []>} : vector<8x8xf32>, vector<8x32xf32>, vector<8x32xf32> -> vector<8x32xf32>
    %457 = arith.addf %410, %456 : vector<8x32xf32>
    %458 = vector.extract_strided_slice %436 {offsets = [8, 0], sizes = [8, 8], strides = [1, 1]} : vector<16x8xf32> to vector<8x8xf32>
    %459 = vector.extract_strided_slice %437 {offsets = [8, 0], sizes = [8, 8], strides = [1, 1]} : vector<16x8xf32> to vector<8x8xf32>
    %460 = tpu.transpose %459, [1, 0] : vector<8x8xf32> -> vector<8x8xf32>
    %cst_208 = arith.constant dense<0.000000e+00> : vector<8x8xf32>
    %461 = tpu.matmul %458, %460, %cst_208 {dimension_numbers = #tpu.dot_dimension_numbers<[1], [0], [0], [1], [0, 0, 1, 1], [], []>} : vector<8x8xf32>, vector<8x8xf32>, vector<8x8xf32> -> vector<8x8xf32>
    %cst_209 = arith.constant dense<0xFF800000> : vector<8xf32>
    %462 = vector.multi_reduction <maximumf>, %461, %cst_209 [1] : vector<8x8xf32> to vector<8xf32>
    %cst_210 = arith.constant 0xFF800000 : f32
    %463 = vector.broadcast %cst_210 : f32 to vector<8xf32>
    %464 = arith.maximumf %463, %462 : vector<8xf32>
    %465 = vector.shape_cast %464 : vector<8xf32> to vector<8x1xf32>
    %466 = vector.broadcast %465 : vector<8x1xf32> to vector<8x8xf32>
    %467 = arith.subf %461, %466 : vector<8x8xf32>
    %468 = math.exp %467 : vector<8x8xf32>
    %cst_211 = arith.constant dense<0.000000e+00> : vector<8xf32>
    %469 = vector.multi_reduction <add>, %468, %cst_211 [1] : vector<8x8xf32> to vector<8xf32>
    %470 = vector.shape_cast %469 : vector<8xf32> to vector<8x1xf32>
    %471 = vector.broadcast %470 : vector<8x1xf32> to vector<8x8xf32>
    %472 = arith.divf %468, %471 : vector<8x8xf32>
    %473 = vector.extract_strided_slice %438 {offsets = [8, 0], sizes = [8, 8], strides = [1, 1]} : vector<16x8xf32> to vector<8x8xf32>
    %cst_212 = arith.constant dense<0.000000e+00> : vector<8x8xf32>
    %474 = tpu.matmul %472, %473, %cst_212 {dimension_numbers = #tpu.dot_dimension_numbers<[1], [0], [0], [1], [0, 0, 1, 1], [], []>} : vector<8x8xf32>, vector<8x8xf32>, vector<8x8xf32> -> vector<8x8xf32>
    %cst_213 = arith.constant dense<0.000000e+00> : vector<8x32xf32>
    %475 = tpu.matmul %474, %433, %cst_213 {dimension_numbers = #tpu.dot_dimension_numbers<[1], [0], [0], [1], [0, 0, 1, 1], [], []>} : vector<8x8xf32>, vector<8x32xf32>, vector<8x32xf32> -> vector<8x32xf32>
    %476 = arith.addf %429, %475 : vector<8x32xf32>
    %c0_214 = arith.constant 0 : index
    %c16_215 = arith.constant 16 : index
    %477 = vector.load %arg8[%c0_214, %c16_215] : memref<32x32xf32, #tpu.memory_space<vmem>>, vector<32x8xf32>
    %c0_216 = arith.constant 0 : index
    %c16_217 = arith.constant 16 : index
    %478 = vector.load %arg9[%c0_216, %c16_217] : memref<32x32xf32, #tpu.memory_space<vmem>>, vector<32x8xf32>
    %c0_218 = arith.constant 0 : index
    %c16_219 = arith.constant 16 : index
    %479 = vector.load %arg10[%c0_218, %c16_219] : memref<32x32xf32, #tpu.memory_space<vmem>>, vector<32x8xf32>
    %c16_220 = arith.constant 16 : index
    %c0_221 = arith.constant 0 : index
    %480 = vector.load %arg11[%c16_220, %c0_221] : memref<32x32xf32, #tpu.memory_space<vmem>>, vector<8x32xf32>
    %cst_222 = arith.constant dense<0.000000e+00> : vector<16x8xf32>
    %481 = tpu.matmul %380, %477, %cst_222 {dimension_numbers = #tpu.dot_dimension_numbers<[1], [0], [0], [1], [0, 0, 1, 1], [], []>} : vector<16x32xf32>, vector<32x8xf32>, vector<16x8xf32> -> vector<16x8xf32>
    %cst_223 = arith.constant 0.353553385 : f32
    %482 = vector.broadcast %cst_223 : f32 to vector<16x8xf32>
    %483 = arith.mulf %481, %482 : vector<16x8xf32>
    %cst_224 = arith.constant dense<0.000000e+00> : vector<16x8xf32>
    %484 = tpu.matmul %380, %478, %cst_224 {dimension_numbers = #tpu.dot_dimension_numbers<[1], [0], [0], [1], [0, 0, 1, 1], [], []>} : vector<16x32xf32>, vector<32x8xf32>, vector<16x8xf32> -> vector<16x8xf32>
    %cst_225 = arith.constant dense<0.000000e+00> : vector<16x8xf32>
    %485 = tpu.matmul %380, %479, %cst_225 {dimension_numbers = #tpu.dot_dimension_numbers<[1], [0], [0], [1], [0, 0, 1, 1], [], []>} : vector<16x32xf32>, vector<32x8xf32>, vector<16x8xf32> -> vector<16x8xf32>
    %486 = vector.extract_strided_slice %483 {offsets = [0, 0], sizes = [8, 8], strides = [1, 1]} : vector<16x8xf32> to vector<8x8xf32>
    %487 = vector.extract_strided_slice %484 {offsets = [0, 0], sizes = [8, 8], strides = [1, 1]} : vector<16x8xf32> to vector<8x8xf32>
    %488 = tpu.transpose %487, [1, 0] : vector<8x8xf32> -> vector<8x8xf32>
    %cst_226 = arith.constant dense<0.000000e+00> : vector<8x8xf32>
    %489 = tpu.matmul %486, %488, %cst_226 {dimension_numbers = #tpu.dot_dimension_numbers<[1], [0], [0], [1], [0, 0, 1, 1], [], []>} : vector<8x8xf32>, vector<8x8xf32>, vector<8x8xf32> -> vector<8x8xf32>
    %cst_227 = arith.constant dense<0xFF800000> : vector<8xf32>
    %490 = vector.multi_reduction <maximumf>, %489, %cst_227 [1] : vector<8x8xf32> to vector<8xf32>
    %cst_228 = arith.constant 0xFF800000 : f32
    %491 = vector.broadcast %cst_228 : f32 to vector<8xf32>
    %492 = arith.maximumf %491, %490 : vector<8xf32>
    %493 = vector.shape_cast %492 : vector<8xf32> to vector<8x1xf32>
    %494 = vector.broadcast %493 : vector<8x1xf32> to vector<8x8xf32>
    %495 = arith.subf %489, %494 : vector<8x8xf32>
    %496 = math.exp %495 : vector<8x8xf32>
    %cst_229 = arith.constant dense<0.000000e+00> : vector<8xf32>
    %497 = vector.multi_reduction <add>, %496, %cst_229 [1] : vector<8x8xf32> to vector<8xf32>
    %498 = vector.shape_cast %497 : vector<8xf32> to vector<8x1xf32>
    %499 = vector.broadcast %498 : vector<8x1xf32> to vector<8x8xf32>
    %500 = arith.divf %496, %499 : vector<8x8xf32>
    %501 = vector.extract_strided_slice %485 {offsets = [0, 0], sizes = [8, 8], strides = [1, 1]} : vector<16x8xf32> to vector<8x8xf32>
    %cst_230 = arith.constant dense<0.000000e+00> : vector<8x8xf32>
    %502 = tpu.matmul %500, %501, %cst_230 {dimension_numbers = #tpu.dot_dimension_numbers<[1], [0], [0], [1], [0, 0, 1, 1], [], []>} : vector<8x8xf32>, vector<8x8xf32>, vector<8x8xf32> -> vector<8x8xf32>
    %cst_231 = arith.constant dense<0.000000e+00> : vector<8x32xf32>
    %503 = tpu.matmul %502, %480, %cst_231 {dimension_numbers = #tpu.dot_dimension_numbers<[1], [0], [0], [1], [0, 0, 1, 1], [], []>} : vector<8x8xf32>, vector<8x32xf32>, vector<8x32xf32> -> vector<8x32xf32>
    %504 = arith.addf %457, %503 : vector<8x32xf32>
    %505 = vector.extract_strided_slice %483 {offsets = [8, 0], sizes = [8, 8], strides = [1, 1]} : vector<16x8xf32> to vector<8x8xf32>
    %506 = vector.extract_strided_slice %484 {offsets = [8, 0], sizes = [8, 8], strides = [1, 1]} : vector<16x8xf32> to vector<8x8xf32>
    %507 = tpu.transpose %506, [1, 0] : vector<8x8xf32> -> vector<8x8xf32>
    %cst_232 = arith.constant dense<0.000000e+00> : vector<8x8xf32>
    %508 = tpu.matmul %505, %507, %cst_232 {dimension_numbers = #tpu.dot_dimension_numbers<[1], [0], [0], [1], [0, 0, 1, 1], [], []>} : vector<8x8xf32>, vector<8x8xf32>, vector<8x8xf32> -> vector<8x8xf32>
    %cst_233 = arith.constant dense<0xFF800000> : vector<8xf32>
    %509 = vector.multi_reduction <maximumf>, %508, %cst_233 [1] : vector<8x8xf32> to vector<8xf32>
    %cst_234 = arith.constant 0xFF800000 : f32
    %510 = vector.broadcast %cst_234 : f32 to vector<8xf32>
    %511 = arith.maximumf %510, %509 : vector<8xf32>
    %512 = vector.shape_cast %511 : vector<8xf32> to vector<8x1xf32>
    %513 = vector.broadcast %512 : vector<8x1xf32> to vector<8x8xf32>
    %514 = arith.subf %508, %513 : vector<8x8xf32>
    %515 = math.exp %514 : vector<8x8xf32>
    %cst_235 = arith.constant dense<0.000000e+00> : vector<8xf32>
    %516 = vector.multi_reduction <add>, %515, %cst_235 [1] : vector<8x8xf32> to vector<8xf32>
    %517 = vector.shape_cast %516 : vector<8xf32> to vector<8x1xf32>
    %518 = vector.broadcast %517 : vector<8x1xf32> to vector<8x8xf32>
    %519 = arith.divf %515, %518 : vector<8x8xf32>
    %520 = vector.extract_strided_slice %485 {offsets = [8, 0], sizes = [8, 8], strides = [1, 1]} : vector<16x8xf32> to vector<8x8xf32>
    %cst_236 = arith.constant dense<0.000000e+00> : vector<8x8xf32>
    %521 = tpu.matmul %519, %520, %cst_236 {dimension_numbers = #tpu.dot_dimension_numbers<[1], [0], [0], [1], [0, 0, 1, 1], [], []>} : vector<8x8xf32>, vector<8x8xf32>, vector<8x8xf32> -> vector<8x8xf32>
    %cst_237 = arith.constant dense<0.000000e+00> : vector<8x32xf32>
    %522 = tpu.matmul %521, %480, %cst_237 {dimension_numbers = #tpu.dot_dimension_numbers<[1], [0], [0], [1], [0, 0, 1, 1], [], []>} : vector<8x8xf32>, vector<8x32xf32>, vector<8x32xf32> -> vector<8x32xf32>
    %523 = arith.addf %476, %522 : vector<8x32xf32>
    %c0_238 = arith.constant 0 : index
    %c24_239 = arith.constant 24 : index
    %524 = vector.load %arg8[%c0_238, %c24_239] : memref<32x32xf32, #tpu.memory_space<vmem>>, vector<32x8xf32>
    %c0_240 = arith.constant 0 : index
    %c24_241 = arith.constant 24 : index
    %525 = vector.load %arg9[%c0_240, %c24_241] : memref<32x32xf32, #tpu.memory_space<vmem>>, vector<32x8xf32>
    %c0_242 = arith.constant 0 : index
    %c24_243 = arith.constant 24 : index
    %526 = vector.load %arg10[%c0_242, %c24_243] : memref<32x32xf32, #tpu.memory_space<vmem>>, vector<32x8xf32>
    %c24_244 = arith.constant 24 : index
    %c0_245 = arith.constant 0 : index
    %527 = vector.load %arg11[%c24_244, %c0_245] : memref<32x32xf32, #tpu.memory_space<vmem>>, vector<8x32xf32>
    %cst_246 = arith.constant dense<0.000000e+00> : vector<16x8xf32>
    %528 = tpu.matmul %380, %524, %cst_246 {dimension_numbers = #tpu.dot_dimension_numbers<[1], [0], [0], [1], [0, 0, 1, 1], [], []>} : vector<16x32xf32>, vector<32x8xf32>, vector<16x8xf32> -> vector<16x8xf32>
    %cst_247 = arith.constant 0.353553385 : f32
    %529 = vector.broadcast %cst_247 : f32 to vector<16x8xf32>
    %530 = arith.mulf %528, %529 : vector<16x8xf32>
    %cst_248 = arith.constant dense<0.000000e+00> : vector<16x8xf32>
    %531 = tpu.matmul %380, %525, %cst_248 {dimension_numbers = #tpu.dot_dimension_numbers<[1], [0], [0], [1], [0, 0, 1, 1], [], []>} : vector<16x32xf32>, vector<32x8xf32>, vector<16x8xf32> -> vector<16x8xf32>
    %cst_249 = arith.constant dense<0.000000e+00> : vector<16x8xf32>
    %532 = tpu.matmul %380, %526, %cst_249 {dimension_numbers = #tpu.dot_dimension_numbers<[1], [0], [0], [1], [0, 0, 1, 1], [], []>} : vector<16x32xf32>, vector<32x8xf32>, vector<16x8xf32> -> vector<16x8xf32>
    %533 = vector.extract_strided_slice %530 {offsets = [0, 0], sizes = [8, 8], strides = [1, 1]} : vector<16x8xf32> to vector<8x8xf32>
    %534 = vector.extract_strided_slice %531 {offsets = [0, 0], sizes = [8, 8], strides = [1, 1]} : vector<16x8xf32> to vector<8x8xf32>
    %535 = tpu.transpose %534, [1, 0] : vector<8x8xf32> -> vector<8x8xf32>
    %cst_250 = arith.constant dense<0.000000e+00> : vector<8x8xf32>
    %536 = tpu.matmul %533, %535, %cst_250 {dimension_numbers = #tpu.dot_dimension_numbers<[1], [0], [0], [1], [0, 0, 1, 1], [], []>} : vector<8x8xf32>, vector<8x8xf32>, vector<8x8xf32> -> vector<8x8xf32>
    %cst_251 = arith.constant dense<0xFF800000> : vector<8xf32>
    %537 = vector.multi_reduction <maximumf>, %536, %cst_251 [1] : vector<8x8xf32> to vector<8xf32>
    %cst_252 = arith.constant 0xFF800000 : f32
    %538 = vector.broadcast %cst_252 : f32 to vector<8xf32>
    %539 = arith.maximumf %538, %537 : vector<8xf32>
    %540 = vector.shape_cast %539 : vector<8xf32> to vector<8x1xf32>
    %541 = vector.broadcast %540 : vector<8x1xf32> to vector<8x8xf32>
    %542 = arith.subf %536, %541 : vector<8x8xf32>
    %543 = math.exp %542 : vector<8x8xf32>
    %cst_253 = arith.constant dense<0.000000e+00> : vector<8xf32>
    %544 = vector.multi_reduction <add>, %543, %cst_253 [1] : vector<8x8xf32> to vector<8xf32>
    %545 = vector.shape_cast %544 : vector<8xf32> to vector<8x1xf32>
    %546 = vector.broadcast %545 : vector<8x1xf32> to vector<8x8xf32>
    %547 = arith.divf %543, %546 : vector<8x8xf32>
    %548 = vector.extract_strided_slice %532 {offsets = [0, 0], sizes = [8, 8], strides = [1, 1]} : vector<16x8xf32> to vector<8x8xf32>
    %cst_254 = arith.constant dense<0.000000e+00> : vector<8x8xf32>
    %549 = tpu.matmul %547, %548, %cst_254 {dimension_numbers = #tpu.dot_dimension_numbers<[1], [0], [0], [1], [0, 0, 1, 1], [], []>} : vector<8x8xf32>, vector<8x8xf32>, vector<8x8xf32> -> vector<8x8xf32>
    %cst_255 = arith.constant dense<0.000000e+00> : vector<8x32xf32>
    %550 = tpu.matmul %549, %527, %cst_255 {dimension_numbers = #tpu.dot_dimension_numbers<[1], [0], [0], [1], [0, 0, 1, 1], [], []>} : vector<8x8xf32>, vector<8x32xf32>, vector<8x32xf32> -> vector<8x32xf32>
    %551 = arith.addf %504, %550 : vector<8x32xf32>
    %552 = vector.extract_strided_slice %530 {offsets = [8, 0], sizes = [8, 8], strides = [1, 1]} : vector<16x8xf32> to vector<8x8xf32>
    %553 = vector.extract_strided_slice %531 {offsets = [8, 0], sizes = [8, 8], strides = [1, 1]} : vector<16x8xf32> to vector<8x8xf32>
    %554 = tpu.transpose %553, [1, 0] : vector<8x8xf32> -> vector<8x8xf32>
    %cst_256 = arith.constant dense<0.000000e+00> : vector<8x8xf32>
    %555 = tpu.matmul %552, %554, %cst_256 {dimension_numbers = #tpu.dot_dimension_numbers<[1], [0], [0], [1], [0, 0, 1, 1], [], []>} : vector<8x8xf32>, vector<8x8xf32>, vector<8x8xf32> -> vector<8x8xf32>
    %cst_257 = arith.constant dense<0xFF800000> : vector<8xf32>
    %556 = vector.multi_reduction <maximumf>, %555, %cst_257 [1] : vector<8x8xf32> to vector<8xf32>
    %cst_258 = arith.constant 0xFF800000 : f32
    %557 = vector.broadcast %cst_258 : f32 to vector<8xf32>
    %558 = arith.maximumf %557, %556 : vector<8xf32>
    %559 = vector.shape_cast %558 : vector<8xf32> to vector<8x1xf32>
    %560 = vector.broadcast %559 : vector<8x1xf32> to vector<8x8xf32>
    %561 = arith.subf %555, %560 : vector<8x8xf32>
    %562 = math.exp %561 : vector<8x8xf32>
    %cst_259 = arith.constant dense<0.000000e+00> : vector<8xf32>
    %563 = vector.multi_reduction <add>, %562, %cst_259 [1] : vector<8x8xf32> to vector<8xf32>
    %564 = vector.shape_cast %563 : vector<8xf32> to vector<8x1xf32>
    %565 = vector.broadcast %564 : vector<8x1xf32> to vector<8x8xf32>
    %566 = arith.divf %562, %565 : vector<8x8xf32>
    %567 = vector.extract_strided_slice %532 {offsets = [8, 0], sizes = [8, 8], strides = [1, 1]} : vector<16x8xf32> to vector<8x8xf32>
    %cst_260 = arith.constant dense<0.000000e+00> : vector<8x8xf32>
    %568 = tpu.matmul %566, %567, %cst_260 {dimension_numbers = #tpu.dot_dimension_numbers<[1], [0], [0], [1], [0, 0, 1, 1], [], []>} : vector<8x8xf32>, vector<8x8xf32>, vector<8x8xf32> -> vector<8x8xf32>
    %cst_261 = arith.constant dense<0.000000e+00> : vector<8x32xf32>
    %569 = tpu.matmul %568, %527, %cst_261 {dimension_numbers = #tpu.dot_dimension_numbers<[1], [0], [0], [1], [0, 0, 1, 1], [], []>} : vector<8x8xf32>, vector<8x32xf32>, vector<8x32xf32> -> vector<8x32xf32>
    %570 = arith.addf %523, %569 : vector<8x32xf32>
    %571 = tpu.concatenate %551, %570 in 0 : vector<8x32xf32>, vector<8x32xf32> -> vector<16x32xf32>
    %572 = arith.addf %317, %571 : vector<16x32xf32>
    %c0_262 = arith.constant 0 : index
    %c0_263 = arith.constant 0 : index
    %573 = vector.load %arg12[%c0_262, %c0_263] : memref<1x32xf32, #tpu.memory_space<vmem>>, vector<1x32xf32>
    %c0_264 = arith.constant 0 : index
    %c0_265 = arith.constant 0 : index
    %574 = vector.load %arg13[%c0_264, %c0_265] : memref<1x32xf32, #tpu.memory_space<vmem>>, vector<1x32xf32>
    %cst_266 = arith.constant dense<0.000000e+00> : vector<16xf32>
    %575 = vector.multi_reduction <add>, %572, %cst_266 [1] : vector<16x32xf32> to vector<16xf32>
    %576 = vector.shape_cast %575 : vector<16xf32> to vector<16x1xf32>
    %cst_267 = arith.constant 3.200000e+01 : f32
    %577 = vector.broadcast %cst_267 : f32 to vector<16x1xf32>
    %578 = arith.divf %576, %577 : vector<16x1xf32>
    %579 = vector.broadcast %578 : vector<16x1xf32> to vector<16x32xf32>
    %580 = arith.subf %572, %579 : vector<16x32xf32>
    %581 = arith.mulf %580, %580 : vector<16x32xf32>
    %cst_268 = arith.constant dense<0.000000e+00> : vector<16xf32>
    %582 = vector.multi_reduction <add>, %581, %cst_268 [1] : vector<16x32xf32> to vector<16xf32>
    %583 = vector.shape_cast %582 : vector<16xf32> to vector<16x1xf32>
    %cst_269 = arith.constant 3.200000e+01 : f32
    %584 = vector.broadcast %cst_269 : f32 to vector<16x1xf32>
    %585 = arith.divf %583, %584 : vector<16x1xf32>
    %586 = vector.broadcast %578 : vector<16x1xf32> to vector<16x32xf32>
    %587 = arith.subf %572, %586 : vector<16x32xf32>
    %588 = vector.broadcast %573 : vector<1x32xf32> to vector<16x32xf32>
    %589 = arith.mulf %588, %587 : vector<16x32xf32>
    %cst_270 = arith.constant 9.99999997E-7 : f32
    %590 = vector.broadcast %cst_270 : f32 to vector<16x1xf32>
    %591 = arith.addf %585, %590 : vector<16x1xf32>
    %592 = math.rsqrt %591 : vector<16x1xf32>
    %593 = vector.broadcast %592 : vector<16x1xf32> to vector<16x32xf32>
    %594 = arith.mulf %589, %593 : vector<16x32xf32>
    %595 = vector.broadcast %574 : vector<1x32xf32> to vector<16x32xf32>
    %596 = arith.addf %594, %595 : vector<16x32xf32>
    %c0_271 = arith.constant 0 : index
    %c0_272 = arith.constant 0 : index
    %597 = vector.load %arg14[%c0_271, %c0_272] : memref<32x64xf32, #tpu.memory_space<vmem>>, vector<32x64xf32>
    %cst_273 = arith.constant dense<0.000000e+00> : vector<16x64xf32>
    %598 = tpu.matmul %596, %597, %cst_273 {dimension_numbers = #tpu.dot_dimension_numbers<[1], [0], [0], [1], [0, 0, 1, 1], [], []>} : vector<16x32xf32>, vector<32x64xf32>, vector<16x64xf32> -> vector<16x64xf32>
    %c0_274 = arith.constant 0 : index
    %c0_275 = arith.constant 0 : index
    %599 = vector.load %arg15[%c0_274, %c0_275] : memref<1x64xf32, #tpu.memory_space<vmem>>, vector<1x64xf32>
    %600 = vector.broadcast %599 : vector<1x64xf32> to vector<16x64xf32>
    %601 = arith.addf %598, %600 : vector<16x64xf32>
    %cst_276 = arith.constant 0.000000e+00 : f32
    %602 = vector.broadcast %cst_276 : f32 to vector<16x64xf32>
    %603 = arith.maximumf %601, %602 : vector<16x64xf32>
    %c0_277 = arith.constant 0 : index
    %c0_278 = arith.constant 0 : index
    %604 = vector.load %arg16[%c0_277, %c0_278] : memref<64x32xf32, #tpu.memory_space<vmem>>, vector<64x32xf32>
    %cst_279 = arith.constant dense<0.000000e+00> : vector<16x32xf32>
    %605 = tpu.matmul %603, %604, %cst_279 {dimension_numbers = #tpu.dot_dimension_numbers<[1], [0], [0], [1], [0, 0, 1, 1], [], []>} : vector<16x64xf32>, vector<64x32xf32>, vector<16x32xf32> -> vector<16x32xf32>
    %c0_280 = arith.constant 0 : index
    %c0_281 = arith.constant 0 : index
    %606 = vector.load %arg17[%c0_280, %c0_281] : memref<1x32xf32, #tpu.memory_space<vmem>>, vector<1x32xf32>
    %607 = vector.broadcast %606 : vector<1x32xf32> to vector<16x32xf32>
    %608 = arith.addf %605, %607 : vector<16x32xf32>
    %609 = arith.addf %572, %608 : vector<16x32xf32>
    %610 = vector.broadcast %356 : vector<16x1xf32> to vector<16x32xf32>
    %611 = arith.mulf %609, %610 : vector<16x32xf32>
    %cst_282 = arith.constant 1.000000e+00 : f32
    %612 = vector.broadcast %cst_282 : f32 to vector<16x1xf32>
    %613 = arith.subf %612, %356 : vector<16x1xf32>
    %614 = vector.broadcast %613 : vector<16x1xf32> to vector<16x32xf32>
    %615 = arith.mulf %313, %614 : vector<16x32xf32>
    %616 = arith.addf %611, %615 : vector<16x32xf32>
    %c0_283 = arith.constant 0 : index
    %c0_284 = arith.constant 0 : index
    %617 = vector.load %arg18[%c0_283, %c0_284] : memref<1x32xf32, #tpu.memory_space<vmem>>, vector<1x32xf32>
    %c0_285 = arith.constant 0 : index
    %c0_286 = arith.constant 0 : index
    %618 = vector.load %arg19[%c0_285, %c0_286] : memref<1x32xf32, #tpu.memory_space<vmem>>, vector<1x32xf32>
    %cst_287 = arith.constant dense<0.000000e+00> : vector<16xf32>
    %619 = vector.multi_reduction <add>, %616, %cst_287 [1] : vector<16x32xf32> to vector<16xf32>
    %620 = vector.shape_cast %619 : vector<16xf32> to vector<16x1xf32>
    %cst_288 = arith.constant 3.200000e+01 : f32
    %621 = vector.broadcast %cst_288 : f32 to vector<16x1xf32>
    %622 = arith.divf %620, %621 : vector<16x1xf32>
    %623 = vector.broadcast %622 : vector<16x1xf32> to vector<16x32xf32>
    %624 = arith.subf %616, %623 : vector<16x32xf32>
    %625 = arith.mulf %624, %624 : vector<16x32xf32>
    %cst_289 = arith.constant dense<0.000000e+00> : vector<16xf32>
    %626 = vector.multi_reduction <add>, %625, %cst_289 [1] : vector<16x32xf32> to vector<16xf32>
    %627 = vector.shape_cast %626 : vector<16xf32> to vector<16x1xf32>
    %cst_290 = arith.constant 3.200000e+01 : f32
    %628 = vector.broadcast %cst_290 : f32 to vector<16x1xf32>
    %629 = arith.divf %627, %628 : vector<16x1xf32>
    %630 = vector.broadcast %622 : vector<16x1xf32> to vector<16x32xf32>
    %631 = arith.subf %616, %630 : vector<16x32xf32>
    %632 = vector.broadcast %617 : vector<1x32xf32> to vector<16x32xf32>
    %633 = arith.mulf %632, %631 : vector<16x32xf32>
    %cst_291 = arith.constant 9.99999997E-7 : f32
    %634 = vector.broadcast %cst_291 : f32 to vector<16x1xf32>
    %635 = arith.addf %629, %634 : vector<16x1xf32>
    %636 = math.rsqrt %635 : vector<16x1xf32>
    %637 = vector.broadcast %636 : vector<16x1xf32> to vector<16x32xf32>
    %638 = arith.mulf %633, %637 : vector<16x32xf32>
    %639 = vector.broadcast %618 : vector<1x32xf32> to vector<16x32xf32>
    %640 = arith.addf %638, %639 : vector<16x32xf32>
    %641 = tpu.concatenate %640, %351, %353 in 1 : vector<16x32xf32>, vector<16x1xf32>, vector<16x1xf32> -> vector<16x34xf32>
    %c0_292 = arith.constant 0 : index
    %c0_293 = arith.constant 0 : index
    %642 = vector.load %arg20[%c0_292, %c0_293] : memref<16x34xf32, #tpu.memory_space<vmem>>, vector<16x34xf32>
    tpu.vector_store %arg20[%c0_292, %c0_293], %641 {strides = array<i32>} : memref<16x34xf32, #tpu.memory_space<vmem>>, vector<16x34xf32>,
    return
  }
}

</mosaic_0001>

<bundles_post_ra>
// kernel: tpu_custom_call.1
= control target key start
LH: loop header
LB: loop body
LE: loop exit
PB: predicated region body
PF: predicated region fallthrough
CT: control target
= control target key end

     0   :  { %s4670_s0 = inlined_call_operand.hbm [shape: f32[16,32], index: 0, kind: input, shape index: {}]   ;;  %s4671_s1 = inlined_call_operand.hbm [shape: f32[16,32], index: 1, kind: input, shape index: {}]   ;;  %s4672_s2 = inlined_call_operand.vmem [shape: f32[2,32], index: 2, kind: input, shape index: {}]   ;;  %s4673_s3 = inlined_call_operand.<no memory space> [shape: f32[1,1], index: 3, kind: input, shape index: {}]   ;;  %s4674_s4 = inlined_call_operand.vmem [shape: f32[32,32], index: 4, kind: input, shape index: {}]   ;;  %s4675_s5 = inlined_call_operand.vmem [shape: f32[1,32], index: 5, kind: input, shape index: {}]   ;;  %s4676_s6 = inlined_call_operand.vmem [shape: f32[1,32], index: 6, kind: input, shape index: {}]   ;;  %s4677_s7 = inlined_call_operand.vmem [shape: f32[1,32], index: 7, kind: input, shape index: {}]   ;;  %s4678_s8 = inlined_call_operand.vmem [shape: f32[32,32], index: 8, kind: input, shape index: {}]   ;;  %s4679_s9 = inlined_call_operand.vmem [shape: f32[32,32], index: 9, kind: input, shape index: {}]   ;;  %s4680_s10 = inlined_call_operand.hbm [shape: f32[32,32], index: 10, kind: input, shape index: {}]   ;;  %s4681_s11 = inlined_call_operand.hbm [shape: f32[32,32], index: 11, kind: input, shape index: {}]   ;;  %s4682_s12 = inlined_call_operand.vmem [shape: f32[1,32], index: 12, kind: input, shape index: {}]   ;;  %s4683_s13 = inlined_call_operand.vmem [shape: f32[1,32], index: 13, kind: input, shape index: {}]   ;;  %s4684_s14 = inlined_call_operand.hbm [shape: f32[32,64], index: 14, kind: input, shape index: {}]   ;;  %s4685_s15 = inlined_call_operand.vmem [shape: f32[1,64], index: 15, kind: input, shape index: {}]   ;;  %s4686_s16 = inlined_call_operand.vmem [shape: f32[64,32], index: 16, kind: input, shape index: {}]   ;;  %s4687_s17 = inlined_call_operand.vmem [shape: f32[1,32], index: 17, kind: input, shape index: {}]   ;;  %s4688_s18 = inlined_call_operand.vmem [shape: f32[1,32], index: 18, kind: input, shape index: {}]   ;;  %s4689_s19 = inlined_call_operand.vmem [shape: f32[1,32], index: 19, kind: input, shape index: {}]   ;;  %s4690_s20 = inlined_call_operand.hbm [shape: f32[16,34], index: 20, kind: output, shape index: {}]  }
   0x1   :  { %4719 = sst [smem:[#allocation17_spill]] %s4670_s0 }
   0x2   :  { %4720 = sst [smem:[#allocation18_spill]] %s4671_s1 }
   0x3   :  { %4721 = sst [smem:[#allocation19_spill]] %s4672_s2 }
   0x4   :  { %4722 = sst [smem:[#allocation20_spill]] %s4673_s3 }
   0x5   :  { %4723 = sst [smem:[#allocation21_spill]] %s4674_s4 }
   0x6   :  { %26 = vsyncpa [#allocation4], 0 }
   0x7   :  { %27 = vsyncpa [#allocation7], 0 }
   0x8   :  { %28 = vsyncpa [#allocation10], 0 }
   0x9   :  { %29 = vsyncpa [#allocation5], 0  ;;  %s4724_s23 = sld [smem:[#allocation18_spill]]  ;;  %s3628_s2 = smov [#allocation6]  }
   0xa   :  { %s49_s25 = sshll.u32 %s3628_s2, 4  ;;  %s89_s27 = sshll.u32 %s4681_s11, 4  ;;  %s50_s25 = int_to_ptr.vmem [resolvable:$true] %s49_s25  ;;  %s90_s27 = int_to_ptr.hbm [resolvable:$true] %s89_s27 }
   0xb   :  { %s3629_s28 = smov 128   ;;  %s3630_s4 = smov 8  }
   0xc   :  { %s3631_s29 = smov [#allocation9]   ;;  %s4725_s1 = sld [smem:[#allocation17_spill]] }
   0xd   :  { %s91_s30 = sshll.u32 %s3631_s29, 4  ;;  %s76_s2 = sshll.u32 %s4680_s10, 4  ;;  %s92_s30 = int_to_ptr.vmem [resolvable:$true] %s91_s30  ;;  %s77_s2 = int_to_ptr.hbm [resolvable:$true] %s76_s2 }
   0xe   :  { %97 = dma.hbm_to_vmem [thread:$0]  %s90_s27, 512, %s92_s30, [#allocation10], %s3629_s28, %s3629_s28, %s3630_s4  }
   0xf   :  { %s47_s24 = sshll.u32 %s4724_s23, 4  ;;  %s3632_s3 = smov [#allocation3]   ;;  %s48_s24 = int_to_ptr.hbm [resolvable:$true] %s47_s24 }
  0x10   :  { %55 = dma.hbm_to_vmem [thread:$0]  %s48_s24, 256, %s50_s25, [#allocation7], %s3629_s28, %s3629_s28, %s3630_s4  }
  0x11   :  { %s36_s26 = sshll.u32 %s3632_s3, 4  ;;  %s3633_s24 = smov [#allocation8]   ;;  %s37_s26 = int_to_ptr.vmem [resolvable:$true] %s36_s26 }
  0x12   :  { %s34_s22 = sshll.u32 %s4725_s1, 4  ;;  %s78_s25 = sshll.u32 %s3633_s24, 4  ;;  %s35_s22 = int_to_ptr.hbm [resolvable:$true] %s34_s22  ;;  %s79_s25 = int_to_ptr.vmem [resolvable:$true] %s78_s25 }
  0x13   :  { %42 = dma.hbm_to_vmem [thread:$0]  %s35_s22, 256, %s37_s26, [#allocation4], %s3629_s28, %s3629_s28, %s3630_s4  }
  0x14   :  { %s106_s21 = sshll.u32 %s4684_s14, 4  ;;  %s3634_s10 = smov [#allocation11]   ;;  %s107_s21 = int_to_ptr.hbm [resolvable:$true] %s106_s21 }
  0x15   :  { %84 = dma.hbm_to_vmem [thread:$0]  %s77_s2, 512, %s79_s25, [#allocation7], %s3629_s28, %s3629_s28, %s3630_s4  }
  0x16   :  { %s108_s27 = sshll.u32 %s3634_s10, 4  ;;  %s109_s27 = int_to_ptr.vmem [resolvable:$true] %s108_s27 }
  0x17   :  { %114 = dma.hbm_to_vmem [thread:$0]  %s107_s21, 512, %s109_s27, [#allocation10], %s3629_s28, %s3629_s28, %s3630_s4  }
  0x18   :  { %3620 = dma.done.wait [#allocation4], 256  }
  0x19   :  { %3621 = vsyncadd [#allocation4], 4294967040 }
  0x1a   :  { %3622 = dma.done.wait [#allocation7], 768  }
  0x1b   :  { %3623 = vsyncadd [#allocation7], 4294966528 }
  0x1c   :  { %3624 = dma.done.wait [#allocation10], 1024  }
  0x1d   :  { %3625 = vsyncadd [#allocation10], 4294966272  ;;  %s4726_s1 = sld [smem:[#allocation21_spill]]  ;;  %vm155_vm0 = vcmask 261120   ;;  %v145_v4 = vld [vmem:[#allocation3] sm:$0xff]  ;;  %v146_v5 = vld [vmem:[#allocation3 + $0x8] sm:$0xff] }
  0x1e   :  { %v147_v6 = vld [vmem:[#allocation6] sm:$0xff]  ;;  %s4727_s29 = sld [smem:[#allocation19_spill]]  ;;  %v148_v12 = vld [vmem:[#allocation6 + $0x8] sm:$0xff]  ;;  %v3635_v17 = vmov 32.0   ;;  %v3837_v40 = vld [vmem:[%s4678_s8 + $0x8] sm:$0xff]  ;;  %vm437_vm8 = vcmask 64512  }
  0x1f   :  { %3358 = vrcp.f32 %v3635_v17  ;;  %v3816_v34 = vld [vmem:[%s4678_s8 + $0x18] sm:$0xff]  ;;  %v3825_v37 = vld [vmem:[%s4678_s8 + $0x10] sm:$0xff]  ;;  %v3842_v41 = vld [vmem:[%s4679_s9 + $0x8] sm:$0xff]  ;;  %s3637_s30 = smov 112   ;;  %s4754_s14 = sld [smem:[#allocation20_spill]] }
  0x20   :  { %v354_v35 = vld [vmem:[%s4679_s9 + $0x18] sm:$0xff]  ;;  %378 = vmatpush.msra.mxu1 %v3816_v34  ;;  %v3830_v38 = vld [vmem:[%s4679_s9 + $0x10] sm:$0xff]  ;;  %v356_v42 = vld [vmem:[#allocation8 + $0x8] sm:$0xff] }
  0x21   :  { %v358_v36 = vld [vmem:[#allocation8 + $0x18] sm:$0xff]  ;;  %403 = vmatpush.msra.mxu2 %v354_v35  ;;  %v357_v39 = vld [vmem:[#allocation8 + $0x10] sm:$0xff]  ;;  %v3849_v43 = vld [vmem:[%s4678_s8] sm:$0xff]  ;;  %v3860_v48 = vpack.i.bf16 %v3816_v34, %v354_v35  ;;  %s3636_s8 = smov 120  }
  0x22   :  { %426 = vmatpush.msra.mxu3 %v358_v36  ;;  %379 = vmatpush.msra.mxu1 %v3825_v37  ;;  %v3854_v44 = vld [vmem:[%s4679_s9] sm:$0xff]  ;;  %v3871_v57 = vpack.i.bf16 %v357_v39, %v358_v36 }
  0x23   :  { %v153_v0 = vld [vmem:[%s4726_s1 + $0x18] sm:$0xff]  ;;  %v152_v1 = vld [vmem:[%s4726_s1 + $0x10] sm:$0xff]  ;;  %v151_v2 = vld [vmem:[%s4726_s1 + $0x8] sm:$0xff]  ;;  %404 = vmatpush.msra.mxu2 %v3830_v38  ;;  %v3866_v50 = vpack.i.bf16 %v3849_v43, %v3854_v44 }
  0x24   :  { %174 = vmatpush.msra.mxu0 %v153_v0  ;;  %v150_v3 = vld [vmem:[%s4726_s1] sm:$0xff]  ;;  %427 = vmatpush.msra.mxu3 %v357_v39  ;;  %s3638_s1 = smov 104  }
  0x25   :  { %v3347_v7 = vld [vmem:[%s4727_s29] ss:$0 sm:$0xff]  ;;  %v3359_v18 = vpop.eup %3358  ;;  %380 = vmatpush.msra.mxu1 %v3837_v40  ;;  %405 = vmatpush.msra.mxu2 %v3842_v41 }
  0x26   :  { %175 = vmatpush.msra.mxu0 %v152_v1  ;;  %v293_v19 = vmul.f32 32.0, %v3359_v18  ;;  %vm297_vm1 = vweird.f32 %v3359_v18  ;;  %428 = vmatpush.msra.mxu3 %v356_v42  ;;  %v355_v45 = vld [vmem:[#allocation8] sm:$0xff] }
  0x27   :  { %381 = vmatpush.msra.mxu1 %v3849_v43  ;;  %406 = vmatpush.msra.mxu2 %v3854_v44  ;;  %v3348_v59 = vld [vmem:[%s4676_s6] ss:$0 sm:$0xff] }
  0x28   :  { %176 = vmatpush.msra.mxu0 %v151_v2  ;;  %v294_v20 = vsub.f32 1.0, %v293_v19  ;;  %429 = vmatpush.msra.mxu3 %v355_v45  ;;  %v3349_v1 = vld [vmem:[%s4677_s7] ss:$0 sm:$0xff] }
  0x2a   :  { %177 = vmatpush.msra.mxu0 %v150_v3  ;;  %v295_v21 = vmul.f32 %v3359_v18, %v294_v20 }
  0x2b   :  { %3108 = vmatmul.msk.f32.vlgmr.msra.gmra.mxu0 %vm155_vm0, %v145_v4 }
  0x2c   :  { %v296_v22 = vadd.f32 %v3359_v18, %v295_v21 }
  0x2e   :  { %v3801_v23 = vsel %vm297_vm1, %v3359_v18, %v296_v22 }
  0x33   :  { %3109 = vmatmul.msk.f32.gmra.mxu0 %vm155_vm0, %v146_v5 }
  0xa8   :  { %v179_v8 = vpop.f32.mrf.mxu0 }
  0xa9   :  { %v180_v9 = vadd.f32 %v179_v8, %v147_v6  ;;  %v3881_v6 = vpack.i.bf16 %v355_v45, %v356_v42  ;;  %v3939_v42 = vpack.i.bf16 %v3825_v37, %v3830_v38 }
  0xab   :  { %v3793_v10 = vadd.f32 %v3347_v7, %v180_v9 }
  0xad   :  { %v286_v11 = vsel %vm155_vm0, %v3793_v10, 0.0 }
  0xae   :  { %287 = vadd.xlane.f32.xlu0 %v286_v11 }
  0xb0   :  { %v182_v13 = vpop.f32.mrf.mxu0 }
  0xb1   :  { %v183_v14 = vadd.f32 %v182_v13, %v148_v12 }
  0xb3   :  { %v3797_v15 = vadd.f32 %v3347_v7, %v183_v14 }
  0xb5   :  { %v289_v16 = vsel %vm155_vm0, %v3797_v15, 0.0 }
  0xb6   :  { %290 = vadd.xlane.f32.xlu1 %v289_v16 }
 0x121   :  { %v288_v24 = vpop.xlane.xlu0 %287 }
 0x122   :  { %v299_v25 = vmul.f32 %v3801_v23, %v288_v24 }
 0x124   :  { %v301_v26 = vsub.f32 %v3793_v10, %v299_v25 }
 0x126   :  { %v303_v27 = vmul.f32 %v301_v26, %v301_v26  ;;  %v316_v0 = vmul.f32 %v3348_v59, %v301_v26 }
 0x128   :  { %v305_v28 = vsel %vm155_vm0, %v303_v27, 0.0 }
 0x129   :  { %v291_v29 = vpop.xlane.xlu1 %290  ;;  %306 = vadd.xlane.f32.xlu0 %v305_v28 }
 0x12a   :  { %v300_v30 = vmul.f32 %v3801_v23, %v291_v29 }
 0x12c   :  { %v3808_v31 = vsub.f32 %v3797_v15, %v300_v30 }
 0x12e   :  { %v304_v32 = vmul.f32 %v3808_v31, %v3808_v31  ;;  %v317_v11 = vmul.f32 %v3348_v59, %v3808_v31 }
 0x130   :  { %v308_v33 = vsel %vm155_vm0, %v304_v32, 0.0 }
 0x131   :  { %309 = vadd.xlane.f32.xlu1 %v308_v33 }
 0x13d   :  { %3258 = vrot.lane.b32.xlu0 %v3860_v48, %s3636_s8 }
 0x145   :  { %3273 = vrot.lane.b32.xlu0 %v3866_v50, %s3636_s8 }
 0x14a   :  { %3263 = vrot.lane.b32.xlu1 %v3939_v42, %s3636_s8 }
 0x14d   :  { %3278 = vrot.lane.b32.xlu0 %v3871_v57, %s3636_s8 }
 0x155   :  { %3283 = vrot.lane.b32.xlu0 %v3881_v6, %s3636_s8 }
 0x19c   :  { %v307_v46 = vpop.xlane.xlu0 %306 }
 0x19d   :  { %v311_v47 = vmul.f32 %v307_v46, %v3801_v23 }
 0x19f   :  { %v318_v49 = vadd.f32 1e-06, %v311_v47 }
 0x1a1   :  { %3360 = vrsqrt.f32 %v318_v49  ;;  %vm326_vm3 = vweird.f32 %v318_v49 }
 0x1a4   :  { %v310_v51 = vpop.xlane.xlu1 %309 }
 0x1a5   :  { %v312_v52 = vmul.f32 %v310_v51, %v3801_v23 }
 0x1a7   :  { %v3361_v53 = vpop.eup %3360  ;;  %v319_v54 = vadd.f32 1e-06, %v312_v52  ;;  %v3946_v52 = vpack.i.bf16 %v3837_v40, %v3842_v41 }
 0x1a8   :  { %v321_v55 = vmul.f32 %v3361_v53, %v318_v49  ;;  %vm327_vm2 = vweird.f32 %v3361_v53 }
 0x1a9   :  { %3362 = vrsqrt.f32 %v319_v54  ;;  %vm328_vm4 = vmor %vm326_vm3, %vm327_vm2  ;;  %vm336_vm5 = vweird.f32 %v319_v54 }
 0x1aa   :  { %v322_v56 = vmul.f32 %v3361_v53, %v321_v55 }
 0x1ac   :  { %v323_v58 = vmul.f32 0.5, %v322_v56 }
 0x1ae   :  { %v324_v60 = vsub.f32 1.5, %v323_v58 }
 0x1af   :  { %v3363_v61 = vpop.eup %3362  ;;  %v3902_v16 = vpop.permute.xlu0 %3258 }
 0x1b0   :  { %v325_v62 = vmul.f32 %v3361_v53, %v324_v60  ;;  %v331_v63 = vmul.f32 %v3363_v61, %v319_v54  ;;  %vm337_vm6 = vweird.f32 %v3363_v61  ;;  %v3261_v19 = vunpack.i.h.bf16 %v3902_v16 }
 0x1b1   :  { %vm338_vm7 = vmor %vm336_vm5, %vm337_vm6  ;;  %v3260_v21 = vunpack.i.l.bf16 %v3902_v16 }
 0x1b2   :  { %v329_v2 = vsel %vm328_vm4, %v3361_v53, %v325_v62  ;;  %v332_v3 = vmul.f32 %v3363_v61, %v331_v63 }
 0x1b3   :  { %v340_v4 = vmul.f32 %v329_v2, %v316_v0 }
 0x1b4   :  { %v333_v5 = vmul.f32 0.5, %v332_v3 }
 0x1b5   :  { %v3883_v7 = vadd.f32 %v3349_v1, %v340_v4 }
 0x1b6   :  { %v334_v8 = vsub.f32 1.5, %v333_v5 }
 0x1b7   :  { %3116 = vmatmul.msk.f32.vlgmr.msra.gmra.mxu1 %vm155_vm0, %v3883_v7  ;;  %3118 = vmatmul.msk.f32.vlgmr.msra.gmra.mxu2 %vm155_vm0, %v3883_v7  ;;  %v3904_v17 = vpop.permute.xlu0 %3273 }
 0x1b8   :  { %v335_v9 = vmul.f32 %v3363_v61, %v334_v8  ;;  %3120 = vmatmul.msk.f32.vlgmr.msra.gmra.mxu3 %vm155_vm0, %v3883_v7  ;;  %v3276_v63 = vunpack.i.h.bf16 %v3904_v17  ;;  %v3275_v0 = vunpack.i.l.bf16 %v3904_v17 }
 0x1ba   :  { %v339_v12 = vsel %vm338_vm7, %v3363_v61, %v335_v9 }
 0x1bb   :  { %v341_v13 = vmul.f32 %v339_v12, %v317_v11 }
 0x1bc   :  { %v3951_v55 = vpop.permute.xlu1 %3263 }
 0x1bd   :  { %v3894_v14 = vadd.f32 %v3349_v1, %v341_v13  ;;  %v3266_v56 = vunpack.i.h.bf16 %v3951_v55  ;;  %v3265_v58 = vunpack.i.l.bf16 %v3951_v55 }
 0x1bf   :  { %3117 = vmatmul.msk.f32.gmra.mxu1 %vm155_vm0, %v3894_v14  ;;  %3119 = vmatmul.msk.f32.gmra.mxu2 %vm155_vm0, %v3894_v14  ;;  %v3907_v20 = vpop.permute.xlu0 %3278 }
 0x1c0   :  { %3121 = vmatmul.msk.f32.gmra.mxu3 %vm155_vm0, %v3894_v14  ;;  %v3280_v26 = vunpack.i.l.bf16 %v3907_v20  ;;  %v3281_v30 = vunpack.i.h.bf16 %v3907_v20 }
 0x1c7   :  { %v3917_v29 = vpop.permute.xlu0 %3283 }
 0x1c8   :  { %v4718_v33 = vunpack.i.l.bf16 %v3917_v29  ;;  %v4717_v35 = vunpack.i.h.bf16 %v3917_v29  ;;  %v4728_v16 = vunpack.i.l.bf16 %v3917_v29 }
 0x234   :  { %v383_v18 = vpop.f32.mrf.mxu1 }
 0x235   :  { %v389_v25 = vmul.f32 0.35355338, %v383_v18 }
 0x23a   :  { %v408_v22 = vpop.f32.mrf.mxu2 }
 0x23b   :  { %v431_v24 = vpop.f32.mrf.mxu3  ;;  %3122 = vmatpush.xpose.msk.msrb.mxu0 %vm437_vm8, %v408_v22 }
 0x23c   :  { %506 = vmatpush.msrb.mxu1 %v431_v24  ;;  %v386_v27 = vpop.f32.mrf.mxu1 }
 0x23d   :  { %v390_v32 = vmul.f32 0.35355338, %v386_v27 }
 0x23e   :  { %654 = vmatpush.msra.mxu1 %v3260_v21  ;;  %3123 = vmatmul.msk.f32.vlgmr.msrb.gmra.mxu0 %vm437_vm8, %v389_v25 }
 0x23f   :  { %613 = vmatpush.msra.mxu0 %v3261_v19 }
 0x240   :  { %655 = vmatpush.msra.mxu1 %v3265_v58 }
 0x241   :  { %614 = vmatpush.msra.mxu0 %v3266_v56 }
 0x242   :  { %v411_v28 = vpop.f32.mrf.mxu2 }
 0x243   :  { %v434_v31 = vpop.f32.mrf.mxu3  ;;  %3125 = vmatpush.xpose.msk.msrb.mxu2 %vm437_vm8, %v411_v28 }
 0x244   :  { %579 = vmatpush.msrb.mxu3 %v434_v31  ;;  %v359_v31 = vld [vmem:[#allocation9] sm:$0xff] }
 0x246   :  { %3126 = vmatmul.msk.f32.vlgmr.msrb.gmra.mxu2 %vm437_vm8, %v390_v32 }
 0x247   :  { %693 = vmatpush.msra.mxu2 %v3280_v26 }
 0x249   :  { %694 = vmatpush.msra.mxu2 %v3281_v30 }
 0x24b   :  { %695 = vmatpush.msra.mxu2 %v4718_v33 }
 0x24d   :  { %696 = vmatpush.msra.mxu2 %v4717_v35 }
 0x24e   :  { %3132 = vmatmul.msk.f32.vlgmr.msra.gmra.mxu2 %vm155_vm0, %v3883_v7 }
 0x256   :  { %3133 = vmatmul.msk.f32.gmra.mxu2 %vm155_vm0, %v3894_v14 }
 0x2bb   :  { %v461_v36 = vpop.f32.mrf.mxu0 }
 0x2bc   :  { %v464_v39 = vsel %vm437_vm8, %v461_v36, -inf }
 0x2bd   :  { %465 = vmax.xlane.f32.xlu2 %v464_v39 }
 0x2c9   :  { %v534_v53 = vpop.f32.mrf.mxu2 }
 0x2ca   :  { %v537_v54 = vsel %vm437_vm8, %v534_v53, -inf }
 0x330   :  { %v466_v45 = vpop.xlane.xlu2 %465 }
 0x331   :  { %v467_v46 = vsub.f32 %v461_v36, %v466_v45 }
 0x333   :  { %v468_v47 = vmul.f32 1.442695, %v467_v46 }
 0x335   :  { %3364 = vpow2.f32 %v468_v47 }
 0x33b   :  { %v3365_v49 = vpop.eup %3364 }
 0x33c   :  { %v470_v51 = vsel %vm437_vm8, %v3365_v49, 0.0 }
 0x33d   :  { %471 = vadd.xlane.f32.xlu2 %v470_v51 }
 0x355   :  { %3268 = vrot.lane.b32.xlu2 %v3946_v52, %s3636_s8 }
 0x37e   :  { %538 = vmax.xlane.f32.xlu2 %v537_v54 }
 0x3b0   :  { %v472_v59 = vpop.xlane.xlu2 %471 }
 0x3b1   :  { %3366 = vrcp.f32 %v472_v59  ;;  %v484_v4 = vand.u32 2147483648, %v472_v59  ;;  %v482_v8 = vand.u32 2147483647, %v472_v59  ;;  %vm478_vm10 = vweird.f32 %v472_v59 }
 0x3b3   :  { %v485_v11 = vor.u32 1.1754944e-38, %v484_v4  ;;  %vm483_vm12 = vcmp.eq.f32.partialorder %v482_v8, 8.507059e+37 }
 0x3b7   :  { %v3367_v60 = vpop.eup %3366 }
 0x3b8   :  { %v474_v61 = vmul.f32 %v3367_v60, %v472_v59  ;;  %v3959_v62 = vpop.permute.xlu2 %3268  ;;  %vm479_vm9 = vweird.f32 %v3367_v60 }
 0x3b9   :  { %v3271_v1 = vunpack.i.h.bf16 %v3959_v62  ;;  %v3270_v2 = vunpack.i.l.bf16 %v3959_v62  ;;  %vm480_vm11 = vmor %vm478_vm10, %vm479_vm9 }
 0x3ba   :  { %v475_v3 = vsub.f32 1.0, %v474_v61 }
 0x3bb   :  { %615 = vmatpush.msra.mxu0 %v3271_v1  ;;  %656 = vmatpush.msra.mxu1 %v3270_v2 }
 0x3bc   :  { %v476_v5 = vmul.f32 %v3367_v60, %v475_v3 }
 0x3bd   :  { %616 = vmatpush.msra.mxu0 %v3276_v63  ;;  %657 = vmatpush.msra.mxu1 %v3275_v0 }
 0x3be   :  { %v477_v9 = vadd.f32 %v3367_v60, %v476_v5  ;;  %3128 = vmatmul.msk.f32.vlgmr.msra.gmra.mxu0 %vm155_vm0, %v3883_v7 }
 0x3c0   :  { %v481_v12 = vsel %vm480_vm11, %v3367_v60, %v477_v9  ;;  %v698_v9 = vpop.f32.mrf.mxu2 }
 0x3c1   :  { %v486_v13 = vsel %vm483_vm12, %v485_v11, %v481_v12 }
 0x3c2   :  { %v487_v18 = vmul.f32 %v3365_v49, %v486_v13 }
 0x3c4   :  { %3124 = vmatmul.msk.f32.vlgmr.msrb.gmra.mxu1 %vm437_vm8, %v487_v18 }
 0x3c5   :  { %818 = vmatpush.msrb.mxu1 %v359_v31 }
 0x3c6   :  { %3129 = vmatmul.msk.f32.gmra.mxu0 %vm155_vm0, %v3894_v14 }
 0x3c8   :  { %v701_v13 = vpop.f32.mrf.mxu2 }
 0x3cc   :  { %3130 = vmatmul.msk.f32.vlgmr.msra.gmra.mxu1 %vm155_vm0, %v3883_v7 }
 0x3cd   :  { %937 = vmatpush.msra.mxu1 %v359_v31 }
 0x3d4   :  { %3131 = vmatmul.msk.f32.gmra.mxu1 %vm155_vm0, %v3894_v14 }
 0x3f1   :  { %v539_v22 = vpop.xlane.xlu2 %538 }
 0x3f2   :  { %v540_v24 = vsub.f32 %v534_v53, %v539_v22 }
 0x3f4   :  { %v541_v25 = vmul.f32 1.442695, %v540_v24 }
 0x3f6   :  { %3368 = vpow2.f32 %v541_v25 }
 0x3fc   :  { %v3369_v27 = vpop.eup %3368 }
 0x3fd   :  { %v543_v28 = vsel %vm437_vm8, %v3369_v27, 0.0 }
 0x3fe   :  { %544 = vadd.xlane.f32.xlu1 %v543_v28 }
 0x417   :  { %3288 = vrot.lane.b32.xlu1 %v3860_v48, %s3637_s30 }
 0x43b   :  { %v618_v36 = vpop.f32.mrf.mxu0 }
 0x43c   :  { %v624_v12 = vmul.f32 0.35355338, %v618_v36 }
 0x441   :  { %v508_v32 = vpop.f32.mrf.mxu1 }
 0x442   :  { %3138 = vmatmul.msk.f32.vlgmr.msrb.gmra.mxu1 %vm437_vm8, %v508_v32 }
 0x443   :  { %v621_v45 = vpop.f32.mrf.mxu0 }
 0x444   :  { %v625_v47 = vmul.f32 0.35355338, %v621_v45 }
 0x449   :  { %v659_v39 = vpop.f32.mrf.mxu1 }
 0x44a   :  { %3134 = vmatpush.xpose.msk.msra.mxu3 %vm437_vm8, %v659_v39 }
 0x451   :  { %v662_v46 = vpop.f32.mrf.mxu1 }
 0x452   :  { %3139 = vmatpush.xpose.msk.msrb.mxu2 %vm437_vm8, %v662_v46 }
 0x455   :  { %3140 = vmatmul.msk.f32.vlgmr.msrb.gmra.mxu2 %vm437_vm8, %v625_v47 }
 0x471   :  { %v545_v49 = vpop.xlane.xlu1 %544 }
 0x472   :  { %3370 = vrcp.f32 %v545_v49  ;;  %v557_v59 = vand.u32 2147483648, %v545_v49  ;;  %v555_v61 = vand.u32 2147483647, %v545_v49  ;;  %vm551_vm14 = vweird.f32 %v545_v49 }
 0x474   :  { %v558_v4 = vor.u32 1.1754944e-38, %v557_v59  ;;  %vm556_vm1 = vcmp.eq.f32.partialorder %v555_v61, 8.507059e+37 }
 0x478   :  { %v3371_v51 = vpop.eup %3370 }
 0x479   :  { %v547_v53 = vmul.f32 %v3371_v51, %v545_v49  ;;  %vm552_vm13 = vweird.f32 %v3371_v51 }
 0x47a   :  { %vm553_vm15 = vmor %vm551_vm14, %vm552_vm13 }
 0x47b   :  { %v548_v54 = vsub.f32 1.0, %v547_v53 }
 0x47d   :  { %v549_v60 = vmul.f32 %v3371_v51, %v548_v54 }
 0x47f   :  { %v550_v3 = vadd.f32 %v3371_v51, %v549_v60 }
 0x481   :  { %v554_v5 = vsel %vm553_vm15, %v3371_v51, %v550_v3 }
 0x482   :  { %v559_v8 = vsel %vm556_vm1, %v558_v4, %v554_v5 }
 0x483   :  { %v560_v11 = vmul.f32 %v3369_v27, %v559_v8 }
 0x485   :  { %3127 = vmatmul.msk.f32.vlgmr.msrb.gmra.mxu3 %vm437_vm8, %v560_v11 }
 0x486   :  { %772 = vmatpush.msrb.mxu3 %v698_v9 }
 0x489   :  { %v4005_v53 = vpop.permute.xlu1 %3288 }
 0x48a   :  { %v4716_v54 = vunpack.i.h.bf16 %v4005_v53  ;;  %v4730_v17 = vunpack.i.h.bf16 %v4005_v53 }
 0x48c   :  { %967 = vmatpush.msra.mxu2 %v4716_v54 }
 0x48d   :  { %3135 = vmatmul.msk.f32.vlgmr.msra.gmra.mxu3 %vm437_vm8, %v624_v12 }
 0x48e   :  { %891 = vmatpush.msra.mxu3 %v701_v13 }
 0x4d8   :  { %v846_v18 = vpop.f32.mrf.mxu2 }
 0x4d9   :  { %v849_v22 = vsel %vm437_vm8, %v846_v18, -inf }
 0x4da   :  { %850 = vmax.xlane.f32.xlu2 %v849_v22 }
 0x508   :  { %v581_v24 = vpop.f32.mrf.mxu3 }
 0x509   :  { %3143 = vmatmul.msk.f32.vlgmr.msra.gmra.mxu1 %vm437_vm8, %v581_v24 }
 0x510   :  { %v727_v25 = vpop.f32.mrf.mxu3 }
 0x511   :  { %v730_v28 = vsel %vm437_vm8, %v727_v25, -inf }
 0x512   :  { %731 = vmax.xlane.f32.xlu0 %v730_v28 }
 0x526   :  { %3298 = vrot.lane.b32.xlu0 %v3946_v52, %s3637_s30 }
 0x52e   :  { %3313 = vrot.lane.b32.xlu0 %v3881_v6, %s3637_s30 }
 0x54d   :  { %v851_v27 = vpop.xlane.xlu2 %850 }
 0x54e   :  { %v852_v31 = vsub.f32 %v846_v18, %v851_v27 }
 0x550   :  { %v853_v32 = vmul.f32 1.442695, %v852_v31 }
 0x552   :  { %3372 = vpow2.f32 %v853_v32 }
 0x558   :  { %v3994_v36 = vpop.eup %3372 }
 0x559   :  { %v855_v39 = vsel %vm437_vm8, %v3994_v36, 0.0 }
 0x55a   :  { %856 = vadd.xlane.f32.xlu2 %v855_v39 }
 0x572   :  { %3293 = vrot.lane.b32.xlu2 %v3939_v42, %s3637_s30 }
 0x57a   :  { %3308 = vrot.lane.b32.xlu2 %v3871_v57, %s3637_s30 }
 0x585   :  { %v732_v45 = vpop.xlane.xlu0 %731 }
 0x586   :  { %v733_v46 = vsub.f32 %v727_v25, %v732_v45 }
 0x588   :  { %v734_v47 = vmul.f32 1.442695, %v733_v46 }
 0x58a   :  { %3374 = vpow2.f32 %v734_v47 }
 0x590   :  { %v3375_v49 = vpop.eup %3374 }
 0x591   :  { %v736_v51 = vsel %vm437_vm8, %v3375_v49, 0.0 }
 0x592   :  { %737 = vadd.xlane.f32.xlu1 %v736_v51 }
 0x598   :  { %v4012_v61 = vpop.permute.xlu0 %3298 }
 0x599   :  { %v4714_v4 = vunpack.i.h.bf16 %v4012_v61 }
 0x5ab   :  { %3303 = vrot.lane.b32.xlu1 %v3866_v50, %s3637_s30 }
 0x5cd   :  { %v857_v59 = vpop.xlane.xlu2 %856 }
 0x5ce   :  { %3376 = vrcp.f32 %v857_v59  ;;  %v869_v45 = vand.u32 2147483648, %v857_v59  ;;  %vm863_vm7 = vweird.f32 %v857_v59  ;;  %v867_v47 = vand.u32 2147483647, %v857_v59 }
 0x5d0   :  { %vm868_vm10 = vcmp.eq.f32.partialorder %v867_v47, 8.507059e+37 }
 0x5d4   :  { %v3377_v5 = vpop.eup %3376 }
 0x5d5   :  { %v4010_v60 = vpop.permute.xlu2 %3293  ;;  %v859_v9 = vmul.f32 %v3377_v5, %v857_v59  ;;  %vm864_vm5 = vweird.f32 %v3377_v5 }
 0x5d6   :  { %v4715_v3 = vunpack.i.h.bf16 %v4010_v60  ;;  %vm865_vm9 = vmor %vm863_vm7, %vm864_vm5 }
 0x5d7   :  { %v860_v12 = vsub.f32 1.0, %v859_v9  ;;  %v4699_v9 = vunpack.i.l.bf16 %v4010_v60 }
 0x5d8   :  { %968 = vmatpush.msra.mxu2 %v4715_v3 }
 0x5d9   :  { %v861_v22 = vmul.f32 %v3377_v5, %v860_v12 }
 0x5da   :  { %969 = vmatpush.msra.mxu2 %v4714_v4 }
 0x5db   :  { %v862_v32 = vadd.f32 %v3377_v5, %v861_v22 }
 0x5dd   :  { %v866_v12 = vsel %vm865_vm9, %v3377_v5, %v862_v32 }
 0x605   :  { %v738_v8 = vpop.xlane.xlu1 %737 }
 0x606   :  { %3378 = vrcp.f32 %v738_v8  ;;  %v748_v24 = vand.u32 2147483647, %v738_v8  ;;  %v750_v25 = vand.u32 2147483648, %v738_v8  ;;  %vm744_vm3 = vweird.f32 %v738_v8 }
 0x608   :  { %v751_v31 = vor.u32 1.1754944e-38, %v750_v25  ;;  %vm749_vm6 = vcmp.eq.f32.partialorder %v748_v24, 8.507059e+37  ;;  %v4056_v24 = vpop.permute.xlu2 %3308 }
 0x609   :  { %v4696_v25 = vunpack.i.l.bf16 %v4056_v24 }
 0x60c   :  { %v3379_v11 = vpop.eup %3378 }
 0x60d   :  { %v740_v13 = vmul.f32 %v3379_v11, %v738_v8  ;;  %vm745_vm2 = vweird.f32 %v3379_v11  ;;  %v4708_v8 = vunpack.i.l.bf16 %v4005_v53 }
 0x60e   :  { %vm746_vm4 = vmor %vm744_vm3, %vm745_vm2 }
 0x60f   :  { %v741_v18 = vsub.f32 1.0, %v740_v13  ;;  %v870_v13 = vor.u32 1.1754944e-38, %v869_v45 }
 0x611   :  { %v742_v28 = vmul.f32 %v3379_v11, %v741_v18  ;;  %v871_v18 = vsel %vm868_vm10, %v870_v13, %v866_v12 }
 0x612   :  { %v872_v5 = vmul.f32 %v3994_v36, %v871_v18  ;;  %v4052_v36 = vld [vmem:[#allocation9 + $0x8] sm:$0xff] }
 0x613   :  { %v743_v27 = vadd.f32 %v3379_v11, %v742_v28  ;;  %795 = vmatpush.msrb.mxu0 %v4052_v36  ;;  %v4059_v28 = vpop.permute.xlu0 %3313 }
 0x614   :  { %v4694_v32 = vunpack.i.l.bf16 %v4059_v28 }
 0x615   :  { %v747_v39 = vsel %vm746_vm4, %v3379_v11, %v743_v27  ;;  %v4698_v11 = vunpack.i.l.bf16 %v4012_v61  ;;  %914 = vmatpush.msra.mxu0 %v4052_v36 }
 0x616   :  { %v752_v46 = vsel %vm749_vm6, %v751_v31, %v747_v39  ;;  %v4695_v31 = vunpack.i.h.bf16 %v4056_v24  ;;  %v4693_v39 = vunpack.i.h.bf16 %v4059_v28 }
 0x617   :  { %v753_v51 = vmul.f32 %v3375_v49, %v752_v46 }
 0x619   :  { %3136 = vmatmul.msk.f32.vlgmr.msrb.gmra.mxu3 %vm437_vm8, %v753_v51 }
 0x61a   :  { %1004 = vmatpush.msrb.mxu3 %v4708_v8  ;;  %v4184_v8 = vld [vmem:[#allocation9 + $0x18] sm:$0xff] }
 0x61c   :  { %1005 = vmatpush.msrb.mxu3 %v4699_v9 }
 0x61d   :  { %v4032_v49 = vpop.permute.xlu1 %3303 }
 0x61e   :  { %v4713_v59 = vunpack.i.h.bf16 %v4032_v49  ;;  %v4697_v22 = vunpack.i.l.bf16 %v4032_v49  ;;  %1006 = vmatpush.msrb.mxu3 %v4698_v11  ;;  %v4733_v55 = vunpack.i.h.bf16 %v4032_v49 }
 0x620   :  { %970 = vmatpush.msra.mxu2 %v4713_v59  ;;  %1007 = vmatpush.msrb.mxu3 %v4697_v22 }
 0x621   :  { %3141 = vmatmul.msk.f32.vlgmr.msra.gmra.mxu3 %vm437_vm8, %v872_v5  ;;  %3144 = vmatmul.msk.f32.vlgmr.msra.gmra.mxu2 %vm155_vm0, %v3883_v7  ;;  %v4082_v5 = vpop.f32.mrf.mxu1 }
 0x629   :  { %3145 = vmatmul.msk.f32.gmra.mxu2 %vm155_vm0, %v3894_v14  ;;  %3146 = vmatmul.msk.f32.vlgmr.msrb.gmra.mxu3 %vm155_vm0, %v3883_v7 }
 0x631   :  { %3147 = vmatmul.msk.f32.gmra.mxu3 %vm155_vm0, %v3894_v14 }
 0x69c   :  { %v774_v27 = vpop.f32.mrf.mxu3 }
 0x69d   :  { %3137 = vmatmul.msk.f32.vlgmr.msrb.gmra.mxu0 %vm437_vm8, %v774_v27 }
 0x69e   :  { %1039 = vmatpush.msrb.mxu0 %v4696_v25 }
 0x6a0   :  { %1040 = vmatpush.msrb.mxu0 %v4695_v31 }
 0x6a2   :  { %1041 = vmatpush.msrb.mxu0 %v4694_v32 }
 0x6a4   :  { %v893_v45 = vpop.f32.mrf.mxu3  ;;  %1042 = vmatpush.msrb.mxu0 %v4693_v39  ;;  %v972_v46 = vpop.f32.mrf.mxu2 }
 0x6a5   :  { %3142 = vmatmul.msk.f32.vlgmr.msra.gmra.mxu0 %vm437_vm8, %v893_v45  ;;  %v978_v51 = vmul.f32 0.35355338, %v972_v46  ;;  %v939_v45 = vpop.f32.mrf.mxu1 }
 0x6ac   :  { %v1009_v47 = vpop.f32.mrf.mxu3  ;;  %v975_v12 = vpop.f32.mrf.mxu2 }
 0x6ad   :  { %3148 = vmatmul.msk.f32.vlgmr.msrb.gmra.mxu0 %vm155_vm0, %v3883_v7  ;;  %3150 = vmatpush.xpose.msk.msrb.mxu1 %vm437_vm8, %v1009_v47  ;;  %v979_v18 = vmul.f32 0.35355338, %v975_v12 }
 0x6b0   :  { %3151 = vmatmul.msk.f32.vlgmr.msrb.gmra.mxu1 %vm437_vm8, %v978_v51 }
 0x6b4   :  { %v1012_v13 = vpop.f32.mrf.mxu3 }
 0x6b5   :  { %3149 = vmatmul.msk.f32.gmra.mxu0 %vm155_vm0, %v3894_v14  ;;  %3154 = vmatpush.xpose.msk.msra.mxu3 %vm437_vm8, %v1012_v13 }
 0x6b8   :  { %3155 = vmatmul.msk.f32.vlgmr.msra.gmra.mxu3 %vm437_vm8, %v979_v18 }
 0x71a   :  { %v4084_v27 = vpop.f32.mrf.mxu0 }
 0x722   :  { %v916_v39 = vpop.f32.mrf.mxu0 }
 0x723   :  { %v4086_v47 = vadd.f32 %v939_v45, %v916_v39 }
 0x72a   :  { %v1044_v46 = vpop.f32.mrf.mxu0 }
 0x72b   :  { %1118 = vmatpush.msra.mxu1 %v1044_v46 }
 0x72d   :  { %v1073_v51 = vpop.f32.mrf.mxu1 }
 0x72e   :  { %v1076_v32 = vsel %vm437_vm8, %v1073_v51, -inf }
 0x72f   :  { %1077 = vmax.xlane.f32.xlu1 %v1076_v32 }
 0x732   :  { %v1047_v31 = vpop.f32.mrf.mxu0 }
 0x733   :  { %1215 = vmatpush.msra.mxu0 %v1047_v31 }
 0x73b   :  { %v1170_v13 = vpop.f32.mrf.mxu3 }
 0x73c   :  { %v1173_v12 = vsel %vm437_vm8, %v1170_v13, -inf }
 0x73d   :  { %1174 = vmax.xlane.f32.xlu0 %v1173_v12 }
 0x751   :  { %3323 = vrot.lane.b32.xlu0 %v3939_v42, %s3638_s1 }
 0x759   :  { %3333 = vrot.lane.b32.xlu0 %v3866_v50, %s3638_s1 }
 0x7a2   :  { %v1078_v18 = vpop.xlane.xlu1 %1077 }
 0x7a3   :  { %v1079_v25 = vsub.f32 %v1073_v51, %v1078_v18 }
 0x7a5   :  { %v1080_v22 = vmul.f32 1.442695, %v1079_v25 }
 0x7a7   :  { %3380 = vpow2.f32 %v1080_v22 }
 0x7ad   :  { %v3381_v39 = vpop.eup %3380 }
 0x7ae   :  { %v1082_v45 = vsel %vm437_vm8, %v3381_v39, 0.0 }
 0x7af   :  { %1083 = vadd.xlane.f32.xlu2 %v1082_v45 }
 0x7b0   :  { %v1175_v46 = vpop.xlane.xlu0 %1174 }
 0x7b1   :  { %v1176_v11 = vsub.f32 %v1170_v13, %v1175_v46 }
 0x7b3   :  { %v1177_v32 = vmul.f32 1.442695, %v1176_v11 }
 0x7b5   :  { %3382 = vpow2.f32 %v1177_v32 }
 0x7bb   :  { %v3383_v31 = vpop.eup %3382 }
 0x7bc   :  { %v1179_v12 = vsel %vm437_vm8, %v3383_v31, 0.0 }
 0x7bd   :  { %1180 = vadd.xlane.f32.xlu1 %v1179_v12 }
 0x7c3   :  { %v4098_v11 = vpop.permute.xlu0 %3323 }
 0x7c4   :  { %v4707_v50 = vunpack.i.l.bf16 %v4098_v11 }
 0x7c7   :  { %3318 = vrot.lane.b32.xlu2 %v3860_v48, %s3638_s1 }
 0x7cf   :  { %3338 = vrot.lane.b32.xlu2 %v3871_v57, %s3638_s1 }
 0x7d6   :  { %3328 = vrot.lane.b32.xlu1 %v3946_v52, %s3638_s1 }
 0x7de   :  { %3343 = vrot.lane.b32.xlu1 %v3881_v6, %s3638_s1 }
 0x822   :  { %v1084_v42 = vpop.xlane.xlu2 %1083 }
 0x823   :  { %3384 = vrcp.f32 %v1084_v42  ;;  %v1096_v48 = vand.u32 2147483648, %v1084_v42  ;;  %v1094_v6 = vand.u32 2147483647, %v1084_v42  ;;  %vm1090_vm12 = vweird.f32 %v1084_v42 }
 0x825   :  { %v1097_v46 = vor.u32 1.1754944e-38, %v1096_v48  ;;  %vm1095_vm14 = vcmp.eq.f32.partialorder %v1094_v6, 8.507059e+37 }
 0x829   :  { %v3385_v22 = vpop.eup %3384 }
 0x82a   :  { %v1086_v25 = vmul.f32 %v3385_v22, %v1084_v42  ;;  %v4100_v51 = vpop.permute.xlu2 %3318  ;;  %vm1091_vm11 = vweird.f32 %v3385_v22 }
 0x82b   :  { %v4700_v13 = vunpack.i.l.bf16 %v4100_v51  ;;  %vm1092_vm13 = vmor %vm1090_vm12, %vm1091_vm11 }
 0x82c   :  { %v1087_v18 = vsub.f32 1.0, %v1086_v25 }
 0x82d   :  { %1306 = vmatpush.msrb.mxu3 %v4700_v13 }
 0x82e   :  { %v1088_v57 = vmul.f32 %v3385_v22, %v1087_v18 }
 0x82f   :  { %1307 = vmatpush.msrb.mxu3 %v4707_v50 }
 0x830   :  { %v1089_v52 = vadd.f32 %v3385_v22, %v1088_v57  ;;  %v1181_v45 = vpop.xlane.xlu1 %1180 }
 0x831   :  { %3386 = vrcp.f32 %v1181_v45  ;;  %v1193_v48 = vand.u32 2147483648, %v1181_v45  ;;  %vm1187_vm1 = vweird.f32 %v1181_v45 }
 0x832   :  { %v1093_v32 = vsel %vm1092_vm13, %v3385_v22, %v1089_v52  ;;  %v4108_v12 = vpop.permute.xlu2 %3338  ;;  %v1191_v52 = vand.u32 2147483647, %v1181_v45 }
 0x833   :  { %v1098_v25 = vsel %vm1095_vm14, %v1097_v46, %v1093_v32  ;;  %v4701_v13 = vunpack.i.h.bf16 %v4108_v12  ;;  %v4702_v18 = vunpack.i.l.bf16 %v4108_v12  ;;  %v4711_v32 = vunpack.i.h.bf16 %v4098_v11 }
 0x834   :  { %v1099_v9 = vmul.f32 %v3381_v39, %v1098_v25  ;;  %v4712_v39 = vunpack.i.h.bf16 %v4100_v51  ;;  %v1194_v25 = vor.u32 1.1754944e-38, %v1193_v48  ;;  %vm1192_vm3 = vcmp.eq.f32.partialorder %v1191_v52, 8.507059e+37 }
 0x835   :  { %1341 = vmatpush.msrb.mxu0 %v4702_v18 }
 0x836   :  { %3152 = vmatmul.msk.f32.vlgmr.msra.gmra.mxu1 %vm437_vm8, %v1099_v9  ;;  %v4119_v9 = vld [vmem:[#allocation9 + $0x10] sm:$0xff] }
 0x837   :  { %v3387_v42 = vpop.eup %3386  ;;  %1342 = vmatpush.msrb.mxu0 %v4701_v13  ;;  %1141 = vmatpush.msrb.mxu2 %v4119_v9 }
 0x838   :  { %v1183_v57 = vmul.f32 %v3387_v42, %v1181_v45  ;;  %vm1188_vm15 = vweird.f32 %v3387_v42  ;;  %1238 = vmatpush.msrb.mxu1 %v4119_v9  ;;  %v4128_v45 = vpop.permute.xlu0 %3333 }
 0x839   :  { %vm1189_vm2 = vmor %vm1187_vm1, %vm1188_vm15  ;;  %1269 = vmatpush.msra.mxu2 %v4712_v39  ;;  %v4705_v52 = vunpack.i.l.bf16 %v4128_v45 }
 0x83a   :  { %v1184_v22 = vsub.f32 1.0, %v1183_v57 }
 0x83b   :  { %1270 = vmatpush.msra.mxu2 %v4711_v32 }
 0x83c   :  { %v1185_v6 = vmul.f32 %v3387_v42, %v1184_v22 }
 0x83e   :  { %v1186_v46 = vadd.f32 %v3387_v42, %v1185_v6 }
 0x840   :  { %v1190_v13 = vsel %vm1189_vm2, %v3387_v42, %v1186_v46  ;;  %v4709_v42 = vunpack.i.h.bf16 %v4128_v45 }
 0x841   :  { %v1195_v57 = vsel %vm1192_vm3, %v1194_v25, %v1190_v13 }
 0x842   :  { %v1196_v22 = vmul.f32 %v3383_v31, %v1195_v57 }
 0x844   :  { %3156 = vmatmul.msk.f32.vlgmr.msra.gmra.mxu0 %vm437_vm8, %v1196_v22 }
 0x848   :  { %v4130_v6 = vpop.permute.xlu1 %3328 }
 0x849   :  { %v4710_v48 = vunpack.i.h.bf16 %v4130_v6  ;;  %v4706_v18 = vunpack.i.l.bf16 %v4130_v6 }
 0x84b   :  { %1308 = vmatpush.msrb.mxu3 %v4706_v18  ;;  %1271 = vmatpush.msra.mxu2 %v4710_v48 }
 0x84d   :  { %1309 = vmatpush.msrb.mxu3 %v4705_v52  ;;  %1272 = vmatpush.msra.mxu2 %v4709_v42 }
 0x84e   :  { %3160 = vmatmul.msk.f32.vlgmr.msrb.gmra.mxu3 %vm155_vm0, %v3883_v7 }
 0x850   :  { %v4146_v31 = vpop.permute.xlu1 %3343 }
 0x851   :  { %v4703_v13 = vunpack.i.h.bf16 %v4146_v31  ;;  %v4704_v46 = vunpack.i.l.bf16 %v4146_v31 }
 0x853   :  { %1343 = vmatpush.msrb.mxu0 %v4704_v46 }
 0x855   :  { %1344 = vmatpush.msrb.mxu0 %v4703_v13 }
 0x856   :  { %3161 = vmatmul.msk.f32.gmra.mxu3 %vm155_vm0, %v3894_v14  ;;  %3162 = vmatmul.msk.f32.vlgmr.msrb.gmra.mxu0 %vm155_vm0, %v3883_v7 }
 0x85e   :  { %3163 = vmatmul.msk.f32.gmra.mxu0 %vm155_vm0, %v3894_v14 }
 0x8b3   :  { %v1120_v25 = vpop.f32.mrf.mxu1 }
 0x8b4   :  { %3153 = vmatmul.msk.f32.vlgmr.msrb.gmra.mxu2 %vm437_vm8, %v1120_v25 }
 0x8b5   :  { %1443 = vmatpush.msrb.mxu2 %v4184_v8 }
 0x8bc   :  { %3158 = vmatmul.msk.f32.vlgmr.msra.gmra.mxu2 %vm155_vm0, %v3883_v7  ;;  %v821_v7 = vadd.f32 %v4082_v5, %v4084_v27 }
 0x8c1   :  { %v1217_v57 = vpop.f32.mrf.mxu0 }
 0x8c2   :  { %3157 = vmatmul.msk.f32.vlgmr.msrb.gmra.mxu1 %vm437_vm8, %v1217_v57 }
 0x8c4   :  { %3159 = vmatmul.msk.f32.gmra.mxu2 %vm155_vm0, %v3894_v14 }
 0x8d1   :  { %v1311_v22 = vpop.f32.mrf.mxu3 }
 0x8d2   :  { %3164 = vmatpush.xpose.msk.msra.mxu1 %vm437_vm8, %v1311_v22 }
 0x8d3   :  { %v1346_v13 = vpop.f32.mrf.mxu0 }
 0x8d6   :  { %1420 = vmatpush.msrb.mxu1 %v1346_v13 }
 0x8d9   :  { %v1314_v46 = vpop.f32.mrf.mxu3 }
 0x8da   :  { %3168 = vmatpush.xpose.msk.msra.mxu3 %vm437_vm8, %v1314_v46 }
 0x8db   :  { %v1349_v52 = vpop.f32.mrf.mxu0 }
 0x8dc   :  { %1517 = vmatpush.msra.mxu0 %v1349_v52 }
 0x8de   :  { %1859 = vmatpush.msrb.mxu0 %v3816_v34 }
 0x8e0   :  { %1860 = vmatpush.msrb.mxu0 %v3825_v37 }
 0x8e2   :  { %1861 = vmatpush.msrb.mxu0 %v3837_v40 }
 0x8e4   :  { %1862 = vmatpush.msrb.mxu0 %v3849_v43 }
 0x937   :  { %v1143_v14 = vpop.f32.mrf.mxu2 }
 0x938   :  { %v4174_v25 = vadd.f32 %v1143_v14, %v821_v7 }
 0x93f   :  { %v1274_v13 = vpop.f32.mrf.mxu2  ;;  %v4178_v34 = vpop.f32.mrf.mxu1 }
 0x940   :  { %v1280_v57 = vmul.f32 0.35355338, %v1274_v13 }
 0x942   :  { %3165 = vmatmul.msk.f32.vlgmr.msra.gmra.mxu1 %vm437_vm8, %v1280_v57 }
 0x943   :  { %1540 = vmatpush.msra.mxu1 %v4184_v8 }
 0x947   :  { %v1277_v46 = vpop.f32.mrf.mxu2 }
 0x948   :  { %v1281_v52 = vmul.f32 0.35355338, %v1277_v46 }
 0x94a   :  { %3169 = vmatmul.msk.f32.vlgmr.msra.gmra.mxu3 %vm437_vm8, %v1281_v52 }
 0x9bf   :  { %v1375_v37 = vpop.f32.mrf.mxu1 }
 0x9c0   :  { %v1378_v40 = vsel %vm437_vm8, %v1375_v37, -inf }
 0x9c1   :  { %1379 = vmax.xlane.f32.xlu0 %v1378_v40 }
 0x9cd   :  { %v1472_v43 = vpop.f32.mrf.mxu3 }
 0x9ce   :  { %v1475_v5 = vsel %vm437_vm8, %v1472_v43, -inf }
 0x9cf   :  { %1476 = vmax.xlane.f32.xlu1 %v1475_v5 }
 0xa34   :  { %v1380_v27 = vpop.xlane.xlu0 %1379 }
 0xa35   :  { %v1381_v22 = vsub.f32 %v1375_v37, %v1380_v27 }
 0xa37   :  { %v1382_v7 = vmul.f32 1.442695, %v1381_v22 }
 0xa39   :  { %3388 = vpow2.f32 %v1382_v7 }
 0xa3f   :  { %v3389_v14 = vpop.eup %3388 }
 0xa40   :  { %v1384_v13 = vsel %vm437_vm8, %v3389_v14, 0.0 }
 0xa41   :  { %1385 = vadd.xlane.f32.xlu2 %v1384_v13 }
 0xa42   :  { %v1477_v57 = vpop.xlane.xlu1 %1476 }
 0xa43   :  { %v1478_v46 = vsub.f32 %v1472_v43, %v1477_v57 }
 0xa45   :  { %v1479_v52 = vmul.f32 1.442695, %v1478_v46 }
 0xa47   :  { %3390 = vpow2.f32 %v1479_v52 }
 0xa4d   :  { %v3391_v18 = vpop.eup %3390 }
 0xa4e   :  { %v1481_v50 = vsel %vm437_vm8, %v3391_v18, 0.0 }
 0xa4f   :  { %1482 = vadd.xlane.f32.xlu0 %v1481_v50 }
 0xab4   :  { %v1386_v40 = vpop.xlane.xlu2 %1385 }
 0xab5   :  { %3392 = vrcp.f32 %v1386_v40  ;;  %v1398_v22 = vand.u32 2147483648, %v1386_v40  ;;  %v1396_v43 = vand.u32 2147483647, %v1386_v40  ;;  %vm1392_vm5 = vweird.f32 %v1386_v40 }
 0xab7   :  { %v1399_v50 = vor.u32 1.1754944e-38, %v1398_v22  ;;  %vm1397_vm7 = vcmp.eq.f32.partialorder %v1396_v43, 8.507059e+37 }
 0xabb   :  { %v3393_v37 = vpop.eup %3392 }
 0xabc   :  { %v1388_v5 = vmul.f32 %v3393_v37, %v1386_v40  ;;  %vm1393_vm4 = vweird.f32 %v3393_v37 }
 0xabd   :  { %vm1394_vm6 = vmor %vm1392_vm5, %vm1393_vm4  ;;  %vm1655_vm4 = vcmask 523264  }
 0xabe   :  { %v1389_v27 = vsub.f32 1.0, %v1388_v5  ;;  %v3460_v5 = vld [vmem:[%s4679_s9 + $0x18] sm:$0xff] }
 0xac0   :  { %v1390_v7 = vmul.f32 %v3393_v37, %v1389_v27 }
 0xac2   :  { %v1391_v13 = vadd.f32 %v3393_v37, %v1390_v7  ;;  %v1483_v57 = vpop.xlane.xlu0 %1482 }
 0xac3   :  { %3394 = vrcp.f32 %v1483_v57  ;;  %v1495_v7 = vand.u32 2147483648, %v1483_v57  ;;  %vm1489_vm10 = vweird.f32 %v1483_v57 }
 0xac4   :  { %v1395_v46 = vsel %vm1394_vm6, %v3393_v37, %v1391_v13  ;;  %v1493_v37 = vand.u32 2147483647, %v1483_v57 }
 0xac5   :  { %v1400_v52 = vsel %vm1397_vm7, %v1399_v50, %v1395_v46 }
 0xac6   :  { %v1401_v42 = vmul.f32 %v3389_v14, %v1400_v52  ;;  %vm1494_vm12 = vcmp.eq.f32.partialorder %v1493_v37, 8.507059e+37 }
 0xac8   :  { %3166 = vmatmul.msk.f32.vlgmr.msrb.gmra.mxu1 %vm437_vm8, %v1401_v42  ;;  %v1496_v42 = vor.u32 1.1754944e-38, %v1495_v7 }
 0xac9   :  { %v3395_v48 = vpop.eup %3394  ;;  %1884 = vmatpush.msrb.mxu1 %v3460_v5 }
 0xaca   :  { %v1485_v27 = vmul.f32 %v3395_v48, %v1483_v57  ;;  %vm1490_vm9 = vweird.f32 %v3395_v48 }
 0xacb   :  { %1885 = vmatpush.msrb.mxu1 %v3830_v38  ;;  %vm1491_vm11 = vmor %vm1489_vm10, %vm1490_vm9 }
 0xacc   :  { %v1486_v40 = vsub.f32 1.0, %v1485_v27 }
 0xacd   :  { %1886 = vmatpush.msrb.mxu1 %v3842_v41 }
 0xace   :  { %v1487_v22 = vmul.f32 %v3395_v48, %v1486_v40 }
 0xacf   :  { %1887 = vmatpush.msrb.mxu1 %v3854_v44 }
 0xad0   :  { %v1488_v14 = vadd.f32 %v3395_v48, %v1487_v22 }
 0xad2   :  { %v1492_v43 = vsel %vm1491_vm11, %v3395_v48, %v1488_v14 }
 0xad3   :  { %v1497_v13 = vsel %vm1494_vm12, %v1496_v42, %v1492_v43 }
 0xad4   :  { %v1498_v50 = vmul.f32 %v3391_v18, %v1497_v13  ;;  %v1243_v18 = vadd.f32 %v4178_v34, %v4086_v47 }
 0xad6   :  { %3170 = vmatmul.msk.f32.vlgmr.msra.gmra.mxu0 %vm437_vm8, %v1498_v50  ;;  %v4221_v50 = vld [vmem:[#allocation11 + $0x18] sm:$0xff] }
 0xad7   :  { %1630 = vmatpush.msra.mxu2 %v4221_v50 }
 0xb45   :  { %v1422_v38 = vpop.f32.mrf.mxu1 }
 0xb46   :  { %3167 = vmatmul.msk.f32.vlgmr.msrb.gmra.mxu2 %vm437_vm8, %v1422_v38  ;;  %v4224_v38 = vld [vmem:[#allocation11 + $0x10] sm:$0xff] }
 0xb47   :  { %1631 = vmatpush.msra.mxu2 %v4224_v38 }
 0xb53   :  { %v1519_v46 = vpop.f32.mrf.mxu0 }
 0xb54   :  { %3171 = vmatmul.msk.f32.vlgmr.msra.gmra.mxu1 %vm437_vm8, %v1519_v46  ;;  %v4227_v46 = vld [vmem:[#allocation11 + $0x8] sm:$0xff] }
 0xb55   :  { %1632 = vmatpush.msra.mxu2 %v4227_v46 }
 0xbc9   :  { %v1445_v41 = vpop.f32.mrf.mxu2 }
 0xbca   :  { %v1448_v52 = vadd.f32 %v1445_v41, %v4174_v25  ;;  %v4230_v41 = vld [vmem:[#allocation11] sm:$0xff] }
 0xbcb   :  { %1633 = vmatpush.msra.mxu2 %v4230_v41 }
 0xbcc   :  { %v4200_v44 = vadd.f32 %v1448_v52, %v3793_v10  ;;  %v3461_v52 = vld [vmem:[#allocation8 + $0x18] sm:$0xff] }
 0xbcd   :  { %1907 = vmatpush.msrb.mxu2 %v3461_v52 }
 0xbce   :  { %v1550_v48 = vsel %vm155_vm0, %v4200_v44, 0.0 }
 0xbcf   :  { %1551 = vadd.xlane.f32.xlu2 %v1550_v48  ;;  %v3462_v48 = vld [vmem:[#allocation8 + $0x10] sm:$0xff] }
 0xbd0   :  { %1908 = vmatpush.msrb.mxu2 %v3462_v48 }
 0xbd1   :  { %v1542_v57 = vpop.f32.mrf.mxu1 }
 0xbd2   :  { %v1545_v5 = vadd.f32 %v1542_v57, %v1243_v18  ;;  %v3463_v18 = vld [vmem:[#allocation8 + $0x8] sm:$0xff]  ;;  %v3464_v57 = vld [vmem:[#allocation8] sm:$0xff] }
 0xbd3   :  { %1909 = vmatpush.msrb.mxu2 %v3463_v18 }
 0xbd4   :  { %v4207_v27 = vadd.f32 %v1545_v5, %v3797_v15 }
 0xbd5   :  { %1910 = vmatpush.msrb.mxu2 %v3464_v57 }
 0xbd6   :  { %v1553_v40 = vsel %vm155_vm0, %v4207_v27, 0.0 }
 0xbd7   :  { %1554 = vadd.xlane.f32.xlu0 %v1553_v40 }
 0xc42   :  { %v1552_v25 = vpop.xlane.xlu2 %1551 }
 0xc43   :  { %v1556_v7 = vmul.f32 %v1552_v25, %v3801_v23 }
 0xc45   :  { %v1558_v22 = vsub.f32 %v4200_v44, %v1556_v7  ;;  %v4237_v7 = vld [vmem:[%s4686_s16 + $0x38] sm:$0xff] }
 0xc46   :  { %1670 = vmatpush.msrb.mxu3 %v4237_v7 }
 0xc47   :  { %v1560_v37 = vmul.f32 %v1558_v22, %v1558_v22 }
 0xc49   :  { %v1562_v14 = vsel %vm155_vm0, %v1560_v37, 0.0  ;;  %v4242_v37 = vld [vmem:[%s4686_s16 + $0x30] sm:$0xff] }
 0xc4a   :  { %v1555_v42 = vpop.xlane.xlu0 %1554  ;;  %1563 = vadd.xlane.f32.xlu1 %v1562_v14  ;;  %v4248_v14 = vld [vmem:[%s4686_s16 + $0x28] sm:$0xff]  ;;  %1671 = vmatpush.msrb.mxu3 %v4242_v37 }
 0xc4b   :  { %v1557_v47 = vmul.f32 %v1555_v42, %v3801_v23  ;;  %v4254_v42 = vld [vmem:[%s4686_s16 + $0x20] sm:$0xff] }
 0xc4c   :  { %1672 = vmatpush.msrb.mxu3 %v4248_v14 }
 0xc4d   :  { %v4216_v34 = vsub.f32 %v4207_v27, %v1557_v47 }
 0xc4e   :  { %1673 = vmatpush.msrb.mxu3 %v4254_v42 }
 0xc4f   :  { %v1561_v43 = vmul.f32 %v4216_v34, %v4216_v34 }
 0xc51   :  { %v1565_v13 = vsel %vm155_vm0, %v1561_v43, 0.0 }
 0xc52   :  { %1566 = vadd.xlane.f32.xlu2 %v1565_v13  ;;  %v4261_v13 = vld [vmem:[%s4686_s16 + $0x18] sm:$0xff] }
 0xc53   :  { %1674 = vmatpush.msrb.mxu3 %v4261_v13 }
 0xcbd   :  { %v1564_v5 = vpop.xlane.xlu1 %1563 }
 0xcbe   :  { %v1568_v40 = vmul.f32 %v1564_v5, %v3801_v23 }
 0xcc0   :  { %v1575_v25 = vadd.f32 1e-06, %v1568_v40  ;;  %v3350_v40 = vld [vmem:[%s4682_s12] ss:$0 sm:$0xff] }
 0xcc1   :  { %v1573_v4 = vmul.f32 %v3350_v40, %v1558_v22  ;;  %v1574_v22 = vmul.f32 %v3350_v40, %v4216_v34 }
 0xcc2   :  { %3396 = vrsqrt.f32 %v1575_v25  ;;  %vm1583_vm14 = vweird.f32 %v1575_v25 }
 0xcc5   :  { %v1567_v47 = vpop.xlane.xlu2 %1566 }
 0xcc6   :  { %v1569_v43 = vmul.f32 %v1567_v47, %v3801_v23 }
 0xcc8   :  { %v3397_v52 = vpop.eup %3396  ;;  %v1576_v48 = vadd.f32 1e-06, %v1569_v43  ;;  %v3351_v43 = vld [vmem:[%s4683_s13] ss:$0 sm:$0xff] }
 0xcc9   :  { %v1578_v18 = vmul.f32 %v3397_v52, %v1575_v25  ;;  %vm1584_vm13 = vweird.f32 %v3397_v52  ;;  %v3353_v25 = vld [vmem:[%s4687_s17] ss:$0 sm:$0xff] }
 0xcca   :  { %3398 = vrsqrt.f32 %v1576_v48  ;;  %vm1585_vm15 = vmor %vm1583_vm14, %vm1584_vm13  ;;  %vm1593_vm2 = vweird.f32 %v1576_v48 }
 0xccb   :  { %v1579_v57 = vmul.f32 %v3397_v52, %v1578_v18 }
 0xccd   :  { %v1580_v5 = vmul.f32 0.5, %v1579_v57 }
 0xccf   :  { %v1581_v47 = vsub.f32 1.5, %v1580_v5 }
 0xcd0   :  { %v3399_v32 = vpop.eup %3398 }
 0xcd1   :  { %v1582_v39 = vmul.f32 %v3397_v52, %v1581_v47  ;;  %v1588_v59 = vmul.f32 %v3399_v32, %v1576_v48  ;;  %vm1594_vm1 = vweird.f32 %v3399_v32  ;;  %v3354_v47 = vld [vmem:[%s4727_s29 + $0x1] ss:$0 sm:$0xff] }
 0xcd2   :  { %vm1595_vm3 = vmor %vm1593_vm2, %vm1594_vm1 }
 0xcd3   :  { %v1586_v3 = vsel %vm1585_vm15, %v3397_v52, %v1582_v39  ;;  %v1589_v54 = vmul.f32 %v3399_v32, %v1588_v59 }
 0xcd4   :  { %v1597_v18 = vmul.f32 %v1586_v3, %v1573_v4 }
 0xcd5   :  { %v1590_v57 = vmul.f32 0.5, %v1589_v54 }
 0xcd6   :  { %v1602_v35 = vadd.f32 %v3351_v43, %v1597_v18 }
 0xcd7   :  { %v1591_v33 = vsub.f32 1.5, %v1590_v57 }
 0xcd8   :  { %3172 = vmatmul.msk.f32.vlgmr.msra.gmra.mxu2 %vm155_vm0, %v1602_v35  ;;  %v4297_v35 = vld [vmem:[%s4686_s16] sm:$0xff] }
 0xcd9   :  { %v1592_v5 = vmul.f32 %v3399_v32, %v1591_v33  ;;  %2101 = vmatpush.msra.mxu2 %v3260_v21  ;;  %v4285_v21 = vld [vmem:[%s4686_s16 + $0x10] sm:$0xff]  ;;  %v4291_v33 = vld [vmem:[%s4686_s16 + $0x8] sm:$0xff]  ;;  %s3093_s16 = sshll.u32 %s4690_s20, 4  ;;  %s3094_s16 = int_to_ptr.hbm [resolvable:$true] %s3093_s16 }
 0xcda   :  { %1675 = vmatpush.msrb.mxu3 %v4285_v21 }
 0xcdb   :  { %2102 = vmatpush.msra.mxu2 %v3265_v58  ;;  %v1596_v39 = vsel %vm1595_vm3, %v3399_v32, %v1592_v5  ;;  %v3352_v58 = vld [vmem:[%s4685_s15] ss:$0 sm:$0xff] }
 0xcdc   :  { %v1598_v59 = vmul.f32 %v1596_v39, %v1574_v22  ;;  %1676 = vmatpush.msrb.mxu3 %v4291_v33 }
 0xcdd   :  { %2103 = vmatpush.msra.mxu2 %v3270_v2 }
 0xcde   :  { %v1603_v54 = vadd.f32 %v3351_v43, %v1598_v59  ;;  %1677 = vmatpush.msrb.mxu3 %v4297_v35  ;;  %v3465_v43 = vld [vmem:[#allocation6] sm:$0xff] }
 0xcdf   :  { %2104 = vmatpush.msra.mxu2 %v3275_v0 }
 0xce0   :  { %3173 = vmatmul.msk.f32.gmra.mxu2 %vm155_vm0, %v1603_v54 }
 0xd5b   :  { %v1635_v0 = vpop.f32.mrf.mxu2 }
 0xd5c   :  { %v1636_v2 = vadd.f32 %v3352_v58, %v1635_v0 }
 0xd5e   :  { %v1641_v3 = vmax.f32 %v1636_v2, 0.0 }
 0xd60   :  { %3174 = vmatmul.msk.f32.vlgmr.msrb.gmra.mxu3 %vm1655_vm4, %v1641_v3 }
 0xd63   :  { %v1638_v4 = vpop.f32.mrf.mxu2 }
 0xd64   :  { %v1639_v32 = vadd.f32 %v3352_v58, %v1638_v4 }
 0xd66   :  { %v1642_v34 = vmax.f32 %v1639_v32, 0.0 }
 0xd68   :  { %3175 = vmatmul.msk.f32.gmra.mxu3 %vm1655_vm4, %v1642_v34 }
 0xde3   :  { %v1679_v52 = vpop.f32.mrf.mxu3 }
 0xde4   :  { %v1680_v48 = vadd.f32 %v3353_v25, %v1679_v52 }
 0xde6   :  { %v4309_v40 = vadd.f32 %v1680_v48, %v4200_v44  ;;  %v3466_v44 = vld [vmem:[#allocation6 + $0x8] sm:$0xff] }
 0xde8   :  { %v1696_v18 = vadd.f32 %v3465_v43, %v4309_v40 }
 0xdea   :  { %v4315_v57 = vadd.f32 %v3354_v47, %v1696_v18 }
 0xdeb   :  { %v1682_v5 = vpop.f32.mrf.mxu3 }
 0xdec   :  { %v1683_v22 = vadd.f32 %v3353_v25, %v1682_v5  ;;  %v1793_v39 = vsel %vm155_vm0, %v4315_v57, 0.0 }
 0xded   :  { %1794 = vadd.xlane.f32.xlu1 %v1793_v39 }
 0xdee   :  { %v4320_v59 = vadd.f32 %v1683_v22, %v4207_v27 }
 0xdf0   :  { %v1697_v54 = vadd.f32 %v3466_v44, %v4320_v59 }
 0xdf2   :  { %v4323_v58 = vadd.f32 %v3354_v47, %v1697_v54 }
 0xdf4   :  { %v1796_v0 = vsel %vm155_vm0, %v4323_v58, 0.0 }
 0xdf5   :  { %1797 = vadd.xlane.f32.xlu2 %v1796_v0 }
 0xe60   :  { %v1795_v2 = vpop.xlane.xlu1 %1794 }
 0xe61   :  { %v1799_v3 = vmul.f32 %v1795_v2, %v3801_v23 }
 0xe63   :  { %v1801_v4 = vsub.f32 %v4315_v57, %v1799_v3 }
 0xe65   :  { %v1803_v32 = vmul.f32 %v1801_v4, %v1801_v4 }
 0xe67   :  { %v1805_v34 = vsel %vm155_vm0, %v1803_v32, 0.0 }
 0xe68   :  { %1806 = vadd.xlane.f32.xlu0 %v1805_v34  ;;  %v1798_v27 = vpop.xlane.xlu2 %1797 }
 0xe69   :  { %v1800_v25 = vmul.f32 %v1798_v27, %v3801_v23 }
 0xe6b   :  { %v1802_v52 = vsub.f32 %v4323_v58, %v1800_v25 }
 0xe6d   :  { %v1804_v48 = vmul.f32 %v1802_v52, %v1802_v52 }
 0xe6f   :  { %v1808_v47 = vsel %vm155_vm0, %v1804_v48, 0.0  ;;  %v3467_v48 = vld [vmem:[%s4676_s6] ss:$0 sm:$0xff] }
 0xe70   :  { %1809 = vadd.xlane.f32.xlu1 %v1808_v47  ;;  %v1813_v47 = vmul.f32 %v3467_v48, %v1801_v4 }
 0xedb   :  { %v1807_v43 = vpop.xlane.xlu0 %1806 }
 0xedc   :  { %v1811_v18 = vmul.f32 %v1807_v43, %v3801_v23 }
 0xede   :  { %v1815_v5 = vadd.f32 1e-06, %v1811_v18 }
 0xee0   :  { %3400 = vrsqrt.f32 %v1815_v5  ;;  %vm1823_vm6 = vweird.f32 %v1815_v5 }
 0xee3   :  { %v1810_v22 = vpop.xlane.xlu1 %1809 }
 0xee4   :  { %v1812_v39 = vmul.f32 %v1810_v22, %v3801_v23 }
 0xee6   :  { %v3401_v44 = vpop.eup %3400  ;;  %v1816_v54 = vadd.f32 1e-06, %v1812_v39 }
 0xee7   :  { %v1818_v0 = vmul.f32 %v3401_v44, %v1815_v5  ;;  %vm1824_vm5 = vweird.f32 %v3401_v44  ;;  %v1814_v5 = vmul.f32 %v3467_v48, %v1802_v52 }
 0xee8   :  { %3402 = vrsqrt.f32 %v1816_v54  ;;  %vm1825_vm7 = vmor %vm1823_vm6, %vm1824_vm5  ;;  %vm1833_vm10 = vweird.f32 %v1816_v54 }
 0xee9   :  { %v1819_v2 = vmul.f32 %v3401_v44, %v1818_v0  ;;  %v3468_v0 = vld [vmem:[%s4677_s7] ss:$0 sm:$0xff] }
 0xeeb   :  { %v1820_v3 = vmul.f32 0.5, %v1819_v2 }
 0xeed   :  { %v1821_v32 = vsub.f32 1.5, %v1820_v3 }
 0xeee   :  { %v3403_v34 = vpop.eup %3402 }
 0xeef   :  { %v1822_v27 = vmul.f32 %v3401_v44, %v1821_v32  ;;  %v1828_v25 = vmul.f32 %v3403_v34, %v1816_v54  ;;  %vm1834_vm9 = vweird.f32 %v3403_v34 }
 0xef0   :  { %vm1835_vm11 = vmor %vm1833_vm10, %vm1834_vm9 }
 0xef1   :  { %v1826_v43 = vsel %vm1825_vm7, %v3401_v44, %v1822_v27  ;;  %v1829_v18 = vmul.f32 %v3403_v34, %v1828_v25  ;;  %v3469_v44 = vld [vmem:[#allocation9] sm:$0xff] }
 0xef2   :  { %v1837_v22 = vmul.f32 %v1826_v43, %v1813_v47 }
 0xef3   :  { %v1830_v39 = vmul.f32 0.5, %v1829_v18 }
 0xef4   :  { %v4341_v2 = vadd.f32 %v3468_v0, %v1837_v22 }
 0xef5   :  { %v1831_v3 = vsub.f32 1.5, %v1830_v39 }
 0xef6   :  { %3184 = vmatmul.msk.f32.vlgmr.msrb.gmra.mxu0 %vm155_vm0, %v4341_v2  ;;  %3186 = vmatmul.msk.f32.vlgmr.msrb.gmra.mxu1 %vm155_vm0, %v4341_v2 }
 0xef7   :  { %v1832_v4 = vmul.f32 %v3403_v34, %v1831_v3  ;;  %3188 = vmatmul.msk.f32.vlgmr.msrb.gmra.mxu2 %vm155_vm0, %v4341_v2 }
 0xef8   :  { %2249 = vmatpush.msrb.mxu2 %v3469_v44 }
 0xef9   :  { %v1836_v32 = vsel %vm1835_vm11, %v3403_v34, %v1832_v4 }
 0xefa   :  { %v1838_v27 = vmul.f32 %v1836_v32, %v1814_v5 }
 0xefc   :  { %v4349_v25 = vadd.f32 %v3468_v0, %v1838_v27 }
 0xefe   :  { %3185 = vmatmul.msk.f32.gmra.mxu0 %vm155_vm0, %v4349_v25  ;;  %3187 = vmatmul.msk.f32.gmra.mxu1 %vm155_vm0, %v4349_v25 }
 0xeff   :  { %3189 = vmatmul.msk.f32.gmra.mxu2 %vm155_vm0, %v4349_v25 }
 0xf07   :  { %3198 = vmatmul.msk.f32.vlgmr.msra.gmra.mxu2 %vm155_vm0, %v4341_v2 }
 0xf08   :  { %2368 = vmatpush.msra.mxu2 %v3469_v44 }
 0xf0f   :  { %3199 = vmatmul.msk.f32.gmra.mxu2 %vm155_vm0, %v4349_v25 }
 0xf73   :  { %v1864_v52 = vpop.f32.mrf.mxu0  ;;  %v1889_v54 = vpop.f32.mrf.mxu1 }
 0xf74   :  { %v1870_v34 = vmul.f32 0.35355338, %v1864_v52  ;;  %3190 = vmatpush.xpose.msk.msra.mxu0 %vm437_vm8, %v1889_v54 }
 0xf77   :  { %3191 = vmatmul.msk.f32.vlgmr.msra.gmra.mxu0 %vm437_vm8, %v1870_v34 }
 0xf7a   :  { %v1912_v48 = vpop.f32.mrf.mxu2 }
 0xf7b   :  { %1986 = vmatpush.msra.mxu1 %v1912_v48  ;;  %v1867_v47 = vpop.f32.mrf.mxu0  ;;  %v1892_v43 = vpop.f32.mrf.mxu1 }
 0xf7c   :  { %v1871_v18 = vmul.f32 0.35355338, %v1867_v47  ;;  %3193 = vmatpush.xpose.msk.msra.mxu3 %vm437_vm8, %v1892_v43 }
 0xf7d   :  { %2076 = vmatpush.msrb.mxu1 %v3261_v19  ;;  %v4729_v19 = vunpack.i.h.bf16 %v3917_v29  ;;  %v4732_v29 = vunpack.i.h.bf16 %v4012_v61 }
 0xf7f   :  { %2077 = vmatpush.msrb.mxu1 %v3266_v56  ;;  %3194 = vmatmul.msk.f32.vlgmr.msra.gmra.mxu3 %vm437_vm8, %v1871_v18 }
 0xf80   :  { %2124 = vmatpush.msrb.mxu3 %v3280_v26 }
 0xf81   :  { %2078 = vmatpush.msrb.mxu1 %v3271_v1 }
 0xf82   :  { %2125 = vmatpush.msrb.mxu3 %v3281_v30  ;;  %v1915_v22 = vpop.f32.mrf.mxu2  ;;  %v4731_v30 = vunpack.i.h.bf16 %v4010_v60 }
 0xf83   :  { %2079 = vmatpush.msrb.mxu1 %v3276_v63  ;;  %2059 = vmatpush.msrb.mxu0 %v1915_v22 }
 0xf84   :  { %2126 = vmatpush.msrb.mxu3 %v4728_v16 }
 0xf86   :  { %2127 = vmatpush.msrb.mxu3 %v4729_v19 }
 0xf87   :  { %3200 = vmatmul.msk.f32.vlgmr.msrb.gmra.mxu3 %vm155_vm0, %v4341_v2 }
 0xf8a   :  { %v2106_v26 = vpop.f32.mrf.mxu2 }
 0xf8b   :  { %3202 = vmatpush.xpose.msk.msra.mxu0 %vm437_vm8, %v2106_v26 }
 0xf8f   :  { %3201 = vmatmul.msk.f32.gmra.mxu3 %vm155_vm0, %v4349_v25 }
 0xf92   :  { %v2109_v20 = vpop.f32.mrf.mxu2 }
 0xf93   :  { %3207 = vmatpush.xpose.msk.msra.mxu3 %vm437_vm8, %v2109_v20 }
 0xf97   :  { %2385 = vmatpush.msrb.mxu3 %v4730_v17 }
 0xf99   :  { %2386 = vmatpush.msrb.mxu3 %v4731_v30 }
 0xf9b   :  { %2387 = vmatpush.msrb.mxu3 %v4732_v29 }
 0xf9d   :  { %2388 = vmatpush.msrb.mxu3 %v4733_v55 }
 0xff4   :  { %v1941_v56 = vpop.f32.mrf.mxu0 }
 0xff5   :  { %v1944_v62 = vsel %vm437_vm8, %v1941_v56, -inf }
 0xff6   :  { %1945 = vmax.xlane.f32.xlu0 %v1944_v62 }
0x1002   :  { %v2014_v63 = vpop.f32.mrf.mxu3 }
0x1003   :  { %v2017_v1 = vsel %vm437_vm8, %v2014_v63, -inf }
0x1004   :  { %2018 = vmax.xlane.f32.xlu1 %v2017_v1 }
0x1069   :  { %v1946_v39 = vpop.xlane.xlu0 %1945 }
0x106a   :  { %v1947_v0 = vsub.f32 %v1941_v56, %v1946_v39 }
0x106c   :  { %v1948_v3 = vmul.f32 1.442695, %v1947_v0 }
0x106e   :  { %3404 = vpow2.f32 %v1948_v3 }
0x1074   :  { %v3405_v4 = vpop.eup %3404 }
0x1075   :  { %v1950_v5 = vsel %vm437_vm8, %v3405_v4, 0.0 }
0x1076   :  { %1951 = vadd.xlane.f32.xlu2 %v1950_v5 }
0x1077   :  { %v2019_v44 = vpop.xlane.xlu1 %2018 }
0x1078   :  { %v2020_v32 = vsub.f32 %v2014_v63, %v2019_v44 }
0x107a   :  { %v2021_v27 = vmul.f32 1.442695, %v2020_v32  ;;  %v2129_v32 = vpop.f32.mrf.mxu3 }
0x107c   :  { %3406 = vpow2.f32 %v2021_v27 }
0x1082   :  { %v3407_v52 = vpop.eup %3406 }
0x1083   :  { %v2023_v54 = vsel %vm437_vm8, %v3407_v52, 0.0 }
0x1084   :  { %2024 = vadd.xlane.f32.xlu0 %v2023_v54 }
0x10e9   :  { %v1952_v34 = vpop.xlane.xlu2 %1951 }
0x10ea   :  { %3408 = vrcp.f32 %v1952_v34  ;;  %v1964_v18 = vand.u32 2147483648, %v1952_v34  ;;  %v1962_v16 = vand.u32 2147483647, %v1952_v34  ;;  %vm1958_vm13 = vweird.f32 %v1952_v34 }
0x10ec   :  { %v1965_v20 = vor.u32 1.1754944e-38, %v1964_v18  ;;  %vm1963_vm15 = vcmp.eq.f32.partialorder %v1962_v16, 8.507059e+37  ;;  %v4735_v18 = vunpack.i.h.bf16 %v4098_v11  ;;  %v4737_v16 = vunpack.i.h.bf16 %v4128_v45 }
0x10f0   :  { %v3409_v48 = vpop.eup %3408 }
0x10f1   :  { %v1954_v47 = vmul.f32 %v3409_v48, %v1952_v34  ;;  %vm1959_vm12 = vweird.f32 %v3409_v48 }
0x10f2   :  { %vm1960_vm14 = vmor %vm1958_vm13, %vm1959_vm12 }
0x10f3   :  { %v1955_v43 = vsub.f32 1.0, %v1954_v47 }
0x10f5   :  { %v1956_v22 = vmul.f32 %v3409_v48, %v1955_v43  ;;  %v4734_v43 = vunpack.i.h.bf16 %v4100_v51 }
0x10f7   :  { %v1957_v19 = vadd.f32 %v3409_v48, %v1956_v22  ;;  %v2025_v26 = vpop.xlane.xlu0 %2024  ;;  %v4736_v22 = vunpack.i.h.bf16 %v4130_v6 }
0x10f8   :  { %3410 = vrcp.f32 %v2025_v26  ;;  %v2037_v63 = vand.u32 2147483648, %v2025_v26  ;;  %v2035_v39 = vand.u32 2147483647, %v2025_v26  ;;  %vm2031_vm2 = vweird.f32 %v2025_v26 }
0x10f9   :  { %v1961_v17 = vsel %vm1960_vm14, %v3409_v48, %v1957_v19  ;;  %v2132_v48 = vpop.f32.mrf.mxu3 }
0x10fa   :  { %v1966_v30 = vsel %vm1963_vm15, %v1965_v20, %v1961_v17  ;;  %v2038_v3 = vor.u32 1.1754944e-38, %v2037_v63  ;;  %vm2036_vm5 = vcmp.eq.f32.partialorder %v2035_v39, 8.507059e+37 }
0x10fb   :  { %v1967_v29 = vmul.f32 %v3405_v4, %v1966_v30 }
0x10fd   :  { %3192 = vmatmul.msk.f32.vlgmr.msra.gmra.mxu1 %vm437_vm8, %v1967_v29 }
0x10fe   :  { %v3411_v55 = vpop.eup %3410  ;;  %2226 = vmatpush.msra.mxu1 %v4052_v36 }
0x10ff   :  { %v2027_v56 = vmul.f32 %v3411_v55, %v2025_v26  ;;  %vm2032_vm1 = vweird.f32 %v3411_v55 }
0x1100   :  { %vm2033_vm3 = vmor %vm2031_vm2, %vm2032_vm1 }
0x1101   :  { %v2028_v62 = vsub.f32 1.0, %v2027_v56 }
0x1103   :  { %v2029_v1 = vmul.f32 %v3411_v55, %v2028_v62 }
0x1105   :  { %v2030_v0 = vadd.f32 %v3411_v55, %v2029_v1  ;;  %3196 = vmatmul.msk.f32.vlgmr.msrb.gmra.mxu1 %vm155_vm0, %v4341_v2 }
0x1106   :  { %2345 = vmatpush.msrb.mxu1 %v4052_v36 }
0x1107   :  { %v2034_v4 = vsel %vm2033_vm3, %v3411_v55, %v2030_v0 }
0x1108   :  { %v2039_v5 = vsel %vm2036_vm5, %v2038_v3, %v2034_v4 }
0x1109   :  { %v2040_v44 = vmul.f32 %v3407_v52, %v2039_v5 }
0x110b   :  { %3195 = vmatmul.msk.f32.vlgmr.msrb.gmra.mxu0 %vm437_vm8, %v2040_v44 }
0x110c   :  { %2203 = vmatpush.msrb.mxu0 %v2129_v32 }
0x110d   :  { %3197 = vmatmul.msk.f32.gmra.mxu1 %vm155_vm0, %v4349_v25 }
0x117a   :  { %v1988_v27 = vpop.f32.mrf.mxu1 }
0x117b   :  { %3206 = vmatmul.msk.f32.vlgmr.msrb.gmra.mxu2 %vm437_vm8, %v1988_v27 }
0x1182   :  { %v2081_v54 = vpop.f32.mrf.mxu1 }
0x1183   :  { %v2087_v34 = vmul.f32 0.35355338, %v2081_v54 }
0x1185   :  { %3203 = vmatmul.msk.f32.vlgmr.msra.gmra.mxu0 %vm437_vm8, %v2087_v34 }
0x1186   :  { %2322 = vmatpush.msra.mxu0 %v2132_v48 }
0x1188   :  { %v2061_v36 = vpop.f32.mrf.mxu0 }
0x1189   :  { %3211 = vmatmul.msk.f32.vlgmr.msra.gmra.mxu2 %vm437_vm8, %v2061_v36 }
0x118a   :  { %v2084_v52 = vpop.f32.mrf.mxu1 }
0x118b   :  { %v2088_v47 = vmul.f32 0.35355338, %v2084_v52 }
0x118d   :  { %3208 = vmatmul.msk.f32.vlgmr.msra.gmra.mxu3 %vm437_vm8, %v2088_v47 }
0x118e   :  { %2535 = vmatpush.msra.mxu3 %v4119_v9 }
0x1195   :  { %3212 = vmatmul.msk.f32.vlgmr.msrb.gmra.mxu3 %vm155_vm0, %v4341_v2 }
0x1196   :  { %2650 = vmatpush.msrb.mxu3 %v4734_v43 }
0x1198   :  { %2651 = vmatpush.msrb.mxu3 %v4735_v18 }
0x119a   :  { %2652 = vmatpush.msrb.mxu3 %v4736_v22  ;;  %v4738_v22 = vunpack.i.l.bf16 %v4005_v53 }
0x119c   :  { %2653 = vmatpush.msrb.mxu3 %v4737_v16 }
0x119d   :  { %3213 = vmatmul.msk.f32.gmra.mxu3 %vm155_vm0, %v4349_v25 }
0x1202   :  { %v2158_v19 = vpop.f32.mrf.mxu0 }
0x1203   :  { %v2161_v9 = vsel %vm437_vm8, %v2158_v19, -inf }
0x1204   :  { %2162 = vmax.xlane.f32.xlu2 %v2161_v9 }
0x1210   :  { %v2277_v26 = vpop.f32.mrf.mxu3 }
0x1211   :  { %v2280_v20 = vsel %vm437_vm8, %v2277_v26, -inf }
0x1212   :  { %2281 = vmax.xlane.f32.xlu1 %v2280_v20  ;;  %v4740_v20 = vunpack.i.l.bf16 %v4012_v61 }
0x1277   :  { %v2163_v17 = vpop.xlane.xlu2 %2162 }
0x1278   :  { %v2164_v30 = vsub.f32 %v2158_v19, %v2163_v17  ;;  %v4739_v19 = vunpack.i.l.bf16 %v4010_v60 }
0x127a   :  { %v2165_v29 = vmul.f32 1.442695, %v2164_v30 }
0x127c   :  { %3412 = vpow2.f32 %v2165_v29  ;;  %v4741_v29 = vunpack.i.l.bf16 %v4032_v49  ;;  %v4742_v49 = vunpack.i.l.bf16 %v4056_v24 }
0x1282   :  { %v3413_v55 = vpop.eup %3412 }
0x1283   :  { %v2167_v56 = vsel %vm437_vm8, %v3413_v55, 0.0 }
0x1284   :  { %2168 = vadd.xlane.f32.xlu0 %v2167_v56 }
0x1285   :  { %v2282_v62 = vpop.xlane.xlu1 %2281 }
0x1286   :  { %v2283_v63 = vsub.f32 %v2277_v26, %v2282_v62 }
0x1288   :  { %v2284_v1 = vmul.f32 1.442695, %v2283_v63  ;;  %v4743_v63 = vunpack.i.h.bf16 %v4056_v24 }
0x128a   :  { %3414 = vpow2.f32 %v2284_v1  ;;  %v4744_v1 = vunpack.i.l.bf16 %v4059_v28 }
0x1290   :  { %v3415_v39 = vpop.eup %3414 }
0x1291   :  { %v2286_v0 = vsel %vm437_vm8, %v3415_v39, 0.0 }
0x1292   :  { %2287 = vadd.xlane.f32.xlu2 %v2286_v0 }
0x12f7   :  { %v2169_v3 = vpop.xlane.xlu0 %2168 }
0x12f8   :  { %3416 = vrcp.f32 %v2169_v3  ;;  %v2181_v32 = vand.u32 2147483648, %v2169_v3  ;;  %v2179_v54 = vand.u32 2147483647, %v2169_v3  ;;  %vm2175_vm7 = vweird.f32 %v2169_v3 }
0x12fa   :  { %v2182_v36 = vor.u32 1.1754944e-38, %v2181_v32  ;;  %vm2180_vm10 = vcmp.eq.f32.partialorder %v2179_v54, 8.507059e+37  ;;  %v4746_v32 = vunpack.i.l.bf16 %v4100_v51  ;;  %v4748_v54 = vunpack.i.l.bf16 %v4130_v6 }
0x12fe   :  { %v3417_v4 = vpop.eup %3416 }
0x12ff   :  { %v2171_v5 = vmul.f32 %v3417_v4, %v2169_v3  ;;  %vm2176_vm6 = vweird.f32 %v3417_v4  ;;  %v2390_v3 = vpop.f32.mrf.mxu3 }
0x1300   :  { %vm2177_vm9 = vmor %vm2175_vm7, %vm2176_vm6 }
0x1301   :  { %v2172_v44 = vsub.f32 1.0, %v2171_v5  ;;  %v2396_v5 = vmul.f32 0.35355338, %v2390_v3 }
0x1303   :  { %v2173_v27 = vmul.f32 %v3417_v4, %v2172_v44 }
0x1305   :  { %v2174_v34 = vadd.f32 %v3417_v4, %v2173_v27  ;;  %v2288_v48 = vpop.xlane.xlu2 %2287  ;;  %v4747_v27 = vunpack.i.l.bf16 %v4098_v11  ;;  %v4480_v11 = vpop.f32.mrf.mxu2 }
0x1306   :  { %3418 = vrcp.f32 %v2288_v48  ;;  %v2300_v26 = vand.u32 2147483648, %v2288_v48  ;;  %v2298_v30 = vand.u32 2147483647, %v2288_v48  ;;  %vm2294_vm12 = vweird.f32 %v2288_v48 }
0x1307   :  { %v2178_v52 = vsel %vm2177_vm9, %v3417_v4, %v2174_v34  ;;  %v2393_v24 = vpop.f32.mrf.mxu3  ;;  %v4749_v34 = vunpack.i.l.bf16 %v4128_v45 }
0x1308   :  { %v2183_v47 = vsel %vm2180_vm10, %v2182_v36, %v2178_v52  ;;  %v2301_v53 = vor.u32 1.1754944e-38, %v2300_v26  ;;  %vm2299_vm14 = vcmp.eq.f32.partialorder %v2298_v30, 8.507059e+37  ;;  %v4752_v52 = vunpack.i.l.bf16 %v4146_v31 }
0x1309   :  { %v2184_v43 = vmul.f32 %v3413_v55, %v2183_v47  ;;  %v4753_v47 = vunpack.i.h.bf16 %v4146_v31 }
0x130b   :  { %3204 = vmatmul.msk.f32.vlgmr.msrb.gmra.mxu0 %vm437_vm8, %v2184_v43 }
0x130c   :  { %v3419_v18 = vpop.eup %3418  ;;  %2410 = vmatpush.msrb.mxu0 %v4738_v22 }
0x130d   :  { %v2290_v16 = vmul.f32 %v3419_v18, %v2288_v48  ;;  %vm2295_vm11 = vweird.f32 %v3419_v18  ;;  %v2370_v45 = vpop.f32.mrf.mxu2  ;;  %v4751_v48 = vunpack.i.h.bf16 %v4108_v12 }
0x130e   :  { %2411 = vmatpush.msrb.mxu0 %v4739_v19  ;;  %vm2296_vm13 = vmor %vm2294_vm12, %vm2295_vm11 }
0x130f   :  { %v2291_v9 = vsub.f32 1.0, %v2290_v16 }
0x1310   :  { %2412 = vmatpush.msrb.mxu0 %v4740_v20 }
0x1311   :  { %v2292_v17 = vmul.f32 %v3419_v18, %v2291_v9 }
0x1312   :  { %2413 = vmatpush.msrb.mxu0 %v4741_v29 }
0x1313   :  { %v2293_v55 = vadd.f32 %v3419_v18, %v2292_v17 }
0x1315   :  { %v2297_v56 = vsel %vm2296_vm13, %v3419_v18, %v2293_v55 }
0x1316   :  { %v2302_v62 = vsel %vm2299_vm14, %v2301_v53, %v2297_v56 }
0x1317   :  { %v2303_v60 = vmul.f32 %v3415_v39, %v2302_v62  ;;  %v4745_v39 = vunpack.i.h.bf16 %v4059_v28  ;;  %v2397_v28 = vmul.f32 0.35355338, %v2393_v24 }
0x1319   :  { %3209 = vmatmul.msk.f32.vlgmr.msra.gmra.mxu0 %vm437_vm8, %v2303_v60 }
0x1321   :  { %3214 = vmatmul.msk.f32.vlgmr.msrb.gmra.mxu0 %vm155_vm0, %v4341_v2 }
0x1329   :  { %3215 = vmatmul.msk.f32.gmra.mxu0 %vm155_vm0, %v4349_v25 }
0x1388   :  { %v2205_v61 = vpop.f32.mrf.mxu0 }
0x1389   :  { %3205 = vmatmul.msk.f32.vlgmr.msra.gmra.mxu1 %vm437_vm8, %v2205_v61 }
0x138a   :  { %2433 = vmatpush.msra.mxu1 %v4742_v49 }
0x138c   :  { %2434 = vmatpush.msra.mxu1 %v4743_v63 }
0x138e   :  { %2435 = vmatpush.msra.mxu1 %v4744_v1 }
0x1390   :  { %2436 = vmatpush.msra.mxu1 %v4745_v39 }
0x1396   :  { %v2324_v0 = vpop.f32.mrf.mxu0 }
0x1397   :  { %3210 = vmatmul.msk.f32.vlgmr.msrb.gmra.mxu1 %vm437_vm8, %v2324_v0 }
0x139e   :  { %v2415_v4 = vpop.f32.mrf.mxu0 }
0x139f   :  { %3216 = vmatmul.msk.f32.vlgmr.msra.gmra.mxu1 %vm155_vm0, %v4341_v2  ;;  %3218 = vmatpush.xpose.msk.msrb.mxu2 %vm437_vm8, %v2415_v4 }
0x13a2   :  { %3219 = vmatmul.msk.f32.vlgmr.msrb.gmra.mxu2 %vm437_vm8, %v2396_v5 }
0x13a6   :  { %v2418_v44 = vpop.f32.mrf.mxu0 }
0x13a7   :  { %3217 = vmatmul.msk.f32.gmra.mxu1 %vm155_vm0, %v4349_v25  ;;  %3222 = vmatpush.xpose.msk.msra.mxu0 %vm437_vm8, %v2418_v44 }
0x13aa   :  { %3223 = vmatmul.msk.f32.vlgmr.msra.gmra.mxu0 %vm437_vm8, %v2397_v28 }
0x13ab   :  { %2675 = vmatpush.msrb.mxu0 %v4746_v32 }
0x13ad   :  { %2676 = vmatpush.msrb.mxu0 %v4747_v27 }
0x13af   :  { %2677 = vmatpush.msrb.mxu0 %v4748_v54 }
0x13b1   :  { %2678 = vmatpush.msrb.mxu0 %v4749_v34 }
0x13b2   :  { %3228 = vmatmul.msk.f32.vlgmr.msrb.gmra.mxu0 %vm155_vm0, %v4341_v2 }
0x13b3   :  { %2998 = vmatpush.msra.mxu0 %v4237_v7 }
0x13b5   :  { %2999 = vmatpush.msra.mxu0 %v4242_v37 }
0x13b7   :  { %3000 = vmatpush.msra.mxu0 %v4248_v14  ;;  %v3470_v14 = vld [vmem:[#allocation9 + $0x10] sm:$0xff] }
0x13b9   :  { %3001 = vmatpush.msra.mxu0 %v4254_v42 }
0x13ba   :  { %3229 = vmatmul.msk.f32.gmra.mxu0 %vm155_vm0, %v4349_v25 }
0x13bb   :  { %3002 = vmatpush.msra.mxu0 %v4261_v13 }
0x13bd   :  { %3003 = vmatpush.msra.mxu0 %v4285_v21  ;;  %v4750_v21 = vunpack.i.l.bf16 %v4108_v12 }
0x13bf   :  { %3004 = vmatpush.msra.mxu0 %v4291_v33 }
0x13c1   :  { %3005 = vmatpush.msra.mxu0 %v4297_v35 }
0x1406   :  { %v4482_v51 = vpop.f32.mrf.mxu1 }
0x1414   :  { %v2347_v6 = vpop.f32.mrf.mxu1 }
0x1415   :  { %v4484_v7 = vadd.f32 %v2370_v45, %v2347_v6 }
0x141c   :  { %v2438_v37 = vpop.f32.mrf.mxu1 }
0x141d   :  { %2512 = vmatpush.msra.mxu2 %v2438_v37 }
0x141f   :  { %2632 = vmatpush.msrb.mxu2 %v3470_v14 }
0x1424   :  { %v2441_v42 = vpop.f32.mrf.mxu1 }
0x1425   :  { %v2467_v13 = vpop.f32.mrf.mxu2  ;;  %2609 = vmatpush.msrb.mxu1 %v2441_v42 }
0x1426   :  { %v2470_v33 = vsel %vm437_vm8, %v2467_v13, -inf }
0x1427   :  { %2698 = vmatpush.msra.mxu1 %v4750_v21  ;;  %2471 = vmax.xlane.f32.xlu1 %v2470_v33  ;;  %v2564_v35 = vpop.f32.mrf.mxu0 }
0x1428   :  { %v2567_v36 = vsel %vm437_vm8, %v2564_v35, -inf }
0x1429   :  { %2699 = vmatpush.msra.mxu1 %v4751_v48  ;;  %2568 = vmax.xlane.f32.xlu2 %v2567_v36 }
0x142b   :  { %2700 = vmatpush.msra.mxu1 %v4752_v52 }
0x142d   :  { %2701 = vmatpush.msra.mxu1 %v4753_v47 }
0x142f   :  { %v2680_v61 = vpop.f32.mrf.mxu0 }
0x1437   :  { %v2683_v6 = vpop.f32.mrf.mxu0 }
0x149a   :  { %v2472_v43 = vpop.xlane.xlu1 %2471 }
0x149b   :  { %v2473_v18 = vsub.f32 %v2467_v13, %v2472_v43 }
0x149c   :  { %v2569_v22 = vpop.xlane.xlu2 %2568 }
0x149d   :  { %v2474_v16 = vmul.f32 1.442695, %v2473_v18  ;;  %v2570_v19 = vsub.f32 %v2564_v35, %v2569_v22 }
0x149f   :  { %3420 = vpow2.f32 %v2474_v16  ;;  %v2571_v9 = vmul.f32 1.442695, %v2570_v19 }
0x14a1   :  { %3422 = vpow2.f32 %v2571_v9 }
0x14a5   :  { %v3421_v26 = vpop.eup %3420 }
0x14a6   :  { %v2476_v12 = vsel %vm437_vm8, %v3421_v26, 0.0 }
0x14a7   :  { %v3423_v20 = vpop.eup %3422  ;;  %2477 = vadd.xlane.f32.xlu0 %v2476_v12 }
0x14a8   :  { %v2573_v17 = vsel %vm437_vm8, %v3423_v20, 0.0 }
0x14a9   :  { %2574 = vadd.xlane.f32.xlu1 %v2573_v17 }
0x151a   :  { %v2478_v30 = vpop.xlane.xlu0 %2477 }
0x151b   :  { %3424 = vrcp.f32 %v2478_v30  ;;  %v2490_v60 = vand.u32 2147483648, %v2478_v30  ;;  %v2488_v63 = vand.u32 2147483647, %v2478_v30  ;;  %vm2484_vm1 = vweird.f32 %v2478_v30 }
0x151c   :  { %v2575_v31 = vpop.xlane.xlu1 %2574 }
0x151d   :  { %3426 = vrcp.f32 %v2575_v31  ;;  %v2587_v39 = vand.u32 2147483648, %v2575_v31  ;;  %v2585_v4 = vand.u32 2147483647, %v2575_v31  ;;  %v2491_v5 = vor.u32 1.1754944e-38, %v2490_v60 }
0x151e   :  { %vm2489_vm5 = vcmp.eq.f32.partialorder %v2488_v63, 8.507059e+37  ;;  %vm2581_vm6 = vweird.f32 %v2575_v31 }
0x151f   :  { %v2588_v32 = vor.u32 1.1754944e-38, %v2587_v39  ;;  %vm2586_vm9 = vcmp.eq.f32.partialorder %v2585_v4, 8.507059e+37 }
0x1521   :  { %v3425_v29 = vpop.eup %3424 }
0x1522   :  { %v2480_v55 = vmul.f32 %v3425_v29, %v2478_v30  ;;  %vm2485_vm15 = vweird.f32 %v3425_v29 }
0x1523   :  { %v3427_v53 = vpop.eup %3426  ;;  %vm2486_vm3 = vmor %vm2484_vm1, %vm2485_vm15 }
0x1524   :  { %v2481_v56 = vsub.f32 1.0, %v2480_v55  ;;  %v2577_v62 = vmul.f32 %v3427_v53, %v2575_v31  ;;  %vm2582_vm2 = vweird.f32 %v3427_v53 }
0x1525   :  { %vm2583_vm7 = vmor %vm2581_vm6, %vm2582_vm2 }
0x1526   :  { %v2482_v49 = vmul.f32 %v3425_v29, %v2481_v56  ;;  %v2578_v1 = vsub.f32 1.0, %v2577_v62 }
0x1528   :  { %v2483_v0 = vadd.f32 %v3425_v29, %v2482_v49  ;;  %v2579_v3 = vmul.f32 %v3427_v53, %v2578_v1 }
0x152a   :  { %v2487_v24 = vsel %vm2486_vm3, %v3425_v29, %v2483_v0  ;;  %v2580_v44 = vadd.f32 %v3427_v53, %v2579_v3 }
0x152b   :  { %v2492_v28 = vsel %vm2489_vm5, %v2491_v5, %v2487_v24 }
0x152c   :  { %v2584_v27 = vsel %vm2583_vm7, %v3427_v53, %v2580_v44  ;;  %v2493_v54 = vmul.f32 %v3421_v26, %v2492_v28 }
0x152d   :  { %v2589_v34 = vsel %vm2586_vm9, %v2588_v32, %v2584_v27 }
0x152e   :  { %3220 = vmatmul.msk.f32.vlgmr.msra.gmra.mxu2 %vm437_vm8, %v2493_v54  ;;  %v2590_v45 = vmul.f32 %v3423_v20, %v2589_v34 }
0x152f   :  { %3232 = vmatpush.xpose.msk.msra.mxu2 %vm437_vm8, %v2680_v61 }
0x1530   :  { %3224 = vmatmul.msk.f32.vlgmr.msrb.gmra.mxu1 %vm437_vm8, %v2590_v45 }
0x1531   :  { %3236 = vmatpush.xpose.msk.msrb.mxu1 %vm437_vm8, %v2683_v6 }
0x1538   :  { %3230 = vmatmul.msk.f32.vlgmr.msra.gmra.mxu1 %vm155_vm0, %v4341_v2 }
0x1540   :  { %3231 = vmatmul.msk.f32.gmra.mxu1 %vm155_vm0, %v4349_v25 }
0x15ad   :  { %v2611_v37 = vpop.f32.mrf.mxu1 }
0x15ae   :  { %3225 = vmatmul.msk.f32.vlgmr.msrb.gmra.mxu2 %vm437_vm8, %v2611_v37 }
0x15b1   :  { %v2514_v14 = vpop.f32.mrf.mxu2 }
0x15b2   :  { %3221 = vmatmul.msk.f32.vlgmr.msra.gmra.mxu3 %vm437_vm8, %v2514_v14 }
0x15b3   :  { %2800 = vmatpush.msra.mxu3 %v4184_v8  ;;  %v2252_v8 = vadd.f32 %v4480_v11, %v4482_v51 }
0x15b5   :  { %v2703_v42 = vpop.f32.mrf.mxu1 }
0x15b6   :  { %2777 = vmatpush.msrb.mxu2 %v2703_v42 }
0x15ba   :  { %3226 = vmatmul.msk.f32.vlgmr.msrb.gmra.mxu3 %vm155_vm0, %v4341_v2 }
0x15bb   :  { %2971 = vmatpush.msrb.mxu3 %v4221_v50  ;;  %v3471_v50 = vld [vmem:[#allocation9 + $0x18] sm:$0xff] }
0x15bd   :  { %v2706_v13 = vpop.f32.mrf.mxu1  ;;  %2972 = vmatpush.msrb.mxu3 %v4224_v38 }
0x15be   :  { %2874 = vmatpush.msra.mxu1 %v2706_v13 }
0x15bf   :  { %2973 = vmatpush.msrb.mxu3 %v4227_v46 }
0x15c1   :  { %2974 = vmatpush.msrb.mxu3 %v4230_v41 }
0x15c2   :  { %3227 = vmatmul.msk.f32.gmra.mxu3 %vm155_vm0, %v4349_v25 }
0x1631   :  { %v2634_v46 = vpop.f32.mrf.mxu2 }
0x1632   :  { %v2637_v34 = vadd.f32 %v2634_v46, %v4484_v7 }
0x1635   :  { %v2537_v21 = vpop.f32.mrf.mxu3 }
0x1636   :  { %v4519_v33 = vadd.f32 %v2537_v21, %v2252_v8  ;;  %v3355_v8 = vld [vmem:[%s4675_s5] ss:$0 sm:$0xff] }
0x163d   :  { %v2655_v2 = vpop.f32.mrf.mxu3 }
0x163e   :  { %v2661_v35 = vmul.f32 0.35355338, %v2655_v2  ;;  %v192_v2 = vmul.f32 %v3355_v8, %v3793_v10 }
0x1640   :  { %3233 = vmatmul.msk.f32.vlgmr.msra.gmra.mxu2 %vm437_vm8, %v2661_v35  ;;  %v194_v35 = vsel %vm155_vm0, %v192_v2, 0.0 }
0x1641   :  { %2897 = vmatpush.msra.mxu2 %v3471_v50 }
0x1645   :  { %v2658_v38 = vpop.f32.mrf.mxu3 }
0x1646   :  { %v2662_v48 = vmul.f32 0.35355338, %v2658_v38 }
0x1648   :  { %3237 = vmatmul.msk.f32.vlgmr.msrb.gmra.mxu1 %vm437_vm8, %v2662_v48 }
0x16c3   :  { %v2732_v41 = vpop.f32.mrf.mxu2 }
0x16c4   :  { %v2735_v25 = vsel %vm437_vm8, %v2732_v41, -inf }
0x16c5   :  { %v2829_v36 = vpop.f32.mrf.mxu1  ;;  %2736 = vmax.xlane.f32.xlu0 %v2735_v25 }
0x16c6   :  { %v2832_v11 = vsel %vm437_vm8, %v2829_v36, -inf }
0x16c7   :  { %2833 = vmax.xlane.f32.xlu2 %v2832_v11 }
0x1738   :  { %v2737_v51 = vpop.xlane.xlu0 %2736 }
0x1739   :  { %v2738_v52 = vsub.f32 %v2732_v41, %v2737_v51 }
0x173a   :  { %v2834_v47 = vpop.xlane.xlu2 %2833 }
0x173b   :  { %v2739_v43 = vmul.f32 1.442695, %v2738_v52  ;;  %v2835_v18 = vsub.f32 %v2829_v36, %v2834_v47  ;;  %v200_v36 = vstv %s4754_s14 }
0x173d   :  { %3428 = vpow2.f32 %v2739_v43  ;;  %v2836_v22 = vmul.f32 1.442695, %v2835_v18 }
0x173f   :  { %3430 = vpow2.f32 %v2836_v22  ;;  %v1701_v22 = vmul.f32 %v3355_v8, %v4315_v57 }
0x1743   :  { %v3429_v16 = vpop.eup %3428 }
0x1744   :  { %v2741_v19 = vsel %vm437_vm8, %v3429_v16, 0.0 }
0x1745   :  { %v3431_v9 = vpop.eup %3430  ;;  %2742 = vadd.xlane.f32.xlu1 %v2741_v19  ;;  %v193_v19 = vmul.f32 %v3355_v8, %v3797_v15 }
0x1746   :  { %v2838_v26 = vsel %vm437_vm8, %v3431_v9, 0.0 }
0x1747   :  { %2839 = vadd.xlane.f32.xlu0 %v2838_v26  ;;  %v197_v26 = vsel %vm155_vm0, %v193_v19, 0.0 }
0x17b8   :  { %v2743_v12 = vpop.xlane.xlu1 %2742 }
0x17b9   :  { %3432 = vrcp.f32 %v2743_v12  ;;  %v2755_v53 = vand.u32 2147483648, %v2743_v12  ;;  %v2753_v62 = vand.u32 2147483647, %v2743_v12  ;;  %vm2749_vm11 = vweird.f32 %v2743_v12 }
0x17ba   :  { %v2840_v20 = vpop.xlane.xlu0 %2839 }
0x17bb   :  { %3434 = vrcp.f32 %v2840_v20  ;;  %v2852_v61 = vand.u32 2147483648, %v2840_v20  ;;  %v2850_v1 = vand.u32 2147483647, %v2840_v20  ;;  %v2756_v39 = vor.u32 1.1754944e-38, %v2755_v53 }
0x17bc   :  { %vm2754_vm14 = vcmp.eq.f32.partialorder %v2753_v62, 8.507059e+37  ;;  %vm2846_vm15 = vweird.f32 %v2840_v20  ;;  %v3639_v62 = vmov 0.0  }
0x17bd   :  { %v2853_v5 = vor.u32 1.1754944e-38, %v2852_v61  ;;  %vm2851_vm2 = vcmp.eq.f32.partialorder %v2850_v1, 8.507059e+37 }
0x17bf   :  { %v3433_v17 = vpop.eup %3432 }
0x17c0   :  { %v2745_v30 = vmul.f32 %v3433_v17, %v2743_v12  ;;  %vm2750_vm10 = vweird.f32 %v3433_v17 }
0x17c1   :  { %v3435_v31 = vpop.eup %3434  ;;  %vm2751_vm13 = vmor %vm2749_vm11, %vm2750_vm10 }
0x17c2   :  { %v2746_v29 = vsub.f32 1.0, %v2745_v30  ;;  %v2842_v55 = vmul.f32 %v3435_v31, %v2840_v20  ;;  %vm2847_vm12 = vweird.f32 %v3435_v31 }
0x17c3   :  { %vm2848_vm1 = vmor %vm2846_vm15, %vm2847_vm12 }
0x17c4   :  { %v2747_v56 = vmul.f32 %v3433_v17, %v2746_v29  ;;  %v2843_v60 = vsub.f32 1.0, %v2842_v55 }
0x17c6   :  { %v2748_v49 = vadd.f32 %v3433_v17, %v2747_v56  ;;  %v2844_v63 = vmul.f32 %v3435_v31, %v2843_v60 }
0x17c8   :  { %v2752_v0 = vsel %vm2751_vm13, %v3433_v17, %v2748_v49  ;;  %v2845_v3 = vadd.f32 %v3435_v31, %v2844_v63 }
0x17c9   :  { %v2757_v4 = vsel %vm2754_vm14, %v2756_v39, %v2752_v0 }
0x17ca   :  { %v2758_v24 = vmul.f32 %v3429_v16, %v2757_v4  ;;  %v2849_v44 = vsel %vm2848_vm1, %v3435_v31, %v2845_v3  ;;  %v1703_v16 = vsel %vm155_vm0, %v1701_v22, 0.0 }
0x17cb   :  { %v2854_v28 = vsel %vm2851_vm2, %v2853_v5, %v2849_v44 }
0x17cc   :  { %v2855_v32 = vmul.f32 %v3431_v9, %v2854_v28  ;;  %3234 = vmatmul.msk.f32.vlgmr.msrb.gmra.mxu2 %vm437_vm8, %v2758_v24 }
0x17ce   :  { %3238 = vmatmul.msk.f32.vlgmr.msra.gmra.mxu1 %vm437_vm8, %v2855_v32 }
0x184b   :  { %v2876_v27 = vpop.f32.mrf.mxu1 }
0x184c   :  { %3239 = vmatmul.msk.f32.vlgmr.msra.gmra.mxu2 %vm437_vm8, %v2876_v27 }
0x184f   :  { %v2779_v54 = vpop.f32.mrf.mxu2 }
0x1850   :  { %3235 = vmatmul.msk.f32.vlgmr.msra.gmra.mxu3 %vm437_vm8, %v2779_v54 }
0x18cf   :  { %v2899_v45 = vpop.f32.mrf.mxu2 }
0x18d0   :  { %v2902_v6 = vadd.f32 %v2899_v45, %v2637_v34 }
0x18d2   :  { %v4533_v37 = vadd.f32 %v2902_v6, %v4323_v58 }
0x18d3   :  { %v2802_v14 = vpop.f32.mrf.mxu3 }
0x18d4   :  { %v2805_v42 = vadd.f32 %v2802_v14, %v4519_v33  ;;  %v2908_v13 = vsel %vm155_vm0, %v4533_v37, 0.0  ;;  %v1702_v33 = vmul.f32 %v3355_v8, %v4323_v58 }
0x18d5   :  { %2909 = vadd.xlane.f32.xlu1 %v2908_v13 }
0x18d6   :  { %v4542_v21 = vadd.f32 %v2805_v42, %v4315_v57  ;;  %v1706_v50 = vsel %vm155_vm0, %v1702_v33, 0.0 }
0x18d8   :  { %v2905_v7 = vsel %vm155_vm0, %v4542_v21, 0.0 }
0x18d9   :  { %2906 = vadd.xlane.f32.xlu2 %v2905_v7 }
0x18dd   :  { %195 = vadd.xlane.f32.xlu1 %v194_v35 }
0x18e5   :  { %1707 = vadd.xlane.f32.xlu1 %v1706_v50 }
0x1948   :  { %v2910_v38 = vpop.xlane.xlu1 %2909 }
0x1949   :  { %v2912_v48 = vmul.f32 %v2910_v38, %v3801_v23 }
0x194b   :  { %v4552_v46 = vsub.f32 %v4533_v37, %v2912_v48 }
0x194c   :  { %v2907_v41 = vpop.xlane.xlu2 %2906 }
0x194d   :  { %v2911_v25 = vmul.f32 %v2907_v41, %v3801_v23  ;;  %v2916_v10 = vmul.f32 %v4552_v46, %v4552_v46 }
0x194f   :  { %v4561_v58 = vsub.f32 %v4542_v21, %v2911_v25  ;;  %v2920_v11 = vsel %vm155_vm0, %v2916_v10, 0.0 }
0x1950   :  { %2921 = vadd.xlane.f32.xlu2 %v2920_v11  ;;  %v196_v51 = vpop.xlane.xlu1 %195 }
0x1951   :  { %v201_v52 = vadd.f32 %v200_v36, %v196_v51  ;;  %v2915_v47 = vmul.f32 %v4561_v58, %v4561_v58 }
0x1953   :  { %v3110_v43 = vmul.f32 -1.442695, %v201_v52  ;;  %v2917_v18 = vsel %vm155_vm0, %v2915_v47, 0.0  ;;  %v3472_v47 = vld [vmem:[%s4682_s12] ss:$0 sm:$0xff] }
0x1954   :  { %2918 = vadd.xlane.f32.xlu0 %v2917_v18 }
0x1955   :  { %3436 = vpow2.f32 %v3110_v43  ;;  %v2925_v43 = vmul.f32 %v3472_v47, %v4561_v58  ;;  %v3473_v58 = vld [vmem:[%s4683_s13] ss:$0 sm:$0xff] }
0x1958   :  { %1704 = vadd.xlane.f32.xlu2 %v1703_v16  ;;  %v1708_v3 = vpop.xlane.xlu1 %1707 }
0x1959   :  { %v1710_v24 = vadd.f32 %v1708_v3, %v200_v36 }
0x195b   :  { %v3437_v9 = vpop.eup %3436  ;;  %v3177_v54 = vmul.f32 -1.442695, %v1710_v24 }
0x195c   :  { %v209_v12 = vadd.f32 1.0, %v3437_v9  ;;  %198 = vadd.xlane.f32.xlu0 %v197_v26 }
0x195e   :  { %3438 = vrcp.f32 %v209_v12  ;;  %v222_v31 = vand.u32 2147483648, %v209_v12  ;;  %v220_v57 = vand.u32 2147483647, %v209_v12  ;;  %vm216_vm3 = vweird.f32 %v209_v12 }
0x1960   :  { %v223_v53 = vor.u32 1.1754944e-38, %v222_v31  ;;  %vm221_vm6 = vcmp.eq.f32.partialorder %v220_v57, 8.507059e+37 }
0x1964   :  { %v3439_v20 = vpop.eup %3438 }
0x1965   :  { %v212_v17 = vmul.f32 %v3439_v20, %v209_v12  ;;  %vm217_vm8 = vweird.f32 %v3439_v20 }
0x1966   :  { %vm218_vm5 = vmor %vm216_vm3, %vm217_vm8 }
0x1967   :  { %v213_v30 = vsub.f32 1.0, %v212_v17 }
0x1969   :  { %v214_v29 = vmul.f32 %v3439_v20, %v213_v30  ;;  %v2926_v30 = vmul.f32 %v3472_v47, %v4552_v46 }
0x196b   :  { %v215_v55 = vadd.f32 %v3439_v20, %v214_v29 }
0x196d   :  { %v219_v56 = vsel %vm218_vm5, %v3439_v20, %v215_v55 }
0x196e   :  { %v224_v15 = vsel %vm221_vm6, %v223_v53, %v219_v56 }
0x196f   :  { %vm248_vm7 = vcmp.gt.f32.partialorder %v224_v15, 0.9  ;;  %vm256_vm9 = vcmp.le.f32.partialorder %v224_v15, 0.9 }
0x1970   :  { %v3112_v60 = vsel %vm248_vm7, 1.0, %v3639_v62  ;;  %v3114_v61 = vsel %vm256_vm9, 1.0, %v3639_v62 }
0x1971   :  { %v4573_v49 = vadd.f32 %v3114_v61, %v3112_v60  ;;  %v264_v8 = vmul.f32 %v3114_v61, %v224_v15 }
0x1973   :  { %v268_v50 = vsub.f32 1.0, %v264_v8 }
0x19c3   :  { %v2922_v63 = vpop.xlane.xlu2 %2921 }
0x19c4   :  { %v2924_v1 = vmul.f32 %v2922_v63, %v3801_v23 }
0x19c6   :  { %v2928_v39 = vadd.f32 1e-06, %v2924_v1 }
0x19c7   :  { %v2919_v0 = vpop.xlane.xlu0 %2918 }
0x19c8   :  { %3440 = vrsqrt.f32 %v2928_v39  ;;  %v2923_v4 = vmul.f32 %v2919_v0, %v3801_v23  ;;  %vm2945_vm14 = vweird.f32 %v2928_v39 }
0x19ca   :  { %v2927_v5 = vadd.f32 1e-06, %v2923_v4 }
0x19cb   :  { %v1705_v44 = vpop.xlane.xlu2 %1704 }
0x19cc   :  { %3442 = vrsqrt.f32 %v2927_v5  ;;  %v1709_v28 = vadd.f32 %v1705_v44, %v200_v36  ;;  %vm2935_vm11 = vweird.f32 %v2927_v5 }
0x19ce   :  { %v3441_v32 = vpop.eup %3440  ;;  %v3176_v27 = vmul.f32 -1.442695, %v1709_v28 }
0x19cf   :  { %v2940_v34 = vmul.f32 %v3441_v32, %v2928_v39  ;;  %v199_v45 = vpop.xlane.xlu0 %198  ;;  %vm2946_vm12 = vweird.f32 %v3441_v32 }
0x19d0   :  { %3444 = vpow2.f32 %v3176_v27  ;;  %v202_v6 = vadd.f32 %v200_v36, %v199_v45  ;;  %v4577_v36 = vmul.f32 %v3112_v60, %v268_v50  ;;  %vm2947_vm15 = vmor %vm2945_vm14, %vm2946_vm12 }
0x19d1   :  { %v2941_v14 = vmul.f32 %v3441_v32, %v2940_v34  ;;  %3446 = vpow2.f32 %v3177_v54 }
0x19d2   :  { %v3443_v42 = vpop.eup %3442  ;;  %v3111_v13 = vmul.f32 -1.442695, %v202_v6  ;;  %v274_v9 = vmul.f32 %v3112_v60, %v4577_v36 }
0x19d3   :  { %v2930_v7 = vmul.f32 %v3443_v42, %v2927_v5  ;;  %v2942_v2 = vmul.f32 0.5, %v2941_v14  ;;  %vm2936_vm10 = vweird.f32 %v3443_v42 }
0x19d4   :  { %3448 = vpow2.f32 %v3111_v13  ;;  %vm2937_vm13 = vmor %vm2935_vm11, %vm2936_vm10  ;;  %v4592_v29 = vadd.f32 %v274_v9, %v264_v8 }
0x19d5   :  { %v2931_v35 = vmul.f32 %v3443_v42, %v2930_v7  ;;  %v2943_v41 = vsub.f32 1.5, %v2942_v2 }
0x19d6   :  { %v3445_v33 = vpop.eup %3444  ;;  %vm1749_vm8 = vcmp.lt.f32.partialorder %v4592_v29, 1.0 }
0x19d7   :  { %v2932_v38 = vmul.f32 0.5, %v2931_v35  ;;  %v1717_v48 = vadd.f32 1.0, %v3445_v33  ;;  %v3447_v25 = vpop.eup %3446  ;;  %v2944_v22 = vmul.f32 %v3441_v32, %v2943_v41  ;;  %v3178_v28 = vsel %vm1749_vm8, 1.0, %v3639_v62 }
0x19d8   :  { %v4583_v18 = vadd.f32 1.0, %v3447_v25 }
0x19d9   :  { %v2933_v10 = vsub.f32 1.5, %v2932_v38  ;;  %3450 = vrcp.f32 %v1717_v48  ;;  %v2948_v12 = vsel %vm2947_vm15, %v3441_v32, %v2944_v22  ;;  %v1728_v53 = vand.u32 2147483647, %v1717_v48 }
0x19da   :  { %v3449_v11 = vpop.eup %3448  ;;  %v2950_v55 = vmul.f32 %v2948_v12, %v2926_v30  ;;  %v1730_v56 = vand.u32 2147483648, %v1717_v48  ;;  %vm1724_vm2 = vweird.f32 %v1717_v48  ;;  %v1743_v47 = vand.u32 2147483647, %v4583_v18 }
0x19db   :  { %v2934_v51 = vmul.f32 %v3443_v42, %v2933_v10  ;;  %v210_v52 = vadd.f32 1.0, %v3449_v11  ;;  %vm1729_vm5 = vcmp.eq.f32.partialorder %v1728_v53, 8.507059e+37 }
0x19dc   :  { %v2952_v46 = vadd.f32 %v3473_v58, %v2950_v55  ;;  %v1731_v0 = vor.u32 1.1754944e-38, %v1730_v56  ;;  %vm1744_vm8 = vcmp.eq.f32.partialorder %v1743_v47, 8.507059e+37 }
0x19dd   :  { %v2938_v16 = vsel %vm2937_vm13, %v3443_v42, %v2934_v51  ;;  %3452 = vrcp.f32 %v210_v52  ;;  %v237_v39 = vand.u32 2147483648, %v210_v52  ;;  %v235_v4 = vand.u32 2147483647, %v210_v52 }
0x19de   :  { %v2949_v19 = vmul.f32 %v2938_v16, %v2925_v43  ;;  %3454 = vrcp.f32 %v4583_v18  ;;  %vm231_vm7 = vweird.f32 %v210_v52  ;;  %v1745_v51 = vand.u32 2147483648, %v4583_v18 }
0x19df   :  { %v3451_v26 = vpop.eup %3450  ;;  %v238_v54 = vor.u32 1.1754944e-38, %v237_v39  ;;  %vm236_vm10 = vcmp.eq.f32.partialorder %v235_v4, 8.507059e+37 }
0x19e0   :  { %v2951_v20 = vadd.f32 %v3473_v58, %v2949_v19  ;;  %v1720_v17 = vmul.f32 %v3451_v26, %v1717_v48  ;;  %vm1725_vm1 = vweird.f32 %v3451_v26  ;;  %v1746_v16 = vor.u32 1.1754944e-38, %v1745_v51 }
0x19e1   :  { %vm1726_vm3 = vmor %vm1724_vm2, %vm1725_vm1  ;;  %vm1739_vm1 = vweird.f32 %v4583_v18 }
0x19e2   :  { %v1721_v31 = vsub.f32 1.0, %v1720_v17  ;;  %3240 = vmatmul.msk.f32.vlgmr.msrb.gmra.mxu3 %vm155_vm0, %v2951_v20 }
0x19e3   :  { %v3453_v57 = vpop.eup %3452 }
0x19e4   :  { %v227_v15 = vmul.f32 %v3453_v57, %v210_v52  ;;  %v1722_v60 = vmul.f32 %v3451_v26, %v1721_v31  ;;  %v3455_v61 = vpop.eup %3454  ;;  %vm232_vm6 = vweird.f32 %v3453_v57 }
0x19e5   :  { %v1735_v24 = vmul.f32 %v3455_v61, %v4583_v18  ;;  %vm233_vm9 = vmor %vm231_vm7, %vm232_vm6  ;;  %vm1740_vm15 = vweird.f32 %v3455_v61 }
0x19e6   :  { %v228_v63 = vsub.f32 1.0, %v227_v15  ;;  %v1723_v1 = vadd.f32 %v3451_v26, %v1722_v60  ;;  %vm1741_vm2 = vmor %vm1739_vm1, %vm1740_vm15 }
0x19e7   :  { %v1736_v6 = vsub.f32 1.0, %v1735_v24  ;;  %v1689_v24 = vsub.f32 1.0, %v4592_v29 }
0x19e8   :  { %v229_v3 = vmul.f32 %v3453_v57, %v228_v63  ;;  %v1727_v5 = vsel %vm1726_vm3, %v3451_v26, %v1723_v1 }
0x19e9   :  { %v4596_v44 = vsel %vm1729_vm5, %v1731_v0, %v1727_v5  ;;  %v1737_v50 = vmul.f32 %v3455_v61, %v1736_v6 }
0x19ea   :  { %v230_v32 = vadd.f32 %v3453_v57, %v229_v3  ;;  %3241 = vmatmul.msk.f32.gmra.mxu3 %vm155_vm0, %v2952_v46  ;;  %v1755_v27 = vmul.f32 %v3178_v28, %v4596_v44 }
0x19eb   :  { %v1738_v11 = vadd.f32 %v3455_v61, %v1737_v50 }
0x19ec   :  { %v234_v34 = vsel %vm233_vm9, %v3453_v57, %v230_v32  ;;  %v1757_v45 = vadd.f32 %v1755_v27, %v4592_v29  ;;  %v3474_v57 = vld [vmem:[%s4685_s15] ss:$0 sm:$0xff]  ;;  %v1691_v27 = vmul.f32 0.0, %v1689_v24 }
0x19ed   :  { %v239_v14 = vsel %vm236_vm10, %v238_v54, %v234_v34  ;;  %v1742_v22 = vsel %vm1741_vm2, %v3455_v61, %v1738_v11  ;;  %v3475_v54 = vld [vmem:[%s4687_s17] ss:$0 sm:$0xff]  ;;  %vm3081_vm10 = vcmask 269312  }
0x19ee   :  { %vm1759_vm11 = vcmp.gt.f32.partialorder %v1757_v45, 0.9  ;;  %vm1767_vm12 = vcmp.le.f32.partialorder %v1757_v45, 0.9  ;;  %vm249_vm13 = vcmp.gt.f32.partialorder %v239_v14, 0.9 }
0x19ef   :  { %v3180_v42 = vsel %vm1759_vm11, 1.0, %v3639_v62  ;;  %v3182_v13 = vsel %vm1767_vm12, 1.0, %v3639_v62  ;;  %v3113_v8 = vsel %vm249_vm13, 1.0, %v3639_v62  ;;  %vm257_vm14 = vcmp.le.f32.partialorder %v239_v14, 0.9 }
0x19f0   :  { %v1773_v7 = vmul.f32 %v3182_v13, %v3178_v28  ;;  %v3115_v2 = vsel %vm257_vm14, 1.0, %v3639_v62  ;;  %v1765_v38 = vmul.f32 %v3180_v42, %v3178_v28  ;;  %vm3084_vm12 = vcmask 277504  }
0x19f1   :  { %v265_v35 = vmul.f32 %v3115_v2, %v239_v14  ;;  %v281_v33 = vadd.f32 %v3115_v2, %v3113_v8 }
0x19f2   :  { %v1785_v48 = vadd.f32 %v1773_v7, %v4573_v49  ;;  %v1747_v49 = vsel %vm1744_vm8, %v1746_v16, %v1742_v22 }
0x19f3   :  { %v269_v41 = vsub.f32 1.0, %v265_v35 }
0x19f4   :  { %v4607_v25 = vadd.f32 %v1785_v48, %v1765_v38 }
0x19f5   :  { %v271_v10 = vmul.f32 %v3113_v8, %v269_v41 }
0x19f7   :  { %v275_v52 = vmul.f32 %v3113_v8, %v271_v10 }
0x19f9   :  { %v277_v43 = vadd.f32 %v275_v52, %v265_v35 }
0x19fb   :  { %vm1750_vm3 = vcmp.lt.f32.partialorder %v277_v43, 1.0  ;;  %v1690_v13 = vsub.f32 1.0, %v277_v43  ;;  %v1688_v41 = vmul.f32 %v4320_v59, %v277_v43 }
0x19fc   :  { %v3179_v19 = vsel %vm1750_vm3, 1.0, %v3639_v62 }
0x19fd   :  { %v1756_v9 = vmul.f32 %v3179_v19, %v1747_v49 }
0x19ff   :  { %v1758_v26 = vadd.f32 %v1756_v9, %v277_v43 }
0x1a01   :  { %vm1760_vm5 = vcmp.gt.f32.partialorder %v1758_v26, 0.9  ;;  %vm1768_vm6 = vcmp.le.f32.partialorder %v1758_v26, 0.9 }
0x1a02   :  { %v3181_v12 = vsel %vm1760_vm5, 1.0, %v3639_v62  ;;  %v3183_v58 = vsel %vm1768_vm6, 1.0, %v3639_v62  ;;  %v1775_v62 = vmul.f32 %v1773_v7, %v4596_v44 }
0x1a03   :  { %v1774_v20 = vmul.f32 %v3183_v58, %v3179_v19  ;;  %v1766_v17 = vmul.f32 %v3181_v12, %v3179_v19 }
0x1a04   :  { %v1777_v61 = vadd.f32 %v1775_v62, %v4592_v29 }
0x1a05   :  { %v1786_v18 = vadd.f32 %v1774_v20, %v281_v33  ;;  %v1776_v1 = vmul.f32 %v1774_v20, %v1747_v49  ;;  %v1692_v33 = vmul.f32 0.0, %v1690_v13 }
0x1a06   :  { %v1779_v63 = vsub.f32 1.0, %v1777_v61 }
0x1a07   :  { %v4615_v30 = vadd.f32 %v1786_v18, %v1766_v17  ;;  %v1778_v46 = vadd.f32 %v1776_v1, %v277_v43 }
0x1a08   :  { %v1781_v39 = vmul.f32 %v1779_v63, %v1765_v38 }
0x1a09   :  { %v1780_v3 = vsub.f32 1.0, %v1778_v46 }
0x1a0a   :  { %v4625_v0 = vadd.f32 %v1781_v39, %v4577_v36  ;;  %v1687_v36 = vmul.f32 %v4309_v40, %v4592_v29  ;;  %v1694_v29 = vadd.f32 %v1692_v33, %v1688_v41 }
0x1a0b   :  { %v1782_v5 = vmul.f32 %v1780_v3, %v1766_v17 }
0x1a0c   :  { %v1789_v4 = vmul.f32 %v4625_v0, %v1765_v38  ;;  %v1693_v42 = vadd.f32 %v1691_v27, %v1687_v36 }
0x1a0d   :  { %v4629_v32 = vadd.f32 %v1782_v5, %v271_v10 }
0x1a0e   :  { %v1791_v28 = vadd.f32 %v1789_v4, %v1775_v62 }
0x1a0f   :  { %v1790_v6 = vmul.f32 %v4629_v32, %v1766_v17 }
0x1a10   :  { %v3017_v45 = vsub.f32 1.0, %v1791_v28 }
0x1a11   :  { %v1792_v2 = vadd.f32 %v1790_v6, %v1776_v1 }
0x1a12   :  { %v3019_v7 = vmul.f32 %v3017_v45, %v1693_v42 }
0x1a13   :  { %v3018_v10 = vsub.f32 1.0, %v1792_v2 }
0x1a65   :  { %v2976_v31 = vpop.f32.mrf.mxu3 }
0x1a66   :  { %v2977_v55 = vadd.f32 %v3474_v57, %v2976_v31 }
0x1a68   :  { %v2982_v53 = vmax.f32 %v2977_v55, 0.0 }
0x1a6a   :  { %3242 = vmatmul.msk.f32.vlgmr.msra.gmra.mxu0 %vm1655_vm4, %v2982_v53 }
0x1a6d   :  { %v2979_v56 = vpop.f32.mrf.mxu3 }
0x1a6e   :  { %v2980_v15 = vadd.f32 %v3474_v57, %v2979_v56 }
0x1a70   :  { %v2983_v60 = vmax.f32 %v2980_v15, 0.0  ;;  %v3356_v15 = vld [vmem:[%s4688_s18] ss:$0 sm:$0xff]  ;;  %s3640_s18 = smov [#allocation12]  }
0x1a72   :  { %3243 = vmatmul.msk.f32.gmra.mxu0 %vm1655_vm4, %v2983_v60 }
0x1ae7   :  { %v3007_v44 = vpop.f32.mrf.mxu0 }
0x1ae8   :  { %v3008_v34 = vadd.f32 %v3475_v54, %v3007_v44 }
0x1aea   :  { %v3013_v14 = vadd.f32 %v3008_v34, %v4542_v21  ;;  %v3020_v21 = vmul.f32 %v3018_v10, %v1694_v29 }
0x1aec   :  { %v3015_v8 = vmul.f32 %v3013_v14, %v1791_v28 }
0x1aee   :  { %v3021_v35 = vadd.f32 %v3019_v7, %v3015_v8 }
0x1aef   :  { %v3010_v50 = vpop.f32.mrf.mxu0 }
0x1af0   :  { %v3011_v38 = vadd.f32 %v3475_v54, %v3010_v50  ;;  %v3025_v48 = vsel %vm155_vm0, %v3021_v35, 0.0 }
0x1af1   :  { %3026 = vadd.xlane.f32.xlu0 %v3025_v48 }
0x1af2   :  { %v3014_v40 = vadd.f32 %v3011_v38, %v4533_v37 }
0x1af4   :  { %v3016_v11 = vmul.f32 %v3014_v40, %v1792_v2 }
0x1af6   :  { %v3022_v51 = vadd.f32 %v3020_v21, %v3016_v11 }
0x1af8   :  { %v3028_v52 = vsel %vm155_vm0, %v3022_v51, 0.0 }
0x1af9   :  { %3029 = vadd.xlane.f32.xlu2 %v3028_v52 }
0x1b64   :  { %v3027_v47 = vpop.xlane.xlu0 %3026 }
0x1b65   :  { %v3031_v22 = vmul.f32 %v3027_v47, %v3801_v23 }
0x1b67   :  { %v3033_v16 = vsub.f32 %v3021_v35, %v3031_v22 }
0x1b69   :  { %v3035_v49 = vmul.f32 %v3033_v16, %v3033_v16  ;;  %v3048_v1 = vmul.f32 %v3356_v15, %v3033_v16 }
0x1b6b   :  { %v3037_v19 = vsel %vm155_vm0, %v3035_v49, 0.0 }
0x1b6c   :  { %3038 = vadd.xlane.f32.xlu1 %v3037_v19  ;;  %v3030_v59 = vpop.xlane.xlu2 %3029 }
0x1b6d   :  { %v3032_v43 = vmul.f32 %v3030_v59, %v3801_v23 }
0x1b6f   :  { %v3034_v9 = vsub.f32 %v3022_v51, %v3032_v43 }
0x1b71   :  { %v3036_v37 = vmul.f32 %v3034_v9, %v3034_v9  ;;  %v3049_v54 = vmul.f32 %v3356_v15, %v3034_v9 }
0x1b73   :  { %v3040_v26 = vsel %vm155_vm0, %v3036_v37, 0.0 }
0x1b74   :  { %3041 = vadd.xlane.f32.xlu0 %v3040_v26 }
0x1bdf   :  { %v3039_v12 = vpop.xlane.xlu1 %3038 }
0x1be0   :  { %v3043_v58 = vmul.f32 %v3039_v12, %v3801_v23 }
0x1be2   :  { %v3050_v20 = vadd.f32 1e-06, %v3043_v58 }
0x1be4   :  { %3456 = vrsqrt.f32 %v3050_v20  ;;  %vm3058_vm7 = vweird.f32 %v3050_v20 }
0x1be7   :  { %v3042_v17 = vpop.xlane.xlu0 %3041 }
0x1be8   :  { %v3044_v18 = vmul.f32 %v3042_v17, %v3801_v23  ;;  %v3357_v23 = vld [vmem:[%s4689_s19] ss:$0 sm:$0xff]  ;;  %s3091_s19 = sshll.u32 %s3640_s18, 4  ;;  %s3092_s19 = int_to_ptr.vmem [resolvable:$true] %s3091_s19 }
0x1bea   :  { %v3457_v31 = vpop.eup %3456  ;;  %v3051_v57 = vadd.f32 1e-06, %v3044_v18 }
0x1beb   :  { %v3053_v55 = vmul.f32 %v3457_v31, %v3050_v20  ;;  %vm3059_vm4 = vweird.f32 %v3457_v31 }
0x1bec   :  { %3458 = vrsqrt.f32 %v3051_v57  ;;  %vm3060_vm9 = vmor %vm3058_vm7, %vm3059_vm4  ;;  %vm3068_vm13 = vweird.f32 %v3051_v57 }
0x1bed   :  { %v3054_v53 = vmul.f32 %v3457_v31, %v3053_v55 }
0x1bef   :  { %v3055_v56 = vmul.f32 0.5, %v3054_v53 }
0x1bf1   :  { %v3056_v60 = vsub.f32 1.5, %v3055_v56 }
0x1bf2   :  { %v3459_v62 = vpop.eup %3458 }
0x1bf3   :  { %v3057_v61 = vmul.f32 %v3457_v31, %v3056_v60  ;;  %v3063_v63 = vmul.f32 %v3459_v62, %v3051_v57  ;;  %vm3069_vm11 = vweird.f32 %v3459_v62 }
0x1bf4   :  { %vm3070_vm14 = vmor %vm3068_vm13, %vm3069_vm11 }
0x1bf5   :  { %v3061_v39 = vsel %vm3060_vm9, %v3457_v31, %v3057_v61  ;;  %v3064_v46 = vmul.f32 %v3459_v62, %v3063_v63 }
0x1bf6   :  { %v3072_v3 = vmul.f32 %v3061_v39, %v3048_v1 }
0x1bf7   :  { %v3065_v4 = vmul.f32 0.5, %v3064_v46 }
0x1bf8   :  { %v3077_v5 = vadd.f32 %v3357_v23, %v3072_v3 }
0x1bf9   :  { %v3066_v24 = vsub.f32 1.5, %v3065_v4 }
0x1bfa   :  { %v3079_v28 = vsel %vm155_vm0, %v3077_v5, %v4625_v0 }
0x1bfb   :  { %v3067_v27 = vmul.f32 %v3459_v62, %v3066_v24  ;;  %v3082_v44 = vsel %vm3081_vm10, %v3079_v28, %v4607_v25 }
0x1bfc   :  { %3085 = vst.msk [vmem:[#allocation12] sm:$0xff] %vm3084_vm12, %v3082_v44 }
0x1bfd   :  { %v3071_v34 = vsel %vm3070_vm14, %v3459_v62, %v3067_v27 }
0x1bfe   :  { %v3073_v36 = vmul.f32 %v3071_v34, %v3049_v54 }
0x1c00   :  { %v3078_v45 = vadd.f32 %v3357_v23, %v3073_v36 }
0x1c02   :  { %v3080_v0 = vsel %vm155_vm0, %v3078_v45, %v4629_v32 }
0x1c03   :  { %v3083_v25 = vsel %vm3081_vm10, %v3080_v0, %v4615_v30 }
0x1c04   :  { %3086 = vst.msk [vmem:[#allocation12 + $0x8] sm:$0xff] %vm3084_vm12, %v3083_v25 }
0x1c05   :  { %3099 = dma.vmem_to_hbm [thread:$0]  %s3092_s19, 256, %s3094_s16, [#allocation5], %s3629_s28, %s3629_s28, %s3630_s4  }
0x1c06   :  { %3626 = dma.done.wait [#allocation5], 256  }
0x1c07   :  { %3627 = vsyncadd [#allocation5], 4294967040 }
0x1c08   :  { %3104 = vsyncpa [#allocation4], 1 }
0x1c09   :  { %3105 = vsyncpa [#allocation7], 1 }
0x1c0a   :  { %3106 = vsyncpa [#allocation10], 1 }
0x1c0b   :  { %3107 = vsyncpa [#allocation5], 1 }

</bundles_post_ra>
